<compile_context>
chip_gen: v7x
topology: tpu7x:2x2x1
jax: 0.10.0
libtpu: 0.0.40
codegen_flags: <defaults>
</compile_context>

<pallas_src>
import functools

import jax
import jax.numpy as jnp
from jax.experimental import pallas as pl
from jax.experimental.pallas import tpu as pltpu


def _round_up(x, m):
    return ((x + m - 1) // m) * m


# ----------------------------- Pallas kernel ------------------------------ #
def _matmul_lrelu_kernel(a_ref, w_ref, o_ref, acc_ref, *, negative_slope,
                         apply_act):
    """Tiled (tm, tk) @ (tk, N) with f32 accumulation + fused LeakyReLU."""
    k = pl.program_id(1)

    @pl.when(k == 0)
    def _():
        acc_ref[...] = jnp.zeros_like(acc_ref)

    acc_ref[...] += jnp.dot(a_ref[...], w_ref[...],
                            preferred_element_type=jnp.float32)

    @pl.when(k == pl.num_programs(1) - 1)
    def _():
        acc = acc_ref[...]
        if apply_act:
            acc = jnp.where(acc >= 0.0, acc, acc * negative_slope)
        o_ref[...] = acc.astype(o_ref.dtype)


def _pallas_matmul_lrelu(a, w, apply_act, out_dtype, negative_slope=0.2,
                         tm_target=512, tk_target=1024):
    """a: (M, K) f32/bf16, w: (K, N) f32.  Returns (M, N) in out_dtype."""
    M, K = a.shape
    K2, N = w.shape
    assert K == K2

    # Lane-dense output: pad N (Cout) to a multiple of 128.
    n_pad = _round_up(N, 128)

    # M tiles: multiple of 16 (bf16 sublane packing), capped at tm_target.
    m_pad = _round_up(M, 16)
    if m_pad > tm_target:
        m_pad = _round_up(M, tm_target)
        tm = tm_target
    else:
        tm = m_pad

    # K tiles: multiple of 128 lanes, capped at tk_target (reduction axis).
    k_pad = _round_up(K, 128)
    if k_pad > tk_target:
        k_pad = _round_up(K, tk_target)
        tk = tk_target
    else:
        tk = k_pad

    a_p = a if (m_pad, k_pad) == (M, K) else jnp.pad(
        a, ((0, m_pad - M), (0, k_pad - K)))
    w_p = w if (k_pad, n_pad) == (K, N) else jnp.pad(
        w, ((0, k_pad - K), (0, n_pad - N)))

    # bf16 operands -> native MXU path; f32 accumulation inside the kernel.
    a_p = a_p.astype(jnp.bfloat16)
    w_p = w_p.astype(jnp.bfloat16)

    grid = (m_pad // tm, k_pad // tk)
    kernel = functools.partial(_matmul_lrelu_kernel,
                               negative_slope=negative_slope,
                               apply_act=apply_act)

    out = pl.pallas_call(
        kernel,
        out_shape=jax.ShapeDtypeStruct((m_pad, n_pad), out_dtype),
        grid=grid,
        in_specs=[
            pl.BlockSpec((tm, tk), lambda i, k: (i, k)),
            pl.BlockSpec((tk, n_pad), lambda i, k: (k, 0)),
        ],
        out_specs=pl.BlockSpec((tm, n_pad), lambda i, k: (i, 0)),
        scratch_shapes=[pltpu.VMEM((tm, n_pad), jnp.float32)],
        compiler_params=pltpu.CompilerParams(
            dimension_semantics=("parallel", "arbitrary")),
    )(a_p, w_p)

    if (m_pad, n_pad) != (M, N):
        out = out[:M, :N]
    return out


# ------------------------------ conv wrapper ------------------------------ #
def _im2col(x, k, stride, pad):
    """x: NHWC.  pad = (top, bottom, left, right).  Returns (M, k*k*C)."""
    x = jnp.pad(x, ((0, 0), (pad[0], pad[1]), (pad[2], pad[3]), (0, 0)))
    N, Hp, Wp, C = x.shape
    Hout = (Hp - k) // stride + 1
    Wout = (Wp - k) // stride + 1
    cols = []
    for kh in range(k):
        for kw in range(k):
            cols.append(
                x[:, kh:kh + stride * Hout:stride,
                  kw:kw + stride * Wout:stride, :]
            )
    patches = jnp.stack(cols, axis=3)  # (N, Hout, Wout, k*k, C)
    patches = patches.reshape(N * Hout * Wout, k * k * C)
    return patches, (N, Hout, Wout)


def conv2d_pallas(x, w_oikk, stride, pad, apply_act, out_dtype):
    """Bias-free conv. x: NHWC. w_oikk: PyTorch (Cout, Cin, kh, kw)."""
    Cout, Cin, kh, kw = w_oikk.shape
    assert kh == kw
    # (Cout, Cin, kh, kw) -> (kh, kw, Cin, Cout) -> (kh*kw*Cin, Cout)
    # matches the im2col column ordering (kh, kw, cin).
    w_mat = jnp.transpose(w_oikk, (2, 3, 1, 0)).reshape(kh * kw * Cin, Cout)
    patches, (N, Hout, Wout) = _im2col(x, kh, stride, pad)
    out = _pallas_matmul_lrelu(patches, w_mat, apply_act, out_dtype)
    return out.reshape(N, Hout, Wout, Cout)


# ---------------------------- model definition ---------------------------- #
_WEIGHT_SHAPES = [
    (64, 6, 4, 4),     # Conv2d(6, 64, 4, 2, 1, bias=False)
    (128, 64, 4, 4),   # Conv2d(64, 128, 4, 2, 1, bias=False)
    (256, 128, 4, 4),  # Conv2d(128, 256, 4, 2, 1, bias=False)
    (512, 256, 4, 4),  # Conv2d(256, 512, 4, 2, 1, bias=False)
    (1, 512, 4, 4),    # Conv2d(512, 1, 4, padding=1, bias=False)
]


def init_discriminator_params(key):
    params = []
    for shape in _WEIGHT_SHAPES:
        key, sub = jax.random.split(key)
        params.append(0.05 * jax.random.normal(sub, shape, dtype=jnp.float32))
    return params


def discriminator_forward(params, img_A, img_B):
    """img_A, img_B: NCHW float32, 3 channels each. Returns NCHW logits."""
    x = jnp.concatenate([img_A, img_B], axis=1)      # (N, 6, H, W)
    x = jnp.transpose(x, (0, 2, 3, 1))               # NHWC
    # Four stride-2 convs with fused LeakyReLU(0.2); bf16 intermediates.
    for w in params[:4]:
        x = conv2d_pallas(x, w, stride=2, pad=(1, 1, 1, 1),
                          apply_act=True, out_dtype=jnp.bfloat16)
    # nn.ZeroPad2d((1, 0, 1, 0)): (left=1, right=0, top=1, bottom=0).
    x = jnp.pad(x, ((0, 0), (1, 0), (1, 0), (0, 0)))
    # Final Conv2d(512, 1, 4, padding=1, bias=False), no activation, f32 out.
    x = conv2d_pallas(x, params[4], stride=1, pad=(1, 1, 1, 1),
                      apply_act=False, out_dtype=jnp.float32)
    return jnp.transpose(x, (0, 3, 1, 2))            # back to NCHW


# --------------------------------- driver --------------------------------- #
if __name__ == "__main__":
    key = jax.random.PRNGKey(0)
    k_params, k_a, k_b = jax.random.split(key, 3)

    params = init_discriminator_params(k_params)

    # Small, module-consistent shapes: batch=2, 3 channels each, 32x32 spatial.
    img_A = jax.random.normal(k_a, (2, 3, 32, 32), dtype=jnp.float32)
    img_B = jax.random.normal(k_b, (2, 3, 32, 32), dtype=jnp.float32)

    out = jax.jit(discriminator_forward)(params, img_A, img_B)
    out = jax.block_until_ready(out)

    # 32 -> 16 -> 8 -> 4 -> 2 -> (zero-pad) 3 -> final conv -> 2
    assert out.shape == (2, 1, 2, 2), out.shape
    assert out.dtype == jnp.float32
    assert bool(jnp.all(jnp.isfinite(out)))

    print("KERNEL_OK")
</pallas_src>

<mosaic_0001>
module attributes {stable_mosaic.version = 11 : i64} {
  func.func @_matmul_lrelu_kernel(%arg0: i32, %arg1: i32, %arg2: memref<512x128xbf16, #tpu.memory_space<vmem>>, %arg3: memref<128x128xbf16, #tpu.memory_space<vmem>>, %arg4: memref<512x128xbf16, #tpu.memory_space<vmem>>, %arg5: memref<512x128xf32, #tpu.memory_space<vmem>>) attributes {dimension_semantics = [#tpu.dimension_semantics<parallel>, #tpu.dimension_semantics<arbitrary>], iteration_bounds = array<i64: 1, 1>, scalar_prefetch = 0 : i64, scratch_operands = 1 : i64, tpu.core_type = #tpu.core_type<tc>, window_params = [{transform_indices = @transform_0, window_bounds = array<i64: 512, 128>}, {transform_indices = @transform_1, window_bounds = array<i64: 128, 128>}, {transform_indices = @transform_2, window_bounds = array<i64: 512, 128>}]} {
    %c0_i32 = arith.constant 0 : i32
    %0 = arith.cmpi eq, %arg1, %c0_i32 : i32
    %1 = arith.extui %0 : i1 to i32
    %c0_i32_0 = arith.constant 0 : i32
    %2 = arith.cmpi ne, %1, %c0_i32_0 : i32
    scf.if %2 {
      %cst_10 = arith.constant 0.000000e+00 : f32
      %12 = vector.broadcast %cst_10 : f32 to vector<512x128xf32>
      %c0_11 = arith.constant 0 : index
      %c0_12 = arith.constant 0 : index
      %13 = vector.load %arg5[%c0_11, %c0_12] : memref<512x128xf32, #tpu.memory_space<vmem>>, vector<512x128xf32>
      tpu.vector_store %arg5[%c0_11, %c0_12], %12 {strides = array<i32>} : memref<512x128xf32, #tpu.memory_space<vmem>>, vector<512x128xf32>,
    } else {
    }
    %c0 = arith.constant 0 : index
    %c0_1 = arith.constant 0 : index
    %3 = vector.load %arg5[%c0, %c0_1] : memref<512x128xf32, #tpu.memory_space<vmem>>, vector<512x128xf32>
    %c0_2 = arith.constant 0 : index
    %c0_3 = arith.constant 0 : index
    %4 = vector.load %arg2[%c0_2, %c0_3] : memref<512x128xbf16, #tpu.memory_space<vmem>>, vector<512x128xbf16>
    %c0_4 = arith.constant 0 : index
    %c0_5 = arith.constant 0 : index
    %5 = vector.load %arg3[%c0_4, %c0_5] : memref<128x128xbf16, #tpu.memory_space<vmem>>, vector<128x128xbf16>
    %cst = arith.constant dense<0.000000e+00> : vector<512x128xf32>
    %6 = tpu.matmul %4, %5, %cst {dimension_numbers = #tpu.dot_dimension_numbers<[1], [0], [0], [1], [0, 0, 1, 1], [], []>} : vector<512x128xbf16>, vector<128x128xbf16>, vector<512x128xf32> -> vector<512x128xf32>
    %7 = arith.addf %3, %6 : vector<512x128xf32>
    %c0_6 = arith.constant 0 : index
    %c0_7 = arith.constant 0 : index
    %8 = vector.load %arg5[%c0_6, %c0_7] : memref<512x128xf32, #tpu.memory_space<vmem>>, vector<512x128xf32>
    tpu.vector_store %arg5[%c0_6, %c0_7], %7 {strides = array<i32>} : memref<512x128xf32, #tpu.memory_space<vmem>>, vector<512x128xf32>,
    %c0_i32_8 = arith.constant 0 : i32
    %9 = arith.cmpi eq, %arg1, %c0_i32_8 : i32
    %10 = arith.extui %9 : i1 to i32
    %c0_i32_9 = arith.constant 0 : i32
    %11 = arith.cmpi ne, %10, %c0_i32_9 : i32
    scf.if %11 {
      %c0_10 = arith.constant 0 : index
      %c0_11 = arith.constant 0 : index
      %12 = vector.load %arg5[%c0_10, %c0_11] : memref<512x128xf32, #tpu.memory_space<vmem>>, vector<512x128xf32>
      %cst_12 = arith.constant 0.000000e+00 : f32
      %13 = vector.broadcast %cst_12 : f32 to vector<512x128xf32>
      %14 = arith.cmpf oge, %12, %13 : vector<512x128xf32>
      %cst_13 = arith.constant 2.000000e-01 : f32
      %15 = vector.broadcast %cst_13 : f32 to vector<512x128xf32>
      %16 = arith.mulf %12, %15 : vector<512x128xf32>
      %17 = arith.select %14, %12, %16 : vector<512x128xi1>, vector<512x128xf32>
      %18 = arith.truncf %17 : vector<512x128xf32> to vector<512x128xbf16>
      %c0_14 = arith.constant 0 : index
      %c0_15 = arith.constant 0 : index
      %19 = vector.load %arg4[%c0_14, %c0_15] : memref<512x128xbf16, #tpu.memory_space<vmem>>, vector<512x128xbf16>
      tpu.vector_store %arg4[%c0_14, %c0_15], %18 {strides = array<i32>} : memref<512x128xbf16, #tpu.memory_space<vmem>>, vector<512x128xbf16>,
    } else {
    }
    return
  }
  func.func @transform_0(%arg0: i32, %arg1: i32) -> (i32, i32) {
    %c0_i32 = arith.constant 0 : i32
    return %arg0, %arg1 : i32, i32
  }
  func.func @transform_1(%arg0: i32, %arg1: i32) -> (i32, i32) {
    %c0_i32 = arith.constant 0 : i32
    %c0_i32_0 = arith.constant 0 : i32
    return %arg1, %c0_i32 : i32, i32
  }
  func.func @transform_2(%arg0: i32, %arg1: i32) -> (i32, i32) {
    %c0_i32 = arith.constant 0 : i32
    %c0_i32_0 = arith.constant 0 : i32
    return %arg0, %c0_i32 : i32, i32
  }
}

module attributes {stable_mosaic.version = 11 : i64} {
  func.func @_matmul_lrelu_kernel(%arg0: i32, %arg1: i32, %arg2: memref<128x1024xbf16, #tpu.memory_space<vmem>>, %arg3: memref<1024x128xbf16, #tpu.memory_space<vmem>>, %arg4: memref<128x128xbf16, #tpu.memory_space<vmem>>, %arg5: memref<128x128xf32, #tpu.memory_space<vmem>>) attributes {dimension_semantics = [#tpu.dimension_semantics<parallel>, #tpu.dimension_semantics<arbitrary>], iteration_bounds = array<i64: 1, 1>, scalar_prefetch = 0 : i64, scratch_operands = 1 : i64, tpu.core_type = #tpu.core_type<tc>, window_params = [{transform_indices = @transform_0, window_bounds = array<i64: 128, 1024>}, {transform_indices = @transform_1, window_bounds = array<i64: 1024, 128>}, {transform_indices = @transform_2, window_bounds = array<i64: 128, 128>}]} {
    %c0_i32 = arith.constant 0 : i32
    %0 = arith.cmpi eq, %arg1, %c0_i32 : i32
    %1 = arith.extui %0 : i1 to i32
    %c0_i32_0 = arith.constant 0 : i32
    %2 = arith.cmpi ne, %1, %c0_i32_0 : i32
    scf.if %2 {
      %cst_10 = arith.constant 0.000000e+00 : f32
      %12 = vector.broadcast %cst_10 : f32 to vector<128x128xf32>
      %c0_11 = arith.constant 0 : index
      %c0_12 = arith.constant 0 : index
      %13 = vector.load %arg5[%c0_11, %c0_12] : memref<128x128xf32, #tpu.memory_space<vmem>>, vector<128x128xf32>
      tpu.vector_store %arg5[%c0_11, %c0_12], %12 {strides = array<i32>} : memref<128x128xf32, #tpu.memory_space<vmem>>, vector<128x128xf32>,
    } else {
    }
    %c0 = arith.constant 0 : index
    %c0_1 = arith.constant 0 : index
    %3 = vector.load %arg5[%c0, %c0_1] : memref<128x128xf32, #tpu.memory_space<vmem>>, vector<128x128xf32>
    %c0_2 = arith.constant 0 : index
    %c0_3 = arith.constant 0 : index
    %4 = vector.load %arg2[%c0_2, %c0_3] : memref<128x1024xbf16, #tpu.memory_space<vmem>>, vector<128x1024xbf16>
    %c0_4 = arith.constant 0 : index
    %c0_5 = arith.constant 0 : index
    %5 = vector.load %arg3[%c0_4, %c0_5] : memref<1024x128xbf16, #tpu.memory_space<vmem>>, vector<1024x128xbf16>
    %cst = arith.constant dense<0.000000e+00> : vector<128x128xf32>
    %6 = tpu.matmul %4, %5, %cst {dimension_numbers = #tpu.dot_dimension_numbers<[1], [0], [0], [1], [0, 0, 1, 1], [], []>} : vector<128x1024xbf16>, vector<1024x128xbf16>, vector<128x128xf32> -> vector<128x128xf32>
    %7 = arith.addf %3, %6 : vector<128x128xf32>
    %c0_6 = arith.constant 0 : index
    %c0_7 = arith.constant 0 : index
    %8 = vector.load %arg5[%c0_6, %c0_7] : memref<128x128xf32, #tpu.memory_space<vmem>>, vector<128x128xf32>
    tpu.vector_store %arg5[%c0_6, %c0_7], %7 {strides = array<i32>} : memref<128x128xf32, #tpu.memory_space<vmem>>, vector<128x128xf32>,
    %c0_i32_8 = arith.constant 0 : i32
    %9 = arith.cmpi eq, %arg1, %c0_i32_8 : i32
    %10 = arith.extui %9 : i1 to i32
    %c0_i32_9 = arith.constant 0 : i32
    %11 = arith.cmpi ne, %10, %c0_i32_9 : i32
    scf.if %11 {
      %c0_10 = arith.constant 0 : index
      %c0_11 = arith.constant 0 : index
      %12 = vector.load %arg5[%c0_10, %c0_11] : memref<128x128xf32, #tpu.memory_space<vmem>>, vector<128x128xf32>
      %cst_12 = arith.constant 0.000000e+00 : f32
      %13 = vector.broadcast %cst_12 : f32 to vector<128x128xf32>
      %14 = arith.cmpf oge, %12, %13 : vector<128x128xf32>
      %cst_13 = arith.constant 2.000000e-01 : f32
      %15 = vector.broadcast %cst_13 : f32 to vector<128x128xf32>
      %16 = arith.mulf %12, %15 : vector<128x128xf32>
      %17 = arith.select %14, %12, %16 : vector<128x128xi1>, vector<128x128xf32>
      %18 = arith.truncf %17 : vector<128x128xf32> to vector<128x128xbf16>
      %c0_14 = arith.constant 0 : index
      %c0_15 = arith.constant 0 : index
      %19 = vector.load %arg4[%c0_14, %c0_15] : memref<128x128xbf16, #tpu.memory_space<vmem>>, vector<128x128xbf16>
      tpu.vector_store %arg4[%c0_14, %c0_15], %18 {strides = array<i32>} : memref<128x128xbf16, #tpu.memory_space<vmem>>, vector<128x128xbf16>,
    } else {
    }
    return
  }
  func.func @transform_0(%arg0: i32, %arg1: i32) -> (i32, i32) {
    %c0_i32 = arith.constant 0 : i32
    return %arg0, %arg1 : i32, i32
  }
  func.func @transform_1(%arg0: i32, %arg1: i32) -> (i32, i32) {
    %c0_i32 = arith.constant 0 : i32
    %c0_i32_0 = arith.constant 0 : i32
    return %arg1, %c0_i32 : i32, i32
  }
  func.func @transform_2(%arg0: i32, %arg1: i32) -> (i32, i32) {
    %c0_i32 = arith.constant 0 : i32
    %c0_i32_0 = arith.constant 0 : i32
    return %arg0, %c0_i32 : i32, i32
  }
}

module attributes {stable_mosaic.version = 11 : i64} {
  func.func @_matmul_lrelu_kernel(%arg0: i32, %arg1: i32, %arg2: memref<32x1024xbf16, #tpu.memory_space<vmem>>, %arg3: memref<1024x256xbf16, #tpu.memory_space<vmem>>, %arg4: memref<32x256xbf16, #tpu.memory_space<vmem>>, %arg5: memref<32x256xf32, #tpu.memory_space<vmem>>) attributes {dimension_semantics = [#tpu.dimension_semantics<parallel>, #tpu.dimension_semantics<arbitrary>], iteration_bounds = array<i64: 1, 2>, scalar_prefetch = 0 : i64, scratch_operands = 1 : i64, tpu.core_type = #tpu.core_type<tc>, window_params = [{transform_indices = @transform_0, window_bounds = array<i64: 32, 1024>}, {transform_indices = @transform_1, window_bounds = array<i64: 1024, 256>}, {transform_indices = @transform_2, window_bounds = array<i64: 32, 256>}]} {
    %c0_i32 = arith.constant 0 : i32
    %0 = arith.cmpi eq, %arg1, %c0_i32 : i32
    %1 = arith.extui %0 : i1 to i32
    %c0_i32_0 = arith.constant 0 : i32
    %2 = arith.cmpi ne, %1, %c0_i32_0 : i32
    scf.if %2 {
      %cst_9 = arith.constant 0.000000e+00 : f32
      %12 = vector.broadcast %cst_9 : f32 to vector<32x256xf32>
      %c0_10 = arith.constant 0 : index
      %c0_11 = arith.constant 0 : index
      %13 = vector.load %arg5[%c0_10, %c0_11] : memref<32x256xf32, #tpu.memory_space<vmem>>, vector<32x256xf32>
      tpu.vector_store %arg5[%c0_10, %c0_11], %12 {strides = array<i32>} : memref<32x256xf32, #tpu.memory_space<vmem>>, vector<32x256xf32>,
    } else {
    }
    %c0 = arith.constant 0 : index
    %c0_1 = arith.constant 0 : index
    %3 = vector.load %arg5[%c0, %c0_1] : memref<32x256xf32, #tpu.memory_space<vmem>>, vector<32x256xf32>
    %c0_2 = arith.constant 0 : index
    %c0_3 = arith.constant 0 : index
    %4 = vector.load %arg2[%c0_2, %c0_3] : memref<32x1024xbf16, #tpu.memory_space<vmem>>, vector<32x1024xbf16>
    %c0_4 = arith.constant 0 : index
    %c0_5 = arith.constant 0 : index
    %5 = vector.load %arg3[%c0_4, %c0_5] : memref<1024x256xbf16, #tpu.memory_space<vmem>>, vector<1024x256xbf16>
    %cst = arith.constant dense<0.000000e+00> : vector<32x256xf32>
    %6 = tpu.matmul %4, %5, %cst {dimension_numbers = #tpu.dot_dimension_numbers<[1], [0], [0], [1], [0, 0, 1, 1], [], []>} : vector<32x1024xbf16>, vector<1024x256xbf16>, vector<32x256xf32> -> vector<32x256xf32>
    %7 = arith.addf %3, %6 : vector<32x256xf32>
    %c0_6 = arith.constant 0 : index
    %c0_7 = arith.constant 0 : index
    %8 = vector.load %arg5[%c0_6, %c0_7] : memref<32x256xf32, #tpu.memory_space<vmem>>, vector<32x256xf32>
    tpu.vector_store %arg5[%c0_6, %c0_7], %7 {strides = array<i32>} : memref<32x256xf32, #tpu.memory_space<vmem>>, vector<32x256xf32>,
    %c1_i32 = arith.constant 1 : i32
    %9 = arith.cmpi eq, %arg1, %c1_i32 : i32
    %10 = arith.extui %9 : i1 to i32
    %c0_i32_8 = arith.constant 0 : i32
    %11 = arith.cmpi ne, %10, %c0_i32_8 : i32
    scf.if %11 {
      %c0_9 = arith.constant 0 : index
      %c0_10 = arith.constant 0 : index
      %12 = vector.load %arg5[%c0_9, %c0_10] : memref<32x256xf32, #tpu.memory_space<vmem>>, vector<32x256xf32>
      %cst_11 = arith.constant 0.000000e+00 : f32
      %13 = vector.broadcast %cst_11 : f32 to vector<32x256xf32>
      %14 = arith.cmpf oge, %12, %13 : vector<32x256xf32>
      %cst_12 = arith.constant 2.000000e-01 : f32
      %15 = vector.broadcast %cst_12 : f32 to vector<32x256xf32>
      %16 = arith.mulf %12, %15 : vector<32x256xf32>
      %17 = arith.select %14, %12, %16 : vector<32x256xi1>, vector<32x256xf32>
      %18 = arith.truncf %17 : vector<32x256xf32> to vector<32x256xbf16>
      %c0_13 = arith.constant 0 : index
      %c0_14 = arith.constant 0 : index
      %19 = vector.load %arg4[%c0_13, %c0_14] : memref<32x256xbf16, #tpu.memory_space<vmem>>, vector<32x256xbf16>
      tpu.vector_store %arg4[%c0_13, %c0_14], %18 {strides = array<i32>} : memref<32x256xbf16, #tpu.memory_space<vmem>>, vector<32x256xbf16>,
    } else {
    }
    return
  }
  func.func @transform_0(%arg0: i32, %arg1: i32) -> (i32, i32) {
    %c0_i32 = arith.constant 0 : i32
    return %arg0, %arg1 : i32, i32
  }
  func.func @transform_1(%arg0: i32, %arg1: i32) -> (i32, i32) {
    %c0_i32 = arith.constant 0 : i32
    %c0_i32_0 = arith.constant 0 : i32
    return %arg1, %c0_i32 : i32, i32
  }
  func.func @transform_2(%arg0: i32, %arg1: i32) -> (i32, i32) {
    %c0_i32 = arith.constant 0 : i32
    %c0_i32_0 = arith.constant 0 : i32
    return %arg0, %c0_i32 : i32, i32
  }
}

module attributes {stable_mosaic.version = 11 : i64} {
  func.func @_matmul_lrelu_kernel(%arg0: i32, %arg1: i32, %arg2: memref<16x1024xbf16, #tpu.memory_space<vmem>>, %arg3: memref<1024x512xbf16, #tpu.memory_space<vmem>>, %arg4: memref<16x512xbf16, #tpu.memory_space<vmem>>, %arg5: memref<16x512xf32, #tpu.memory_space<vmem>>) attributes {dimension_semantics = [#tpu.dimension_semantics<parallel>, #tpu.dimension_semantics<arbitrary>], iteration_bounds = array<i64: 1, 4>, scalar_prefetch = 0 : i64, scratch_operands = 1 : i64, tpu.core_type = #tpu.core_type<tc>, window_params = [{transform_indices = @transform_0, window_bounds = array<i64: 16, 1024>}, {transform_indices = @transform_1, window_bounds = array<i64: 1024, 512>}, {transform_indices = @transform_2, window_bounds = array<i64: 16, 512>}]} {
    %c0_i32 = arith.constant 0 : i32
    %0 = arith.cmpi eq, %arg1, %c0_i32 : i32
    %1 = arith.extui %0 : i1 to i32
    %c0_i32_0 = arith.constant 0 : i32
    %2 = arith.cmpi ne, %1, %c0_i32_0 : i32
    scf.if %2 {
      %cst_9 = arith.constant 0.000000e+00 : f32
      %12 = vector.broadcast %cst_9 : f32 to vector<16x512xf32>
      %c0_10 = arith.constant 0 : index
      %c0_11 = arith.constant 0 : index
      %13 = vector.load %arg5[%c0_10, %c0_11] : memref<16x512xf32, #tpu.memory_space<vmem>>, vector<16x512xf32>
      tpu.vector_store %arg5[%c0_10, %c0_11], %12 {strides = array<i32>} : memref<16x512xf32, #tpu.memory_space<vmem>>, vector<16x512xf32>,
    } else {
    }
    %c0 = arith.constant 0 : index
    %c0_1 = arith.constant 0 : index
    %3 = vector.load %arg5[%c0, %c0_1] : memref<16x512xf32, #tpu.memory_space<vmem>>, vector<16x512xf32>
    %c0_2 = arith.constant 0 : index
    %c0_3 = arith.constant 0 : index
    %4 = vector.load %arg2[%c0_2, %c0_3] : memref<16x1024xbf16, #tpu.memory_space<vmem>>, vector<16x1024xbf16>
    %c0_4 = arith.constant 0 : index
    %c0_5 = arith.constant 0 : index
    %5 = vector.load %arg3[%c0_4, %c0_5] : memref<1024x512xbf16, #tpu.memory_space<vmem>>, vector<1024x512xbf16>
    %cst = arith.constant dense<0.000000e+00> : vector<16x512xf32>
    %6 = tpu.matmul %4, %5, %cst {dimension_numbers = #tpu.dot_dimension_numbers<[1], [0], [0], [1], [0, 0, 1, 1], [], []>} : vector<16x1024xbf16>, vector<1024x512xbf16>, vector<16x512xf32> -> vector<16x512xf32>
    %7 = arith.addf %3, %6 : vector<16x512xf32>
    %c0_6 = arith.constant 0 : index
    %c0_7 = arith.constant 0 : index
    %8 = vector.load %arg5[%c0_6, %c0_7] : memref<16x512xf32, #tpu.memory_space<vmem>>, vector<16x512xf32>
    tpu.vector_store %arg5[%c0_6, %c0_7], %7 {strides = array<i32>} : memref<16x512xf32, #tpu.memory_space<vmem>>, vector<16x512xf32>,
    %c3_i32 = arith.constant 3 : i32
    %9 = arith.cmpi eq, %arg1, %c3_i32 : i32
    %10 = arith.extui %9 : i1 to i32
    %c0_i32_8 = arith.constant 0 : i32
    %11 = arith.cmpi ne, %10, %c0_i32_8 : i32
    scf.if %11 {
      %c0_9 = arith.constant 0 : index
      %c0_10 = arith.constant 0 : index
      %12 = vector.load %arg5[%c0_9, %c0_10] : memref<16x512xf32, #tpu.memory_space<vmem>>, vector<16x512xf32>
      %cst_11 = arith.constant 0.000000e+00 : f32
      %13 = vector.broadcast %cst_11 : f32 to vector<16x512xf32>
      %14 = arith.cmpf oge, %12, %13 : vector<16x512xf32>
      %cst_12 = arith.constant 2.000000e-01 : f32
      %15 = vector.broadcast %cst_12 : f32 to vector<16x512xf32>
      %16 = arith.mulf %12, %15 : vector<16x512xf32>
      %17 = arith.select %14, %12, %16 : vector<16x512xi1>, vector<16x512xf32>
      %18 = arith.truncf %17 : vector<16x512xf32> to vector<16x512xbf16>
      %c0_13 = arith.constant 0 : index
      %c0_14 = arith.constant 0 : index
      %19 = vector.load %arg4[%c0_13, %c0_14] : memref<16x512xbf16, #tpu.memory_space<vmem>>, vector<16x512xbf16>
      tpu.vector_store %arg4[%c0_13, %c0_14], %18 {strides = array<i32>} : memref<16x512xbf16, #tpu.memory_space<vmem>>, vector<16x512xbf16>,
    } else {
    }
    return
  }
  func.func @transform_0(%arg0: i32, %arg1: i32) -> (i32, i32) {
    %c0_i32 = arith.constant 0 : i32
    return %arg0, %arg1 : i32, i32
  }
  func.func @transform_1(%arg0: i32, %arg1: i32) -> (i32, i32) {
    %c0_i32 = arith.constant 0 : i32
    %c0_i32_0 = arith.constant 0 : i32
    return %arg1, %c0_i32 : i32, i32
  }
  func.func @transform_2(%arg0: i32, %arg1: i32) -> (i32, i32) {
    %c0_i32 = arith.constant 0 : i32
    %c0_i32_0 = arith.constant 0 : i32
    return %arg0, %c0_i32 : i32, i32
  }
}

module attributes {stable_mosaic.version = 11 : i64} {
  func.func @_matmul_lrelu_kernel(%arg0: i32, %arg1: i32, %arg2: memref<16x1024xbf16, #tpu.memory_space<vmem>>, %arg3: memref<1024x128xbf16, #tpu.memory_space<vmem>>, %arg4: memref<16x128xf32, #tpu.memory_space<vmem>>, %arg5: memref<16x128xf32, #tpu.memory_space<vmem>>) attributes {dimension_semantics = [#tpu.dimension_semantics<parallel>, #tpu.dimension_semantics<arbitrary>], iteration_bounds = array<i64: 1, 8>, scalar_prefetch = 0 : i64, scratch_operands = 1 : i64, tpu.core_type = #tpu.core_type<tc>, window_params = [{transform_indices = @transform_0, window_bounds = array<i64: 16, 1024>}, {transform_indices = @transform_1, window_bounds = array<i64: 1024, 128>}, {transform_indices = @transform_2, window_bounds = array<i64: 16, 128>}]} {
    %c0_i32 = arith.constant 0 : i32
    %0 = arith.cmpi eq, %arg1, %c0_i32 : i32
    %1 = arith.extui %0 : i1 to i32
    %c0_i32_0 = arith.constant 0 : i32
    %2 = arith.cmpi ne, %1, %c0_i32_0 : i32
    scf.if %2 {
      %cst_9 = arith.constant 0.000000e+00 : f32
      %12 = vector.broadcast %cst_9 : f32 to vector<16x128xf32>
      %c0_10 = arith.constant 0 : index
      %c0_11 = arith.constant 0 : index
      %13 = vector.load %arg5[%c0_10, %c0_11] : memref<16x128xf32, #tpu.memory_space<vmem>>, vector<16x128xf32>
      tpu.vector_store %arg5[%c0_10, %c0_11], %12 {strides = array<i32>} : memref<16x128xf32, #tpu.memory_space<vmem>>, vector<16x128xf32>,
    } else {
    }
    %c0 = arith.constant 0 : index
    %c0_1 = arith.constant 0 : index
    %3 = vector.load %arg5[%c0, %c0_1] : memref<16x128xf32, #tpu.memory_space<vmem>>, vector<16x128xf32>
    %c0_2 = arith.constant 0 : index
    %c0_3 = arith.constant 0 : index
    %4 = vector.load %arg2[%c0_2, %c0_3] : memref<16x1024xbf16, #tpu.memory_space<vmem>>, vector<16x1024xbf16>
    %c0_4 = arith.constant 0 : index
    %c0_5 = arith.constant 0 : index
    %5 = vector.load %arg3[%c0_4, %c0_5] : memref<1024x128xbf16, #tpu.memory_space<vmem>>, vector<1024x128xbf16>
    %cst = arith.constant dense<0.000000e+00> : vector<16x128xf32>
    %6 = tpu.matmul %4, %5, %cst {dimension_numbers = #tpu.dot_dimension_numbers<[1], [0], [0], [1], [0, 0, 1, 1], [], []>} : vector<16x1024xbf16>, vector<1024x128xbf16>, vector<16x128xf32> -> vector<16x128xf32>
    %7 = arith.addf %3, %6 : vector<16x128xf32>
    %c0_6 = arith.constant 0 : index
    %c0_7 = arith.constant 0 : index
    %8 = vector.load %arg5[%c0_6, %c0_7] : memref<16x128xf32, #tpu.memory_space<vmem>>, vector<16x128xf32>
    tpu.vector_store %arg5[%c0_6, %c0_7], %7 {strides = array<i32>} : memref<16x128xf32, #tpu.memory_space<vmem>>, vector<16x128xf32>,
    %c7_i32 = arith.constant 7 : i32
    %9 = arith.cmpi eq, %arg1, %c7_i32 : i32
    %10 = arith.extui %9 : i1 to i32
    %c0_i32_8 = arith.constant 0 : i32
    %11 = arith.cmpi ne, %10, %c0_i32_8 : i32
    scf.if %11 {
      %c0_9 = arith.constant 0 : index
      %c0_10 = arith.constant 0 : index
      %12 = vector.load %arg5[%c0_9, %c0_10] : memref<16x128xf32, #tpu.memory_space<vmem>>, vector<16x128xf32>
      %c0_11 = arith.constant 0 : index
      %c0_12 = arith.constant 0 : index
      %13 = vector.load %arg4[%c0_11, %c0_12] : memref<16x128xf32, #tpu.memory_space<vmem>>, vector<16x128xf32>
      tpu.vector_store %arg4[%c0_11, %c0_12], %12 {strides = array<i32>} : memref<16x128xf32, #tpu.memory_space<vmem>>, vector<16x128xf32>,
    } else {
    }
    return
  }
  func.func @transform_0(%arg0: i32, %arg1: i32) -> (i32, i32) {
    %c0_i32 = arith.constant 0 : i32
    return %arg0, %arg1 : i32, i32
  }
  func.func @transform_1(%arg0: i32, %arg1: i32) -> (i32, i32) {
    %c0_i32 = arith.constant 0 : i32
    %c0_i32_0 = arith.constant 0 : i32
    return %arg1, %c0_i32 : i32, i32
  }
  func.func @transform_2(%arg0: i32, %arg1: i32) -> (i32, i32) {
    %c0_i32 = arith.constant 0 : i32
    %c0_i32_0 = arith.constant 0 : i32
    return %arg0, %c0_i32 : i32, i32
  }
}

</mosaic_0001>

<bundles_post_ra>
// kernel: discriminator_forward.5
= control target key start
LH: loop header
LB: loop body
LE: loop exit
PB: predicated region body
PF: predicated region fallthrough
CT: control target
= control target key end

     0   :  { %s2237_s1 = inlined_call_operand.vmem [shape: bf16[128,128], index: 1, kind: input, shape index: {}]   ;;  %s2238_s0 = inlined_call_operand.vmem [shape: bf16[512,128], index: 0, kind: input, shape index: {}]   ;;  %s2239_s2 = inlined_call_operand.vmem [shape: bf16[512,128], index: 2, kind: output, shape index: {}]  }
   0x1   :  { %v1959_v0 = vld [vmem:[%s2237_s1] sm:$0xff]   ;;  %v1960_v1 = vld [vmem:[%s2237_s1 + $0x8] sm:$0xff]   ;;  %v1961_v2 = vld [vmem:[%s2237_s1 + $0x10] sm:$0xff]  }
   0x2   :  { %1863 = vmatprep.subr.bf16.mxu0 %v1959_v0  ;;  %1943 = vmatprep.subr.bf16.mxu1 %v1959_v0  ;;  %v1962_v3 = vld [vmem:[%s2237_s1 + $0x18] sm:$0xff]   ;;  %v1967_v4 = vld [vmem:[%s2238_s0] sm:$0xff]   ;;  %v1964_v7 = vld [vmem:[%s2237_s1 + $0x28] sm:$0xff]  }
   0x3   :  { %1864 = vmatpush3.bf16.msra.mxu0 %v1959_v0  ;;  %1951 = vmatpush3.bf16.msra.mxu1 %v1959_v0  ;;  %v1968_v5 = vld [vmem:[%s2238_s0 + $0x80] sm:$0xff]   ;;  %v1965_v8 = vld [vmem:[%s2237_s1 + $0x30] sm:$0xff]   ;;  %v1966_v9 = vld [vmem:[%s2237_s1 + $0x38] sm:$0xff]  }
   0x4   :  { %1865 = vmatprep.subr.bf16.mxu0 %v1960_v1  ;;  %1944 = vmatprep.subr.bf16.mxu1 %v1960_v1  ;;  %v1963_v6 = vld [vmem:[%s2237_s1 + $0x20] sm:$0xff]   ;;  %v1969_v10 = vld [vmem:[%s2238_s0 + $0x8] sm:$0xff]   ;;  %v1971_v12 = vld [vmem:[%s2238_s0 + $0x10] sm:$0xff]  }
   0x5   :  { %1879 = vmatprep.mubr.bf16.mxu0 %v1967_v4  ;;  %1911 = vmatprep.mubr.bf16.mxu1 %v1968_v5  ;;  %v1970_v11 = vld [vmem:[%s2238_s0 + $0x88] sm:$0xff]   ;;  %v1972_v13 = vld [vmem:[%s2238_s0 + $0x90] sm:$0xff]   ;;  %v1973_v14 = vld [vmem:[%s2238_s0 + $0x18] sm:$0xff]  }
   0x6   :  { %v1974_v15 = vld [vmem:[%s2238_s0 + $0x98] sm:$0xff]   ;;  %v1975_v16 = vld [vmem:[%s2238_s0 + $0x20] sm:$0xff]   ;;  %v1977_v18 = vld [vmem:[%s2238_s0 + $0x28] sm:$0xff]  }
   0x7   :  { %1866 = vmatpush3.bf16.msra.mxu0 %v1960_v1  ;;  %1952 = vmatpush3.bf16.msra.mxu1 %v1960_v1  ;;  %v1976_v17 = vld [vmem:[%s2238_s0 + $0xa0] sm:$0xff]   ;;  %v1978_v19 = vld [vmem:[%s2238_s0 + $0xa8] sm:$0xff]   ;;  %v1979_v20 = vld [vmem:[%s2238_s0 + $0x30] sm:$0xff]  }
   0x8   :  { %1867 = vmatprep.subr.bf16.mxu0 %v1961_v2  ;;  %1945 = vmatprep.subr.bf16.mxu1 %v1961_v2  ;;  %v1980_v21 = vld [vmem:[%s2238_s0 + $0xb0] sm:$0xff]   ;;  %v1981_v22 = vld [vmem:[%s2238_s0 + $0x38] sm:$0xff]   ;;  %v1983_v24 = vld [vmem:[%s2238_s0 + $0x40] sm:$0xff]  }
   0x9   :  { %v1982_v23 = vld [vmem:[%s2238_s0 + $0xb8] sm:$0xff]   ;;  %v1984_v25 = vld [vmem:[%s2238_s0 + $0xc0] sm:$0xff]   ;;  %v1985_v26 = vld [vmem:[%s2238_s0 + $0x48] sm:$0xff]  }
   0xa   :  { %v1986_v27 = vld [vmem:[%s2238_s0 + $0xc8] sm:$0xff]   ;;  %v1987_v28 = vld [vmem:[%s2238_s0 + $0x50] sm:$0xff]   ;;  %v1989_v30 = vld [vmem:[%s2238_s0 + $0x58] sm:$0xff]  }
   0xb   :  { %1868 = vmatpush3.bf16.msra.mxu0 %v1961_v2  ;;  %1953 = vmatpush3.bf16.msra.mxu1 %v1961_v2  ;;  %v1988_v29 = vld [vmem:[%s2238_s0 + $0xd0] sm:$0xff]   ;;  %v1990_v31 = vld [vmem:[%s2238_s0 + $0xd8] sm:$0xff]   ;;  %v1991_v32 = vld [vmem:[%s2238_s0 + $0x60] sm:$0xff]  }
   0xc   :  { %1869 = vmatprep.subr.bf16.mxu0 %v1962_v3  ;;  %1946 = vmatprep.subr.bf16.mxu1 %v1962_v3  ;;  %v1992_v33 = vld [vmem:[%s2238_s0 + $0xe0] sm:$0xff]   ;;  %v1993_v34 = vld [vmem:[%s2238_s0 + $0x68] sm:$0xff]   ;;  %v1995_v36 = vld [vmem:[%s2238_s0 + $0x70] sm:$0xff]  }
   0xd   :  { %v1994_v35 = vld [vmem:[%s2238_s0 + $0xe8] sm:$0xff]   ;;  %v1996_v37 = vld [vmem:[%s2238_s0 + $0xf0] sm:$0xff]   ;;  %v1997_v38 = vld [vmem:[%s2238_s0 + $0x78] sm:$0xff]  }
   0xe   :  { %v1998_v39 = vld [vmem:[%s2238_s0 + $0xf8] sm:$0xff]  }
   0xf   :  { %1870 = vmatpush3.bf16.msra.mxu0 %v1962_v3  ;;  %1954 = vmatpush3.bf16.msra.mxu1 %v1962_v3 }
  0x10   :  { %1871 = vmatprep.subr.bf16.mxu0 %v1963_v6  ;;  %1947 = vmatprep.subr.bf16.mxu1 %v1963_v6 }
  0x13   :  { %1872 = vmatpush3.bf16.msra.mxu0 %v1963_v6  ;;  %1955 = vmatpush3.bf16.msra.mxu1 %v1963_v6 }
  0x14   :  { %1873 = vmatprep.subr.bf16.mxu0 %v1964_v7  ;;  %1948 = vmatprep.subr.bf16.mxu1 %v1964_v7 }
  0x17   :  { %1874 = vmatpush3.bf16.msra.mxu0 %v1964_v7  ;;  %1956 = vmatpush3.bf16.msra.mxu1 %v1964_v7 }
  0x18   :  { %1875 = vmatprep.subr.bf16.mxu0 %v1965_v8  ;;  %1949 = vmatprep.subr.bf16.mxu1 %v1965_v8 }
  0x1b   :  { %1876 = vmatpush3.bf16.msra.mxu0 %v1965_v8  ;;  %1957 = vmatpush3.bf16.msra.mxu1 %v1965_v8 }
  0x1c   :  { %1877 = vmatprep.subr.bf16.mxu0 %v1966_v9  ;;  %1950 = vmatprep.subr.bf16.mxu1 %v1966_v9 }
  0x1f   :  { %1878 = vmatpush3.bf16.msra.mxu0 %v1966_v9  ;;  %1958 = vmatpush3.bf16.msra.mxu1 %v1966_v9 }
  0x22   :  { %1880 = vmatmul.mubr.bf16.vlgmr.msra.gmra.mrb[0].mxu0 %v1969_v10  ;;  %1912 = vmatmul.mubr.bf16.vlgmr.msra.gmra.mrb[0].mxu1 %v1970_v11 }
  0x23   :  { %1883 = vmatprep.mubr.bf16.mxu0 %v1971_v12  ;;  %1915 = vmatprep.mubr.bf16.mxu1 %v1972_v13 }
  0x2a   :  { %1884 = vmatmul.mubr.bf16.gmra.mrb[4].mxu0 %v1973_v14  ;;  %1916 = vmatmul.mubr.bf16.gmra.mrb[4].mxu1 %v1974_v15 }
  0x2b   :  { %1887 = vmatprep.mubr.bf16.mxu0 %v1975_v16  ;;  %1919 = vmatprep.mubr.bf16.mxu1 %v1976_v17 }
  0x32   :  { %1888 = vmatmul.mubr.bf16.gmra.mrb[8].mxu0 %v1977_v18  ;;  %1920 = vmatmul.mubr.bf16.gmra.mrb[8].mxu1 %v1978_v19 }
  0x33   :  { %1891 = vmatprep.mubr.bf16.mxu0 %v1979_v20  ;;  %1923 = vmatprep.mubr.bf16.mxu1 %v1980_v21 }
  0x3a   :  { %1892 = vmatmul.mubr.bf16.gmra.mrb[12].mxu0 %v1981_v22  ;;  %1924 = vmatmul.mubr.bf16.gmra.mrb[12].mxu1 %v1982_v23 }
  0x3b   :  { %1895 = vmatprep.mubr.bf16.mxu0 %v1983_v24  ;;  %1927 = vmatprep.mubr.bf16.mxu1 %v1984_v25 }
  0x42   :  { %1896 = vmatmul.mubr.bf16.gmra.mrb[16].mxu0 %v1985_v26  ;;  %1928 = vmatmul.mubr.bf16.gmra.mrb[16].mxu1 %v1986_v27 }
  0x43   :  { %1899 = vmatprep.mubr.bf16.mxu0 %v1987_v28  ;;  %1931 = vmatprep.mubr.bf16.mxu1 %v1988_v29 }
  0x4a   :  { %1900 = vmatmul.mubr.bf16.gmra.mrb[20].mxu0 %v1989_v30  ;;  %1932 = vmatmul.mubr.bf16.gmra.mrb[20].mxu1 %v1990_v31 }
  0x4b   :  { %1903 = vmatprep.mubr.bf16.mxu0 %v1991_v32  ;;  %1935 = vmatprep.mubr.bf16.mxu1 %v1992_v33 }
  0x52   :  { %1904 = vmatmul.mubr.bf16.gmra.mrb[24].mxu0 %v1993_v34  ;;  %1936 = vmatmul.mubr.bf16.gmra.mrb[24].mxu1 %v1994_v35 }
  0x53   :  { %1907 = vmatprep.mubr.bf16.mxu0 %v1995_v36  ;;  %1939 = vmatprep.mubr.bf16.mxu1 %v1996_v37 }
  0x5a   :  { %1908 = vmatmul.mubr.bf16.gmra.mrb[28].mxu0 %v1997_v38  ;;  %1940 = vmatmul.mubr.bf16.gmra.mrb[28].mxu1 %v1998_v39 }
  0xf5   :  { %v1881_v40 = vpop.f32.mrb[0].mxu0  ;;  %v1913_v41 = vpop.f32.mrb[0].mxu1 }
  0xf6   :  { %vm950_vm0 = vcmp.ge.f32.partialorder %v1881_v40, 0.0  ;;  %v1014_v42 = vmul.f32 0.2, %v1881_v40  ;;  %v1046_v43 = vmul.f32 0.2, %v1913_v41  ;;  %vm982_vm1 = vcmp.ge.f32.partialorder %v1913_v41, 0.0 }
  0xf7   :  { %v498_v44 = vpop.f32.mrb[1].mxu0  ;;  %v626_v45 = vpop.f32.mrb[1].mxu1 }
  0xf8   :  { %v1012_v46 = vmul.f32 0.2, %v498_v44  ;;  %v1882_v47 = vpop.f32.mrb[2].mxu0  ;;  %v1914_v48 = vpop.f32.mrb[2].mxu1  ;;  %v1078_v49 = vsel %vm950_vm0, %v1881_v40, %v1014_v42  ;;  %v1044_v50 = vmul.f32 0.2, %v626_v45  ;;  %v1110_v52 = vsel %vm982_vm1, %v1913_v41, %v1046_v43 }
  0xf9   :  { %vm951_vm2 = vcmp.ge.f32.partialorder %v1882_v47, 0.0  ;;  %v1015_v51 = vmul.f32 0.2, %v1882_v47  ;;  %vm948_vm3 = vcmp.ge.f32.partialorder %v498_v44, 0.0  ;;  %vm983_vm4 = vcmp.ge.f32.partialorder %v1914_v48, 0.0  ;;  %v501_v54 = vpop.f32.mrb[3].mxu0 }
  0xfa   :  { %v1047_v53 = vmul.f32 0.2, %v1914_v48  ;;  %v629_v55 = vpop.f32.mrb[3].mxu1  ;;  %vm980_vm5 = vcmp.ge.f32.partialorder %v626_v45, 0.0  ;;  %vm949_vm6 = vcmp.ge.f32.partialorder %v501_v54, 0.0  ;;  %v1076_v61 = vsel %vm948_vm3, %v498_v44, %v1012_v46 }
  0xfb   :  { %v1079_v56 = vsel %vm951_vm2, %v1882_v47, %v1015_v51  ;;  %v1013_v57 = vmul.f32 0.2, %v501_v54  ;;  %vm981_vm7 = vcmp.ge.f32.partialorder %v629_v55, 0.0  ;;  %v1045_v60 = vmul.f32 0.2, %v629_v55 }
  0xfc   :  { %v1640_v58 = vpack.c.bf16 %v1079_v56, %v1078_v49  ;;  %v1111_v59 = vsel %vm983_vm4, %v1914_v48, %v1047_v53  ;;  %v1108_v2 = vsel %vm980_vm5, %v626_v45, %v1044_v50 }
  0xfd   :  { %v1720_v62 = vpack.c.bf16 %v1111_v59, %v1110_v52  ;;  %v1077_v63 = vsel %vm949_vm6, %v501_v54, %v1013_v57  ;;  %v1885_v0 = vpop.f32.mrb[4].mxu0  ;;  %v1917_v1 = vpop.f32.mrb[4].mxu1  ;;  %v1109_v4 = vsel %vm981_vm7, %v629_v55, %v1045_v60 }
  0xfe   :  { %1792 = vst [vmem:[%s2239_s2 + $0x8] sm:$0xff] %v1640_v58   ;;  %v1635_v3 = vpack.c.bf16 %v1077_v63, %v1076_v61  ;;  %v1018_v5 = vmul.f32 0.2, %v1885_v0  ;;  %v514_v6 = vpop.f32.mrb[5].mxu0  ;;  %v642_v7 = vpop.f32.mrb[5].mxu1  ;;  %v1715_v8 = vpack.c.bf16 %v1109_v4, %v1108_v2  ;;  %vm954_vm8 = vcmp.ge.f32.partialorder %v1885_v0, 0.0 }
  0xff   :  { %1808 = vst [vmem:[%s2239_s2 + $0x88] sm:$0xff] %v1720_v62   ;;  %v1050_v9 = vmul.f32 0.2, %v1917_v1  ;;  %v1886_v10 = vpop.f32.mrb[6].mxu0  ;;  %v1918_v11 = vpop.f32.mrb[6].mxu1  ;;  %vm986_vm9 = vcmp.ge.f32.partialorder %v1917_v1, 0.0 }
 0x100   :  { %1636 = vst [vmem:[%s2239_s2] sm:$0xff] %v1635_v3   ;;  %v1016_v12 = vmul.f32 0.2, %v514_v6  ;;  %v1048_v13 = vmul.f32 0.2, %v642_v7  ;;  %v517_v14 = vpop.f32.mrb[7].mxu0  ;;  %1807 = vst [vmem:[%s2239_s2 + $0x80] sm:$0xff] %v1715_v8   ;;  %v1082_v17 = vsel %vm954_vm8, %v1885_v0, %v1018_v5 }
 0x101   :  { %vm952_vm10 = vcmp.ge.f32.partialorder %v514_v6, 0.0  ;;  %vm955_vm11 = vcmp.ge.f32.partialorder %v1886_v10, 0.0  ;;  %v1019_v15 = vmul.f32 0.2, %v1886_v10  ;;  %vm987_vm12 = vcmp.ge.f32.partialorder %v1918_v11, 0.0  ;;  %v645_v16 = vpop.f32.mrb[7].mxu1 }
 0x102   :  { %vm984_vm13 = vcmp.ge.f32.partialorder %v642_v7, 0.0  ;;  %v1051_v18 = vmul.f32 0.2, %v1918_v11  ;;  %vm953_vm14 = vcmp.ge.f32.partialorder %v517_v14, 0.0  ;;  %v1017_v20 = vmul.f32 0.2, %v517_v14 }
 0x103   :  { %v1083_v19 = vsel %vm955_vm11, %v1886_v10, %v1019_v15  ;;  %vm985_vm15 = vcmp.ge.f32.partialorder %v645_v16, 0.0  ;;  %v1049_v21 = vmul.f32 0.2, %v645_v16  ;;  %v1114_v22 = vsel %vm986_vm9, %v1917_v1, %v1050_v9 }
 0x104   :  { %v1080_v23 = vsel %vm952_vm10, %v514_v6, %v1016_v12  ;;  %v1650_v24 = vpack.c.bf16 %v1083_v19, %v1082_v17  ;;  %v1115_v25 = vsel %vm987_vm12, %v1918_v11, %v1051_v18  ;;  %v1112_v26 = vsel %vm984_vm13, %v642_v7, %v1048_v13 }
 0x105   :  { %v1730_v27 = vpack.c.bf16 %v1115_v25, %v1114_v22  ;;  %v1081_v28 = vsel %vm953_vm14, %v517_v14, %v1017_v20  ;;  %v1113_v29 = vsel %vm985_vm15, %v645_v16, %v1049_v21  ;;  %v1889_v30 = vpop.f32.mrb[8].mxu0  ;;  %v1921_v31 = vpop.f32.mrb[8].mxu1 }
 0x106   :  { %1794 = vst [vmem:[%s2239_s2 + $0x18] sm:$0xff] %v1650_v24   ;;  %v1645_v32 = vpack.c.bf16 %v1081_v28, %v1080_v23  ;;  %v1725_v33 = vpack.c.bf16 %v1113_v29, %v1112_v26  ;;  %vm958_vm0 = vcmp.ge.f32.partialorder %v1889_v30, 0.0  ;;  %v1022_v34 = vmul.f32 0.2, %v1889_v30  ;;  %v530_v35 = vpop.f32.mrb[9].mxu0  ;;  %v658_v36 = vpop.f32.mrb[9].mxu1 }
 0x107   :  { %1810 = vst [vmem:[%s2239_s2 + $0x98] sm:$0xff] %v1730_v27   ;;  %vm990_vm1 = vcmp.ge.f32.partialorder %v1921_v31, 0.0  ;;  %v1054_v37 = vmul.f32 0.2, %v1921_v31  ;;  %v1020_v38 = vmul.f32 0.2, %v530_v35 }
 0x108   :  { %1793 = vst [vmem:[%s2239_s2 + $0x10] sm:$0xff] %v1645_v32   ;;  %1809 = vst [vmem:[%s2239_s2 + $0x90] sm:$0xff] %v1725_v33   ;;  %v1052_v39 = vmul.f32 0.2, %v658_v36  ;;  %v1890_v40 = vpop.f32.mrb[10].mxu0  ;;  %v1922_v41 = vpop.f32.mrb[10].mxu1  ;;  %v1086_v42 = vsel %vm958_vm0, %v1889_v30, %v1022_v34 }
 0x109   :  { %vm956_vm2 = vcmp.ge.f32.partialorder %v530_v35, 0.0  ;;  %vm959_vm3 = vcmp.ge.f32.partialorder %v1890_v40, 0.0  ;;  %v1023_v43 = vmul.f32 0.2, %v1890_v40  ;;  %v533_v44 = vpop.f32.mrb[11].mxu0  ;;  %v661_v45 = vpop.f32.mrb[11].mxu1  ;;  %v1118_v50 = vsel %vm990_vm1, %v1921_v31, %v1054_v37 }
 0x10a   :  { %vm988_vm4 = vcmp.ge.f32.partialorder %v658_v36, 0.0  ;;  %vm991_vm5 = vcmp.ge.f32.partialorder %v1922_v41, 0.0  ;;  %v1055_v46 = vmul.f32 0.2, %v1922_v41  ;;  %vm957_vm6 = vcmp.ge.f32.partialorder %v533_v44, 0.0 }
 0x10b   :  { %v1087_v47 = vsel %vm959_vm3, %v1890_v40, %v1023_v43  ;;  %v1021_v48 = vmul.f32 0.2, %v533_v44  ;;  %vm989_vm7 = vcmp.ge.f32.partialorder %v661_v45, 0.0  ;;  %v1053_v49 = vmul.f32 0.2, %v661_v45 }
 0x10c   :  { %v1084_v51 = vsel %vm956_vm2, %v530_v35, %v1020_v38  ;;  %v1660_v52 = vpack.c.bf16 %v1087_v47, %v1086_v42  ;;  %v1119_v53 = vsel %vm991_vm5, %v1922_v41, %v1055_v46  ;;  %v1116_v54 = vsel %vm988_vm4, %v658_v36, %v1052_v39 }
 0x10d   :  { %v1740_v55 = vpack.c.bf16 %v1119_v53, %v1118_v50  ;;  %v1085_v56 = vsel %vm957_vm6, %v533_v44, %v1021_v48  ;;  %v1117_v57 = vsel %vm989_vm7, %v661_v45, %v1053_v49  ;;  %v1893_v58 = vpop.f32.mrb[12].mxu0  ;;  %v1925_v59 = vpop.f32.mrb[12].mxu1 }
 0x10e   :  { %1796 = vst [vmem:[%s2239_s2 + $0x28] sm:$0xff] %v1660_v52   ;;  %v1655_v60 = vpack.c.bf16 %v1085_v56, %v1084_v51  ;;  %v1735_v61 = vpack.c.bf16 %v1117_v57, %v1116_v54  ;;  %vm962_vm8 = vcmp.ge.f32.partialorder %v1893_v58, 0.0  ;;  %v1026_v62 = vmul.f32 0.2, %v1893_v58  ;;  %v546_v63 = vpop.f32.mrb[13].mxu0  ;;  %v674_v0 = vpop.f32.mrb[13].mxu1 }
 0x10f   :  { %1812 = vst [vmem:[%s2239_s2 + $0xa8] sm:$0xff] %v1740_v55   ;;  %vm994_vm9 = vcmp.ge.f32.partialorder %v1925_v59, 0.0  ;;  %v1058_v1 = vmul.f32 0.2, %v1925_v59  ;;  %v1024_v2 = vmul.f32 0.2, %v546_v63 }
 0x110   :  { %1795 = vst [vmem:[%s2239_s2 + $0x20] sm:$0xff] %v1655_v60   ;;  %1811 = vst [vmem:[%s2239_s2 + $0xa0] sm:$0xff] %v1735_v61   ;;  %v1056_v3 = vmul.f32 0.2, %v674_v0  ;;  %v1894_v4 = vpop.f32.mrb[14].mxu0  ;;  %v1926_v5 = vpop.f32.mrb[14].mxu1  ;;  %v1090_v6 = vsel %vm962_vm8, %v1893_v58, %v1026_v62 }
 0x111   :  { %vm960_vm10 = vcmp.ge.f32.partialorder %v546_v63, 0.0  ;;  %vm963_vm11 = vcmp.ge.f32.partialorder %v1894_v4, 0.0  ;;  %v1027_v7 = vmul.f32 0.2, %v1894_v4  ;;  %v549_v8 = vpop.f32.mrb[15].mxu0  ;;  %v677_v9 = vpop.f32.mrb[15].mxu1  ;;  %v1122_v14 = vsel %vm994_vm9, %v1925_v59, %v1058_v1 }
 0x112   :  { %vm992_vm12 = vcmp.ge.f32.partialorder %v674_v0, 0.0  ;;  %vm995_vm13 = vcmp.ge.f32.partialorder %v1926_v5, 0.0  ;;  %v1059_v10 = vmul.f32 0.2, %v1926_v5  ;;  %vm961_vm14 = vcmp.ge.f32.partialorder %v549_v8, 0.0 }
 0x113   :  { %v1091_v11 = vsel %vm963_vm11, %v1894_v4, %v1027_v7  ;;  %v1025_v12 = vmul.f32 0.2, %v549_v8  ;;  %vm993_vm15 = vcmp.ge.f32.partialorder %v677_v9, 0.0  ;;  %v1057_v13 = vmul.f32 0.2, %v677_v9 }
 0x114   :  { %v1088_v15 = vsel %vm960_vm10, %v546_v63, %v1024_v2  ;;  %v1670_v16 = vpack.c.bf16 %v1091_v11, %v1090_v6  ;;  %v1123_v17 = vsel %vm995_vm13, %v1926_v5, %v1059_v10  ;;  %v1120_v18 = vsel %vm992_vm12, %v674_v0, %v1056_v3 }
 0x115   :  { %v1750_v19 = vpack.c.bf16 %v1123_v17, %v1122_v14  ;;  %v1089_v20 = vsel %vm961_vm14, %v549_v8, %v1025_v12  ;;  %v1121_v21 = vsel %vm993_vm15, %v677_v9, %v1057_v13  ;;  %v1897_v22 = vpop.f32.mrb[16].mxu0  ;;  %v1929_v23 = vpop.f32.mrb[16].mxu1 }
 0x116   :  { %1798 = vst [vmem:[%s2239_s2 + $0x38] sm:$0xff] %v1670_v16   ;;  %v1665_v24 = vpack.c.bf16 %v1089_v20, %v1088_v15  ;;  %v1745_v25 = vpack.c.bf16 %v1121_v21, %v1120_v18  ;;  %vm966_vm0 = vcmp.ge.f32.partialorder %v1897_v22, 0.0  ;;  %v1030_v26 = vmul.f32 0.2, %v1897_v22  ;;  %v562_v27 = vpop.f32.mrb[17].mxu0  ;;  %v690_v28 = vpop.f32.mrb[17].mxu1 }
 0x117   :  { %1814 = vst [vmem:[%s2239_s2 + $0xb8] sm:$0xff] %v1750_v19   ;;  %vm998_vm1 = vcmp.ge.f32.partialorder %v1929_v23, 0.0  ;;  %v1062_v29 = vmul.f32 0.2, %v1929_v23  ;;  %v1028_v30 = vmul.f32 0.2, %v562_v27 }
 0x118   :  { %1797 = vst [vmem:[%s2239_s2 + $0x30] sm:$0xff] %v1665_v24   ;;  %1813 = vst [vmem:[%s2239_s2 + $0xb0] sm:$0xff] %v1745_v25   ;;  %v1060_v31 = vmul.f32 0.2, %v690_v28  ;;  %v1898_v32 = vpop.f32.mrb[18].mxu0  ;;  %v1930_v33 = vpop.f32.mrb[18].mxu1  ;;  %v1094_v34 = vsel %vm966_vm0, %v1897_v22, %v1030_v26 }
 0x119   :  { %vm964_vm2 = vcmp.ge.f32.partialorder %v562_v27, 0.0  ;;  %vm967_vm3 = vcmp.ge.f32.partialorder %v1898_v32, 0.0  ;;  %v1031_v35 = vmul.f32 0.2, %v1898_v32  ;;  %v565_v36 = vpop.f32.mrb[19].mxu0  ;;  %v693_v37 = vpop.f32.mrb[19].mxu1  ;;  %v1126_v42 = vsel %vm998_vm1, %v1929_v23, %v1062_v29 }
 0x11a   :  { %vm996_vm4 = vcmp.ge.f32.partialorder %v690_v28, 0.0  ;;  %vm999_vm5 = vcmp.ge.f32.partialorder %v1930_v33, 0.0  ;;  %v1063_v38 = vmul.f32 0.2, %v1930_v33  ;;  %vm965_vm6 = vcmp.ge.f32.partialorder %v565_v36, 0.0 }
 0x11b   :  { %v1095_v39 = vsel %vm967_vm3, %v1898_v32, %v1031_v35  ;;  %v1029_v40 = vmul.f32 0.2, %v565_v36  ;;  %vm997_vm7 = vcmp.ge.f32.partialorder %v693_v37, 0.0  ;;  %v1061_v41 = vmul.f32 0.2, %v693_v37 }
 0x11c   :  { %v1092_v43 = vsel %vm964_vm2, %v562_v27, %v1028_v30  ;;  %v1680_v44 = vpack.c.bf16 %v1095_v39, %v1094_v34  ;;  %v1127_v45 = vsel %vm999_vm5, %v1930_v33, %v1063_v38  ;;  %v1124_v46 = vsel %vm996_vm4, %v690_v28, %v1060_v31 }
 0x11d   :  { %v1760_v47 = vpack.c.bf16 %v1127_v45, %v1126_v42  ;;  %v1093_v48 = vsel %vm965_vm6, %v565_v36, %v1029_v40  ;;  %v1125_v49 = vsel %vm997_vm7, %v693_v37, %v1061_v41  ;;  %v1901_v50 = vpop.f32.mrb[20].mxu0  ;;  %v1933_v51 = vpop.f32.mrb[20].mxu1 }
 0x11e   :  { %1800 = vst [vmem:[%s2239_s2 + $0x48] sm:$0xff] %v1680_v44   ;;  %v1675_v52 = vpack.c.bf16 %v1093_v48, %v1092_v43  ;;  %v1755_v53 = vpack.c.bf16 %v1125_v49, %v1124_v46  ;;  %vm970_vm8 = vcmp.ge.f32.partialorder %v1901_v50, 0.0  ;;  %v1034_v54 = vmul.f32 0.2, %v1901_v50  ;;  %v578_v55 = vpop.f32.mrb[21].mxu0  ;;  %v706_v56 = vpop.f32.mrb[21].mxu1 }
 0x11f   :  { %1816 = vst [vmem:[%s2239_s2 + $0xc8] sm:$0xff] %v1760_v47   ;;  %vm1002_vm9 = vcmp.ge.f32.partialorder %v1933_v51, 0.0  ;;  %v1066_v57 = vmul.f32 0.2, %v1933_v51  ;;  %v1032_v58 = vmul.f32 0.2, %v578_v55 }
 0x120   :  { %1799 = vst [vmem:[%s2239_s2 + $0x40] sm:$0xff] %v1675_v52   ;;  %1815 = vst [vmem:[%s2239_s2 + $0xc0] sm:$0xff] %v1755_v53   ;;  %v1064_v59 = vmul.f32 0.2, %v706_v56  ;;  %v1902_v60 = vpop.f32.mrb[22].mxu0  ;;  %v1934_v61 = vpop.f32.mrb[22].mxu1  ;;  %v1098_v62 = vsel %vm970_vm8, %v1901_v50, %v1034_v54 }
 0x121   :  { %vm968_vm10 = vcmp.ge.f32.partialorder %v578_v55, 0.0  ;;  %vm971_vm11 = vcmp.ge.f32.partialorder %v1902_v60, 0.0  ;;  %v1035_v63 = vmul.f32 0.2, %v1902_v60  ;;  %v581_v0 = vpop.f32.mrb[23].mxu0  ;;  %v709_v1 = vpop.f32.mrb[23].mxu1  ;;  %v1130_v6 = vsel %vm1002_vm9, %v1933_v51, %v1066_v57 }
 0x122   :  { %vm1000_vm12 = vcmp.ge.f32.partialorder %v706_v56, 0.0  ;;  %vm1003_vm13 = vcmp.ge.f32.partialorder %v1934_v61, 0.0  ;;  %v1067_v2 = vmul.f32 0.2, %v1934_v61  ;;  %vm969_vm14 = vcmp.ge.f32.partialorder %v581_v0, 0.0 }
 0x123   :  { %v1099_v3 = vsel %vm971_vm11, %v1902_v60, %v1035_v63  ;;  %v1033_v4 = vmul.f32 0.2, %v581_v0  ;;  %vm1001_vm15 = vcmp.ge.f32.partialorder %v709_v1, 0.0  ;;  %v1065_v5 = vmul.f32 0.2, %v709_v1 }
 0x124   :  { %v1096_v7 = vsel %vm968_vm10, %v578_v55, %v1032_v58  ;;  %v1690_v8 = vpack.c.bf16 %v1099_v3, %v1098_v62  ;;  %v1131_v9 = vsel %vm1003_vm13, %v1934_v61, %v1067_v2  ;;  %v1128_v10 = vsel %vm1000_vm12, %v706_v56, %v1064_v59 }
 0x125   :  { %v1770_v11 = vpack.c.bf16 %v1131_v9, %v1130_v6  ;;  %v1097_v12 = vsel %vm969_vm14, %v581_v0, %v1033_v4  ;;  %v1129_v13 = vsel %vm1001_vm15, %v709_v1, %v1065_v5  ;;  %v1905_v14 = vpop.f32.mrb[24].mxu0  ;;  %v1937_v15 = vpop.f32.mrb[24].mxu1 }
 0x126   :  { %1802 = vst [vmem:[%s2239_s2 + $0x58] sm:$0xff] %v1690_v8   ;;  %v1685_v16 = vpack.c.bf16 %v1097_v12, %v1096_v7  ;;  %v1765_v17 = vpack.c.bf16 %v1129_v13, %v1128_v10  ;;  %vm974_vm0 = vcmp.ge.f32.partialorder %v1905_v14, 0.0  ;;  %v1038_v18 = vmul.f32 0.2, %v1905_v14  ;;  %v594_v19 = vpop.f32.mrb[25].mxu0  ;;  %v722_v20 = vpop.f32.mrb[25].mxu1 }
 0x127   :  { %1818 = vst [vmem:[%s2239_s2 + $0xd8] sm:$0xff] %v1770_v11   ;;  %vm1006_vm1 = vcmp.ge.f32.partialorder %v1937_v15, 0.0  ;;  %v1070_v21 = vmul.f32 0.2, %v1937_v15  ;;  %v1036_v22 = vmul.f32 0.2, %v594_v19 }
 0x128   :  { %1801 = vst [vmem:[%s2239_s2 + $0x50] sm:$0xff] %v1685_v16   ;;  %1817 = vst [vmem:[%s2239_s2 + $0xd0] sm:$0xff] %v1765_v17   ;;  %v1068_v23 = vmul.f32 0.2, %v722_v20  ;;  %v1906_v24 = vpop.f32.mrb[26].mxu0  ;;  %v1938_v25 = vpop.f32.mrb[26].mxu1  ;;  %v1102_v26 = vsel %vm974_vm0, %v1905_v14, %v1038_v18 }
 0x129   :  { %vm972_vm2 = vcmp.ge.f32.partialorder %v594_v19, 0.0  ;;  %vm975_vm3 = vcmp.ge.f32.partialorder %v1906_v24, 0.0  ;;  %v1039_v27 = vmul.f32 0.2, %v1906_v24  ;;  %v597_v28 = vpop.f32.mrb[27].mxu0  ;;  %v725_v29 = vpop.f32.mrb[27].mxu1  ;;  %v1134_v34 = vsel %vm1006_vm1, %v1937_v15, %v1070_v21 }
 0x12a   :  { %vm1004_vm4 = vcmp.ge.f32.partialorder %v722_v20, 0.0  ;;  %vm1007_vm5 = vcmp.ge.f32.partialorder %v1938_v25, 0.0  ;;  %v1071_v30 = vmul.f32 0.2, %v1938_v25  ;;  %vm973_vm6 = vcmp.ge.f32.partialorder %v597_v28, 0.0 }
 0x12b   :  { %v1103_v31 = vsel %vm975_vm3, %v1906_v24, %v1039_v27  ;;  %v1037_v32 = vmul.f32 0.2, %v597_v28  ;;  %vm1005_vm7 = vcmp.ge.f32.partialorder %v725_v29, 0.0  ;;  %v1069_v33 = vmul.f32 0.2, %v725_v29 }
 0x12c   :  { %v1100_v35 = vsel %vm972_vm2, %v594_v19, %v1036_v22  ;;  %v1700_v36 = vpack.c.bf16 %v1103_v31, %v1102_v26  ;;  %v1135_v37 = vsel %vm1007_vm5, %v1938_v25, %v1071_v30  ;;  %v1132_v38 = vsel %vm1004_vm4, %v722_v20, %v1068_v23 }
 0x12d   :  { %v1780_v39 = vpack.c.bf16 %v1135_v37, %v1134_v34  ;;  %v1101_v40 = vsel %vm973_vm6, %v597_v28, %v1037_v32  ;;  %v1133_v41 = vsel %vm1005_vm7, %v725_v29, %v1069_v33  ;;  %v1909_v42 = vpop.f32.mrb[28].mxu0  ;;  %v1941_v43 = vpop.f32.mrb[28].mxu1 }
 0x12e   :  { %1804 = vst [vmem:[%s2239_s2 + $0x68] sm:$0xff] %v1700_v36   ;;  %v1695_v44 = vpack.c.bf16 %v1101_v40, %v1100_v35  ;;  %v1775_v45 = vpack.c.bf16 %v1133_v41, %v1132_v38  ;;  %vm978_vm8 = vcmp.ge.f32.partialorder %v1909_v42, 0.0  ;;  %v1042_v46 = vmul.f32 0.2, %v1909_v42  ;;  %v610_v47 = vpop.f32.mrb[29].mxu0  ;;  %v738_v48 = vpop.f32.mrb[29].mxu1 }
 0x12f   :  { %1820 = vst [vmem:[%s2239_s2 + $0xe8] sm:$0xff] %v1780_v39   ;;  %vm1010_vm9 = vcmp.ge.f32.partialorder %v1941_v43, 0.0  ;;  %v1074_v49 = vmul.f32 0.2, %v1941_v43  ;;  %v1040_v50 = vmul.f32 0.2, %v610_v47 }
 0x130   :  { %1803 = vst [vmem:[%s2239_s2 + $0x60] sm:$0xff] %v1695_v44   ;;  %1819 = vst [vmem:[%s2239_s2 + $0xe0] sm:$0xff] %v1775_v45   ;;  %v1072_v51 = vmul.f32 0.2, %v738_v48  ;;  %v1910_v52 = vpop.f32.mrb[30].mxu0  ;;  %v1942_v53 = vpop.f32.mrb[30].mxu1  ;;  %v1106_v54 = vsel %vm978_vm8, %v1909_v42, %v1042_v46 }
 0x131   :  { %vm976_vm10 = vcmp.ge.f32.partialorder %v610_v47, 0.0  ;;  %vm979_vm11 = vcmp.ge.f32.partialorder %v1910_v52, 0.0  ;;  %v1043_v55 = vmul.f32 0.2, %v1910_v52  ;;  %v613_v56 = vpop.f32.mrb[31].mxu0  ;;  %v741_v57 = vpop.f32.mrb[31].mxu1  ;;  %v1138_v62 = vsel %vm1010_vm9, %v1941_v43, %v1074_v49 }
 0x132   :  { %vm1008_vm12 = vcmp.ge.f32.partialorder %v738_v48, 0.0  ;;  %vm1011_vm13 = vcmp.ge.f32.partialorder %v1942_v53, 0.0  ;;  %v1075_v58 = vmul.f32 0.2, %v1942_v53  ;;  %vm977_vm14 = vcmp.ge.f32.partialorder %v613_v56, 0.0 }
 0x133   :  { %v1107_v59 = vsel %vm979_vm11, %v1910_v52, %v1043_v55  ;;  %v1041_v60 = vmul.f32 0.2, %v613_v56  ;;  %vm1009_vm15 = vcmp.ge.f32.partialorder %v741_v57, 0.0  ;;  %v1073_v61 = vmul.f32 0.2, %v741_v57 }
 0x134   :  { %v1104_v63 = vsel %vm976_vm10, %v610_v47, %v1040_v50  ;;  %v1710_v0 = vpack.c.bf16 %v1107_v59, %v1106_v54  ;;  %v1139_v1 = vsel %vm1011_vm13, %v1942_v53, %v1075_v58  ;;  %v1136_v2 = vsel %vm1008_vm12, %v738_v48, %v1072_v51 }
 0x135   :  { %v1790_v3 = vpack.c.bf16 %v1139_v1, %v1138_v62  ;;  %v1105_v4 = vsel %vm977_vm14, %v613_v56, %v1041_v60  ;;  %v1137_v5 = vsel %vm1009_vm15, %v741_v57, %v1073_v61 }
 0x136   :  { %1806 = vst [vmem:[%s2239_s2 + $0x78] sm:$0xff] %v1710_v0   ;;  %v1705_v6 = vpack.c.bf16 %v1105_v4, %v1104_v63  ;;  %v1785_v7 = vpack.c.bf16 %v1137_v5, %v1136_v2 }
 0x137   :  { %1822 = vst [vmem:[%s2239_s2 + $0xf8] sm:$0xff] %v1790_v3  }
 0x138   :  { %1805 = vst [vmem:[%s2239_s2 + $0x70] sm:$0xff] %v1705_v6   ;;  %1821 = vst [vmem:[%s2239_s2 + $0xf0] sm:$0xff] %v1785_v7  }

// kernel: discriminator_forward.6
= control target key start
LH: loop header
LB: loop body
LE: loop exit
PB: predicated region body
PF: predicated region fallthrough
CT: control target
= control target key end

     0   :  { %s2513_s1 = inlined_call_operand.vmem [shape: bf16[1024,128], index: 1, kind: input, shape index: {}]   ;;  %s2514_s0 = inlined_call_operand.vmem [shape: bf16[128,1024], index: 0, kind: input, shape index: {}]   ;;  %s2515_s2 = inlined_call_operand.vmem [shape: bf16[128,128], index: 2, kind: output, shape index: {}]  }
   0x1   :  { %v1978_v0 = vld [vmem:[%s2513_s1 + $0x40] sm:$0xff]   ;;  %v1982_v4 = vld [vmem:[%s2513_s1 + $0x48] sm:$0xff]   ;;  %v1986_v8 = vld [vmem:[%s2513_s1 + $0x50] sm:$0xff]  }
   0x2   :  { %v1979_v1 = vld [vmem:[%s2513_s1 + $0xc0] sm:$0xff]   ;;  %1722 = vmatprep.subr.bf16.mxu0 %v1978_v0  ;;  %v1983_v5 = vld [vmem:[%s2513_s1 + $0xc8] sm:$0xff]   ;;  %v1987_v9 = vld [vmem:[%s2513_s1 + $0xd0] sm:$0xff]  }
   0x3   :  { %v1980_v2 = vld [vmem:[%s2513_s1] sm:$0xff]   ;;  %1786 = vmatprep.subr.bf16.mxu1 %v1979_v1  ;;  %v1984_v6 = vld [vmem:[%s2513_s1 + $0x8] sm:$0xff]   ;;  %v1988_v10 = vld [vmem:[%s2513_s1 + $0x10] sm:$0xff]  }
   0x4   :  { %v1981_v3 = vld [vmem:[%s2513_s1 + $0x80] sm:$0xff]   ;;  %1723 = vmatpush3.bf16.msra.mxu0 %v1980_v2  ;;  %v1985_v7 = vld [vmem:[%s2513_s1 + $0x88] sm:$0xff]   ;;  %v1989_v11 = vld [vmem:[%s2513_s1 + $0x90] sm:$0xff]  }
   0x5   :  { %1787 = vmatpush3.bf16.msra.mxu1 %v1981_v3  ;;  %1724 = vmatprep.subr.bf16.mxu0 %v1982_v4  ;;  %v1990_v12 = vld [vmem:[%s2513_s1 + $0x58] sm:$0xff]   ;;  %v1994_v16 = vld [vmem:[%s2513_s1 + $0x60] sm:$0xff]   ;;  %v1998_v20 = vld [vmem:[%s2513_s1 + $0x68] sm:$0xff]  }
   0x6   :  { %1788 = vmatprep.subr.bf16.mxu1 %v1983_v5  ;;  %v1991_v13 = vld [vmem:[%s2513_s1 + $0xd8] sm:$0xff]   ;;  %v1995_v17 = vld [vmem:[%s2513_s1 + $0xe0] sm:$0xff]   ;;  %v1999_v21 = vld [vmem:[%s2513_s1 + $0xe8] sm:$0xff]  }
   0x7   :  { %v1992_v14 = vld [vmem:[%s2513_s1 + $0x18] sm:$0xff]   ;;  %v1996_v18 = vld [vmem:[%s2513_s1 + $0x20] sm:$0xff]   ;;  %v2000_v22 = vld [vmem:[%s2513_s1 + $0x28] sm:$0xff]  }
   0x8   :  { %1725 = vmatpush3.bf16.msra.mxu0 %v1984_v6  ;;  %v1993_v15 = vld [vmem:[%s2513_s1 + $0x98] sm:$0xff]   ;;  %v1997_v19 = vld [vmem:[%s2513_s1 + $0xa0] sm:$0xff]   ;;  %v2001_v23 = vld [vmem:[%s2513_s1 + $0xa8] sm:$0xff]  }
   0x9   :  { %1789 = vmatpush3.bf16.msra.mxu1 %v1985_v7  ;;  %1726 = vmatprep.subr.bf16.mxu0 %v1986_v8  ;;  %v2002_v24 = vld [vmem:[%s2513_s1 + $0x70] sm:$0xff]   ;;  %v2006_v28 = vld [vmem:[%s2513_s1 + $0x78] sm:$0xff]   ;;  %v48_v32 = vld [vmem:[%s2514_s0] sm:$0xff] }
   0xa   :  { %1790 = vmatprep.subr.bf16.mxu1 %v1987_v9  ;;  %v2003_v25 = vld [vmem:[%s2513_s1 + $0xf0] sm:$0xff]   ;;  %v2007_v29 = vld [vmem:[%s2513_s1 + $0xf8] sm:$0xff]   ;;  %v52_v33 = vld [vmem:[%s2514_s0 + $0x20] sm:$0xff] }
   0xb   :  { %v2004_v26 = vld [vmem:[%s2513_s1 + $0x30] sm:$0xff]   ;;  %v2008_v30 = vld [vmem:[%s2513_s1 + $0x38] sm:$0xff]   ;;  %v49_v34 = vld [vmem:[%s2514_s0 + $0x8] sm:$0xff]  ;;  %v1515_v35 = vcombine.low %v48_v32, %v52_v33  ;;  %v1516_v36 = vcombine.high %v48_v32, %v52_v33 }
   0xc   :  { %1727 = vmatpush3.bf16.msra.mxu0 %v1988_v10  ;;  %v2005_v27 = vld [vmem:[%s2513_s1 + $0xb0] sm:$0xff]   ;;  %v2009_v31 = vld [vmem:[%s2513_s1 + $0xb8] sm:$0xff]   ;;  %v53_v37 = vld [vmem:[%s2514_s0 + $0x28] sm:$0xff] }
   0xd   :  { %1791 = vmatpush3.bf16.msra.mxu1 %v1989_v11  ;;  %1728 = vmatprep.subr.bf16.mxu0 %v1990_v12  ;;  %v1517_v38 = vcombine.low %v49_v34, %v53_v37  ;;  %v1518_v39 = vcombine.high %v49_v34, %v53_v37  ;;  %v2010_v40 = vld [vmem:[%s2513_s1 + $0x140] sm:$0xff]   ;;  %v57_v47 = vld [vmem:[%s2514_s0 + $0x48] sm:$0xff]  ;;  %v2018_v62 = vld [vmem:[%s2513_s1 + $0x150] sm:$0xff]  }
   0xe   :  { %1792 = vmatprep.subr.bf16.mxu1 %v1991_v13  ;;  %976 = vmatprep.mubr.bf16.mxu0 %v1516_v36  ;;  %v2011_v41 = vld [vmem:[%s2513_s1 + $0x100] sm:$0xff]   ;;  %v61_v48 = vld [vmem:[%s2514_s0 + $0x68] sm:$0xff]  ;;  %v2019_v63 = vld [vmem:[%s2513_s1 + $0x110] sm:$0xff]  }
   0xf   :  { %1073 = vmatprep.mubr.bf16.mxu1 %v1518_v39  ;;  %v2012_v42 = vld [vmem:[%s2513_s1 + $0x1c0] sm:$0xff]   ;;  %v1526_v49 = vcombine.high %v57_v47, %v61_v48  ;;  %v2014_v50 = vld [vmem:[%s2513_s1 + $0x148] sm:$0xff]   ;;  %v1525_v53 = vcombine.low %v57_v47, %v61_v48  ;;  %v2020_v0 = vld [vmem:[%s2513_s1 + $0x1d0] sm:$0xff]  }
  0x10   :  { %1729 = vmatpush3.bf16.msra.mxu0 %v1992_v14  ;;  %v2013_v43 = vld [vmem:[%s2513_s1 + $0x180] sm:$0xff]   ;;  %v2015_v52 = vld [vmem:[%s2513_s1 + $0x108] sm:$0xff]   ;;  %v2021_v1 = vld [vmem:[%s2513_s1 + $0x190] sm:$0xff]  }
  0x11   :  { %1793 = vmatpush3.bf16.msra.mxu1 %v1993_v15  ;;  %1730 = vmatprep.subr.bf16.mxu0 %v1994_v16  ;;  %v56_v44 = vld [vmem:[%s2514_s0 + $0x40] sm:$0xff]  ;;  %v2016_v54 = vld [vmem:[%s2513_s1 + $0x1c8] sm:$0xff]   ;;  %v2022_v10 = vld [vmem:[%s2513_s1 + $0x158] sm:$0xff]  }
  0x12   :  { %1794 = vmatprep.subr.bf16.mxu1 %v1995_v17  ;;  %v60_v45 = vld [vmem:[%s2514_s0 + $0x60] sm:$0xff]  ;;  %v2017_v55 = vld [vmem:[%s2513_s1 + $0x188] sm:$0xff]   ;;  %v2023_v11 = vld [vmem:[%s2513_s1 + $0x118] sm:$0xff]  }
  0x13   :  { %v1524_v46 = vcombine.high %v56_v44, %v60_v45  ;;  %v1523_v51 = vcombine.low %v56_v44, %v60_v45  ;;  %v64_v56 = vld [vmem:[%s2514_s0 + $0x80] sm:$0xff]  ;;  %v65_v58 = vld [vmem:[%s2514_s0 + $0x88] sm:$0xff]  ;;  %v2024_v12 = vld [vmem:[%s2513_s1 + $0x1d8] sm:$0xff]  }
  0x14   :  { %1731 = vmatpush3.bf16.msra.mxu0 %v1996_v18  ;;  %v68_v57 = vld [vmem:[%s2514_s0 + $0xa0] sm:$0xff]  ;;  %v69_v59 = vld [vmem:[%s2514_s0 + $0xa8] sm:$0xff]  ;;  %v2025_v13 = vld [vmem:[%s2513_s1 + $0x198] sm:$0xff]  }
  0x15   :  { %1795 = vmatpush3.bf16.msra.mxu1 %v1997_v19  ;;  %1732 = vmatprep.subr.bf16.mxu0 %v1998_v20  ;;  %v1532_v60 = vcombine.high %v64_v56, %v68_v57  ;;  %v1534_v61 = vcombine.high %v65_v58, %v69_v59  ;;  %v1531_v2 = vcombine.low %v64_v56, %v68_v57  ;;  %v72_v3 = vld [vmem:[%s2514_s0 + $0xc0] sm:$0xff]  ;;  %v73_v5 = vld [vmem:[%s2514_s0 + $0xc8] sm:$0xff]  ;;  %v2035_v39 = vld [vmem:[%s2513_s1 + $0x130] sm:$0xff]  }
  0x16   :  { %1796 = vmatprep.subr.bf16.mxu1 %v1999_v21  ;;  %v76_v4 = vld [vmem:[%s2514_s0 + $0xe0] sm:$0xff]  ;;  %v1533_v6 = vcombine.low %v65_v58, %v69_v59  ;;  %v77_v8 = vld [vmem:[%s2514_s0 + $0xe8] sm:$0xff]  ;;  %v2039_v48 = vld [vmem:[%s2513_s1 + $0x138] sm:$0xff]  }
  0x17   :  { %v1540_v7 = vcombine.high %v72_v3, %v76_v4  ;;  %v1542_v9 = vcombine.high %v73_v5, %v77_v8  ;;  %v80_v14 = vld [vmem:[%s2514_s0 + $0x100] sm:$0xff]  ;;  %v81_v16 = vld [vmem:[%s2514_s0 + $0x108] sm:$0xff]  ;;  %v1539_v19 = vcombine.low %v72_v3, %v76_v4  ;;  %v1541_v21 = vcombine.low %v73_v5, %v77_v8  ;;  %v59_v8 = vld [vmem:[%s2514_s0 + $0x58] sm:$0xff] }
  0x18   :  { %1733 = vmatpush3.bf16.msra.mxu0 %v2000_v22  ;;  %v84_v15 = vld [vmem:[%s2514_s0 + $0x120] sm:$0xff]  ;;  %v85_v17 = vld [vmem:[%s2514_s0 + $0x128] sm:$0xff] }
  0x19   :  { %1797 = vmatpush3.bf16.msra.mxu1 %v2001_v23  ;;  %1734 = vmatprep.subr.bf16.mxu0 %v2002_v24  ;;  %v2026_v18 = vld [vmem:[%s2513_s1 + $0x160] sm:$0xff]   ;;  %v1548_v22 = vcombine.high %v80_v14, %v84_v15  ;;  %v1550_v24 = vcombine.high %v81_v16, %v85_v17  ;;  %v2032_v32 = vld [vmem:[%s2513_s1 + $0x1e8] sm:$0xff]   ;;  %v1547_v34 = vcombine.low %v80_v14, %v84_v15  ;;  %v66_v14 = vld [vmem:[%s2514_s0 + $0x90] sm:$0xff] }
  0x1a   :  { %1798 = vmatprep.subr.bf16.mxu1 %v2003_v25  ;;  %v2027_v20 = vld [vmem:[%s2513_s1 + $0x120] sm:$0xff]   ;;  %v2033_v33 = vld [vmem:[%s2513_s1 + $0x1a8] sm:$0xff]   ;;  %v70_v15 = vld [vmem:[%s2514_s0 + $0xb0] sm:$0xff] }
  0x1b   :  { %v2028_v23 = vld [vmem:[%s2513_s1 + $0x1e0] sm:$0xff]   ;;  %v97_v44 = vld [vmem:[%s2514_s0 + $0x188] sm:$0xff] }
  0x1c   :  { %1735 = vmatpush3.bf16.msra.mxu0 %v2004_v26  ;;  %v2029_v25 = vld [vmem:[%s2513_s1 + $0x1a0] sm:$0xff]   ;;  %v101_v45 = vld [vmem:[%s2514_s0 + $0x1a8] sm:$0xff] }
  0x1d   :  { %1799 = vmatpush3.bf16.msra.mxu1 %v2005_v27  ;;  %1736 = vmatprep.subr.bf16.mxu0 %v2006_v28  ;;  %v88_v26 = vld [vmem:[%s2514_s0 + $0x140] sm:$0xff]  ;;  %v2030_v28 = vld [vmem:[%s2513_s1 + $0x168] sm:$0xff]   ;;  %v1565_v59 = vcombine.low %v97_v44, %v101_v45 }
  0x1e   :  { %1800 = vmatprep.subr.bf16.mxu1 %v2007_v29  ;;  %v92_v27 = vld [vmem:[%s2514_s0 + $0x160] sm:$0xff]  ;;  %v89_v29 = vld [vmem:[%s2514_s0 + $0x148] sm:$0xff] }
  0x1f   :  { %v1556_v36 = vcombine.high %v88_v26, %v92_v27  ;;  %v1555_v47 = vcombine.low %v88_v26, %v92_v27  ;;  %v105_v56 = vld [vmem:[%s2514_s0 + $0x1c8] sm:$0xff]  ;;  %v1535_v26 = vcombine.low %v66_v14, %v70_v15 }
  0x20   :  { %1737 = vmatpush3.bf16.msra.mxu0 %v2008_v30  ;;  %v93_v30 = vld [vmem:[%s2514_s0 + $0x168] sm:$0xff] }
  0x21   :  { %1801 = vmatpush3.bf16.msra.mxu1 %v2009_v31  ;;  %1850 = vmatprep.subr.bf16.mxu0 %v2010_v40  ;;  %v2031_v31 = vld [vmem:[%s2513_s1 + $0x128] sm:$0xff]   ;;  %v1558_v37 = vcombine.high %v89_v29, %v93_v30  ;;  %v2036_v40 = vld [vmem:[%s2513_s1 + $0x1f0] sm:$0xff]  }
  0x22   :  { %1914 = vmatprep.subr.bf16.mxu1 %v2012_v42  ;;  %v100_v42 = vld [vmem:[%s2514_s0 + $0x1a0] sm:$0xff]  ;;  %v109_v57 = vld [vmem:[%s2514_s0 + $0x1e8] sm:$0xff] }
  0x23   :  { %977 = vmatmul.mubr.bf16.vlgmr.msra.gmra.mrb[0].mxu0 %v1515_v35  ;;  %v1549_v35 = vcombine.low %v81_v16, %v85_v17  ;;  %v1573_v3 = vcombine.low %v105_v56, %v109_v57  ;;  %v67_v16 = vld [vmem:[%s2514_s0 + $0x98] sm:$0xff] }
  0x24   :  { %1074 = vmatmul.mubr.bf16.vlgmr.msra.gmra.mrb[0].mxu1 %v1517_v38  ;;  %1851 = vmatpush3.bf16.msra.mxu0 %v2011_v41  ;;  %v2034_v38 = vld [vmem:[%s2513_s1 + $0x170] sm:$0xff]   ;;  %v96_v41 = vld [vmem:[%s2514_s0 + $0x180] sm:$0xff]  ;;  %v71_v17 = vld [vmem:[%s2514_s0 + $0xb8] sm:$0xff] }
  0x25   :  { %1915 = vmatpush3.bf16.msra.mxu1 %v2013_v43  ;;  %984 = vmatprep.mubr.bf16.mxu0 %v1524_v46  ;;  %v2037_v43 = vld [vmem:[%s2513_s1 + $0x1b0] sm:$0xff]   ;;  %v2038_v46 = vld [vmem:[%s2513_s1 + $0x178] sm:$0xff]   ;;  %v1563_v58 = vcombine.low %v96_v41, %v100_v42  ;;  %v1537_v27 = vcombine.low %v67_v16, %v71_v17 }
  0x26   :  { %1081 = vmatprep.mubr.bf16.mxu1 %v1526_v49  ;;  %1852 = vmatprep.subr.bf16.mxu0 %v2014_v50  ;;  %v1557_v49 = vcombine.low %v89_v29, %v93_v30  ;;  %v1564_v50 = vcombine.high %v96_v41, %v100_v42  ;;  %v82_v30 = vld [vmem:[%s2514_s0 + $0x110] sm:$0xff]  ;;  %v95_v41 = vld [vmem:[%s2514_s0 + $0x178] sm:$0xff] }
  0x27   :  { %1916 = vmatprep.subr.bf16.mxu1 %v2016_v54  ;;  %v104_v54 = vld [vmem:[%s2514_s0 + $0x1c0] sm:$0xff] }
  0x28   :  { %1853 = vmatpush3.bf16.msra.mxu0 %v2015_v52  ;;  %v1566_v52 = vcombine.high %v97_v44, %v101_v45 }
  0x29   :  { %1917 = vmatpush3.bf16.msra.mxu1 %v2017_v55  ;;  %1854 = vmatprep.subr.bf16.mxu0 %v2018_v62  ;;  %v108_v55 = vld [vmem:[%s2514_s0 + $0x1e0] sm:$0xff]  ;;  %v50_v62 = vld [vmem:[%s2514_s0 + $0x10] sm:$0xff] }
  0x2a   :  { %1918 = vmatprep.subr.bf16.mxu1 %v2020_v0  ;;  %v51_v0 = vld [vmem:[%s2514_s0 + $0x18] sm:$0xff] }
  0x2b   :  { %985 = vmatmul.mubr.bf16.gmra.mrb[4].mxu0 %v1523_v51  ;;  %v2040_v51 = vld [vmem:[%s2513_s1 + $0x1f8] sm:$0xff]  }
  0x2c   :  { %1082 = vmatmul.mubr.bf16.gmra.mrb[4].mxu1 %v1525_v53  ;;  %992 = vmatprep.mubr.bf16.mxu0 %v1532_v60  ;;  %v2041_v53 = vld [vmem:[%s2513_s1 + $0x1b8] sm:$0xff]   ;;  %v1572_v60 = vcombine.high %v104_v54, %v108_v55 }
  0x2d   :  { %1089 = vmatprep.mubr.bf16.mxu1 %v1534_v61  ;;  %1855 = vmatpush3.bf16.msra.mxu0 %v2019_v63  ;;  %v1574_v61 = vcombine.high %v105_v56, %v109_v57  ;;  %v54_v63 = vld [vmem:[%s2514_s0 + $0x30] sm:$0xff]  ;;  %v107_v56 = vld [vmem:[%s2514_s0 + $0x1d8] sm:$0xff] }
  0x2e   :  { %1919 = vmatpush3.bf16.msra.mxu1 %v2021_v1  ;;  %1856 = vmatprep.subr.bf16.mxu0 %v2022_v10  ;;  %v55_v1 = vld [vmem:[%s2514_s0 + $0x38] sm:$0xff]  ;;  %v1520_v4 = vcombine.high %v50_v62, %v54_v63  ;;  %v1519_v10 = vcombine.low %v50_v62, %v54_v63 }
  0x2f   :  { %1920 = vmatprep.subr.bf16.mxu1 %v2024_v12  ;;  %v1522_v5 = vcombine.high %v51_v0, %v55_v1  ;;  %v111_v57 = vld [vmem:[%s2514_s0 + $0x1f8] sm:$0xff] }
  0x30   :  { %v1577_v63 = vcombine.low %v107_v56, %v111_v57 }
  0x31   :  { %1857 = vmatpush3.bf16.msra.mxu0 %v2023_v11  ;;  %v1521_v11 = vcombine.low %v51_v0, %v55_v1 }
  0x32   :  { %1921 = vmatpush3.bf16.msra.mxu1 %v2025_v13  ;;  %1858 = vmatprep.subr.bf16.mxu0 %v2026_v18 }
  0x33   :  { %993 = vmatmul.mubr.bf16.gmra.mrb[8].mxu0 %v1531_v2  ;;  %1922 = vmatprep.subr.bf16.mxu1 %v2028_v23  ;;  %v1571_v2 = vcombine.low %v104_v54, %v108_v55  ;;  %v78_v23 = vld [vmem:[%s2514_s0 + $0xf0] sm:$0xff] }
  0x34   :  { %1090 = vmatmul.mubr.bf16.gmra.mrb[8].mxu1 %v1533_v6  ;;  %1000 = vmatprep.mubr.bf16.mxu0 %v1540_v7  ;;  %v58_v6 = vld [vmem:[%s2514_s0 + $0x50] sm:$0xff] }
  0x35   :  { %1097 = vmatprep.mubr.bf16.mxu1 %v1542_v9  ;;  %1859 = vmatpush3.bf16.msra.mxu0 %v2027_v20  ;;  %v62_v7 = vld [vmem:[%s2514_s0 + $0x70] sm:$0xff]  ;;  %v63_v9 = vld [vmem:[%s2514_s0 + $0x78] sm:$0xff]  ;;  %v1536_v20 = vcombine.high %v66_v14, %v70_v15 }
  0x36   :  { %1923 = vmatpush3.bf16.msra.mxu1 %v2029_v25  ;;  %1860 = vmatprep.subr.bf16.mxu0 %v2030_v28  ;;  %v1528_v12 = vcombine.high %v58_v6, %v62_v7  ;;  %v1530_v13 = vcombine.high %v59_v8, %v63_v9  ;;  %v1527_v18 = vcombine.low %v58_v6, %v62_v7  ;;  %v79_v25 = vld [vmem:[%s2514_s0 + $0xf8] sm:$0xff]  ;;  %v106_v54 = vld [vmem:[%s2514_s0 + $0x1d0] sm:$0xff] }
  0x37   :  { %1924 = vmatprep.subr.bf16.mxu1 %v2032_v32  ;;  %v83_v32 = vld [vmem:[%s2514_s0 + $0x118] sm:$0xff]  ;;  %v110_v55 = vld [vmem:[%s2514_s0 + $0x1f0] sm:$0xff] }
  0x38   :  { %v1575_v62 = vcombine.low %v106_v54, %v110_v55 }
  0x39   :  { %1861 = vmatpush3.bf16.msra.mxu0 %v2031_v31  ;;  %v86_v31 = vld [vmem:[%s2514_s0 + $0x130] sm:$0xff] }
  0x3a   :  { %1925 = vmatpush3.bf16.msra.mxu1 %v2033_v33  ;;  %1862 = vmatprep.subr.bf16.mxu0 %v2034_v38  ;;  %v87_v33 = vld [vmem:[%s2514_s0 + $0x138] sm:$0xff]  ;;  %v90_v38 = vld [vmem:[%s2514_s0 + $0x150] sm:$0xff]  ;;  %v1551_v42 = vcombine.low %v82_v30, %v86_v31 }
  0x3b   :  { %1001 = vmatmul.mubr.bf16.gmra.mrb[12].mxu0 %v1539_v19  ;;  %1926 = vmatprep.subr.bf16.mxu1 %v2036_v40  ;;  %v1529_v19 = vcombine.low %v59_v8, %v63_v9  ;;  %v91_v40 = vld [vmem:[%s2514_s0 + $0x158] sm:$0xff] }
  0x3c   :  { %1098 = vmatmul.mubr.bf16.gmra.mrb[12].mxu1 %v1541_v21  ;;  %1008 = vmatprep.mubr.bf16.mxu0 %v1548_v22  ;;  %v1538_v21 = vcombine.high %v67_v16, %v71_v17  ;;  %v74_v22 = vld [vmem:[%s2514_s0 + $0xd0] sm:$0xff]  ;;  %v1562_v45 = vcombine.high %v91_v40, %v95_v41 }
  0x3d   :  { %1105 = vmatprep.mubr.bf16.mxu1 %v1550_v24  ;;  %1863 = vmatpush3.bf16.msra.mxu0 %v2035_v39  ;;  %v75_v24 = vld [vmem:[%s2514_s0 + $0xd8] sm:$0xff]  ;;  %v1544_v28 = vcombine.high %v74_v22, %v78_v23  ;;  %v94_v39 = vld [vmem:[%s2514_s0 + $0x170] sm:$0xff] }
  0x3e   :  { %1927 = vmatpush3.bf16.msra.mxu1 %v2037_v43  ;;  %1864 = vmatprep.subr.bf16.mxu0 %v2038_v46  ;;  %v1546_v29 = vcombine.high %v75_v24, %v79_v25  ;;  %v1553_v43 = vcombine.low %v83_v32, %v87_v33  ;;  %v1560_v44 = vcombine.high %v90_v38, %v94_v39  ;;  %v98_v46 = vld [vmem:[%s2514_s0 + $0x190] sm:$0xff] }
  0x3f   :  { %1928 = vmatprep.subr.bf16.mxu1 %v2040_v51  ;;  %v1561_v51 = vcombine.low %v91_v40, %v95_v41 }
  0x41   :  { %1865 = vmatpush3.bf16.msra.mxu0 %v2039_v48  ;;  %v99_v48 = vld [vmem:[%s2514_s0 + $0x198] sm:$0xff] }
  0x42   :  { %1929 = vmatpush3.bf16.msra.mxu1 %v2041_v53 }
  0x43   :  { %1009 = vmatmul.mubr.bf16.gmra.mrb[16].mxu0 %v1547_v34  ;;  %v1543_v34 = vcombine.low %v74_v22, %v78_v23 }
  0x44   :  { %1106 = vmatmul.mubr.bf16.gmra.mrb[16].mxu1 %v1549_v35  ;;  %1016 = vmatprep.mubr.bf16.mxu0 %v1556_v36  ;;  %v1545_v35 = vcombine.low %v75_v24, %v79_v25  ;;  %v1552_v36 = vcombine.high %v82_v30, %v86_v31 }
  0x45   :  { %1113 = vmatprep.mubr.bf16.mxu1 %v1558_v37  ;;  %v1554_v37 = vcombine.high %v83_v32, %v87_v33 }
  0x4b   :  { %1017 = vmatmul.mubr.bf16.gmra.mrb[20].mxu0 %v1555_v47  ;;  %v102_v47 = vld [vmem:[%s2514_s0 + $0x1b0] sm:$0xff] }
  0x4c   :  { %1114 = vmatmul.mubr.bf16.gmra.mrb[20].mxu1 %v1557_v49  ;;  %1024 = vmatprep.mubr.bf16.mxu0 %v1564_v50  ;;  %v103_v49 = vld [vmem:[%s2514_s0 + $0x1b8] sm:$0xff]  ;;  %v1559_v50 = vcombine.low %v90_v38, %v94_v39 }
  0x4d   :  { %1121 = vmatprep.mubr.bf16.mxu1 %v1566_v52  ;;  %v1568_v52 = vcombine.high %v98_v46, %v102_v47  ;;  %v1570_v53 = vcombine.high %v99_v48, %v103_v49 }
  0x53   :  { %1025 = vmatmul.mubr.bf16.gmra.mrb[24].mxu0 %v1563_v58  ;;  %v1567_v58 = vcombine.low %v98_v46, %v102_v47 }
  0x54   :  { %1122 = vmatmul.mubr.bf16.gmra.mrb[24].mxu1 %v1565_v59  ;;  %1032 = vmatprep.mubr.bf16.mxu0 %v1572_v60  ;;  %v1569_v59 = vcombine.low %v99_v48, %v103_v49  ;;  %v1576_v60 = vcombine.high %v106_v54, %v110_v55 }
  0x55   :  { %1129 = vmatprep.mubr.bf16.mxu1 %v1574_v61  ;;  %v1578_v61 = vcombine.high %v107_v56, %v111_v57 }
  0x5b   :  { %1033 = vmatmul.mubr.bf16.gmra.mrb[28].mxu0 %v1571_v2 }
  0x5c   :  { %1130 = vmatmul.mubr.bf16.gmra.mrb[28].mxu1 %v1573_v3  ;;  %1170 = vmatprep.mubr.bf16.mxu0 %v1520_v4 }
  0x5d   :  { %1267 = vmatprep.mubr.bf16.mxu1 %v1522_v5 }
  0x63   :  { %1171 = vmatmul.mubr.bf16.vlgmr.msra.gmra.mrb[32].mxu0 %v1519_v10 }
  0x64   :  { %1268 = vmatmul.mubr.bf16.vlgmr.msra.gmra.mrb[32].mxu1 %v1521_v11  ;;  %1178 = vmatprep.mubr.bf16.mxu0 %v1528_v12 }
  0x65   :  { %1275 = vmatprep.mubr.bf16.mxu1 %v1530_v13 }
  0x6b   :  { %1179 = vmatmul.mubr.bf16.gmra.mrb[36].mxu0 %v1527_v18 }
  0x6c   :  { %1276 = vmatmul.mubr.bf16.gmra.mrb[36].mxu1 %v1529_v19  ;;  %1186 = vmatprep.mubr.bf16.mxu0 %v1536_v20 }
  0x6d   :  { %1283 = vmatprep.mubr.bf16.mxu1 %v1538_v21 }
  0x73   :  { %1187 = vmatmul.mubr.bf16.gmra.mrb[40].mxu0 %v1535_v26 }
  0x74   :  { %1284 = vmatmul.mubr.bf16.gmra.mrb[40].mxu1 %v1537_v27  ;;  %1194 = vmatprep.mubr.bf16.mxu0 %v1544_v28 }
  0x75   :  { %1291 = vmatprep.mubr.bf16.mxu1 %v1546_v29 }
  0x7b   :  { %1195 = vmatmul.mubr.bf16.gmra.mrb[44].mxu0 %v1543_v34 }
  0x7c   :  { %1292 = vmatmul.mubr.bf16.gmra.mrb[44].mxu1 %v1545_v35  ;;  %1202 = vmatprep.mubr.bf16.mxu0 %v1552_v36 }
  0x7d   :  { %1299 = vmatprep.mubr.bf16.mxu1 %v1554_v37 }
  0x83   :  { %1203 = vmatmul.mubr.bf16.gmra.mrb[48].mxu0 %v1551_v42 }
  0x84   :  { %1300 = vmatmul.mubr.bf16.gmra.mrb[48].mxu1 %v1553_v43  ;;  %1210 = vmatprep.mubr.bf16.mxu0 %v1560_v44 }
  0x85   :  { %1307 = vmatprep.mubr.bf16.mxu1 %v1562_v45 }
  0x8b   :  { %1211 = vmatmul.mubr.bf16.gmra.mrb[52].mxu0 %v1559_v50 }
  0x8c   :  { %1308 = vmatmul.mubr.bf16.gmra.mrb[52].mxu1 %v1561_v51  ;;  %1218 = vmatprep.mubr.bf16.mxu0 %v1568_v52 }
  0x8d   :  { %1315 = vmatprep.mubr.bf16.mxu1 %v1570_v53 }
  0x93   :  { %1219 = vmatmul.mubr.bf16.gmra.mrb[56].mxu0 %v1567_v58 }
  0x94   :  { %1316 = vmatmul.mubr.bf16.gmra.mrb[56].mxu1 %v1569_v59  ;;  %1226 = vmatprep.mubr.bf16.mxu0 %v1576_v60 }
  0x95   :  { %1323 = vmatprep.mubr.bf16.mxu1 %v1578_v61 }
  0x9b   :  { %1227 = vmatmul.mubr.bf16.gmra.mrb[60].mxu0 %v1575_v62 }
  0x9c   :  { %1324 = vmatmul.mubr.bf16.gmra.mrb[60].mxu1 %v1577_v63 }
  0xf6   :  { %v1738_v0 = vpop.f32.mrb[0].mxu0 }
  0xf7   :  { %v1802_v1 = vpop.f32.mrb[0].mxu1  ;;  %v1739_v2 = vpop.f32.mrb[1].mxu0 }
  0xf8   :  { %v1740_v3 = vadd.f32 %v1739_v2, %v1738_v0  ;;  %v1803_v4 = vpop.f32.mrb[1].mxu1  ;;  %v1741_v5 = vpop.f32.mrb[2].mxu0 }
  0xf9   :  { %v1804_v6 = vadd.f32 %v1803_v4, %v1802_v1  ;;  %v1805_v7 = vpop.f32.mrb[2].mxu1  ;;  %v1742_v8 = vpop.f32.mrb[3].mxu0 }
  0xfa   :  { %v1743_v9 = vadd.f32 %v1742_v8, %v1741_v5  ;;  %v1806_v10 = vpop.f32.mrb[3].mxu1 }
  0xfb   :  { %v2441_v11 = vadd.f32 %v1804_v6, %v1740_v3  ;;  %v1807_v12 = vadd.f32 %v1806_v10, %v1805_v7 }
  0xfd   :  { %v2443_v13 = vadd.f32 %v1807_v12, %v1743_v9 }
  0xfe   :  { %v1744_v14 = vpop.f32.mrb[4].mxu0 }
  0xff   :  { %v1808_v15 = vpop.f32.mrb[4].mxu1  ;;  %v1745_v16 = vpop.f32.mrb[5].mxu0 }
 0x100   :  { %v1746_v17 = vadd.f32 %v1745_v16, %v1744_v14  ;;  %v1809_v18 = vpop.f32.mrb[5].mxu1  ;;  %v1747_v19 = vpop.f32.mrb[6].mxu0 }
 0x101   :  { %v1810_v20 = vadd.f32 %v1809_v18, %v1808_v15  ;;  %v1811_v21 = vpop.f32.mrb[6].mxu1  ;;  %v1748_v22 = vpop.f32.mrb[7].mxu0 }
 0x102   :  { %v1749_v23 = vadd.f32 %v1748_v22, %v1747_v19  ;;  %v1812_v24 = vpop.f32.mrb[7].mxu1 }
 0x103   :  { %v2445_v25 = vadd.f32 %v1810_v20, %v1746_v17  ;;  %v1813_v26 = vadd.f32 %v1812_v24, %v1811_v21 }
 0x105   :  { %v2447_v27 = vadd.f32 %v1813_v26, %v1749_v23 }
 0x106   :  { %v1750_v28 = vpop.f32.mrb[8].mxu0 }
 0x107   :  { %v1814_v29 = vpop.f32.mrb[8].mxu1  ;;  %v1751_v30 = vpop.f32.mrb[9].mxu0 }
 0x108   :  { %v1752_v31 = vadd.f32 %v1751_v30, %v1750_v28  ;;  %v1815_v32 = vpop.f32.mrb[9].mxu1  ;;  %v1753_v33 = vpop.f32.mrb[10].mxu0 }
 0x109   :  { %v1816_v34 = vadd.f32 %v1815_v32, %v1814_v29  ;;  %v1817_v35 = vpop.f32.mrb[10].mxu1  ;;  %v1754_v36 = vpop.f32.mrb[11].mxu0 }
 0x10a   :  { %v1755_v37 = vadd.f32 %v1754_v36, %v1753_v33  ;;  %v1818_v38 = vpop.f32.mrb[11].mxu1 }
 0x10b   :  { %v2449_v39 = vadd.f32 %v1816_v34, %v1752_v31  ;;  %v1819_v40 = vadd.f32 %v1818_v38, %v1817_v35 }
 0x10d   :  { %v2451_v41 = vadd.f32 %v1819_v40, %v1755_v37 }
 0x10e   :  { %v1756_v42 = vpop.f32.mrb[12].mxu0 }
 0x10f   :  { %v1820_v43 = vpop.f32.mrb[12].mxu1  ;;  %v1757_v44 = vpop.f32.mrb[13].mxu0 }
 0x110   :  { %v1758_v45 = vadd.f32 %v1757_v44, %v1756_v42  ;;  %v1821_v46 = vpop.f32.mrb[13].mxu1  ;;  %v1759_v47 = vpop.f32.mrb[14].mxu0 }
 0x111   :  { %v1822_v48 = vadd.f32 %v1821_v46, %v1820_v43  ;;  %v1823_v49 = vpop.f32.mrb[14].mxu1  ;;  %v1760_v50 = vpop.f32.mrb[15].mxu0 }
 0x112   :  { %v1761_v51 = vadd.f32 %v1760_v50, %v1759_v47  ;;  %v1824_v52 = vpop.f32.mrb[15].mxu1 }
 0x113   :  { %v2453_v53 = vadd.f32 %v1822_v48, %v1758_v45  ;;  %v1825_v54 = vadd.f32 %v1824_v52, %v1823_v49 }
 0x115   :  { %v2455_v55 = vadd.f32 %v1825_v54, %v1761_v51 }
 0x116   :  { %v1762_v56 = vpop.f32.mrb[16].mxu0 }
 0x117   :  { %v1826_v57 = vpop.f32.mrb[16].mxu1  ;;  %v1763_v58 = vpop.f32.mrb[17].mxu0 }
 0x118   :  { %v1764_v59 = vadd.f32 %v1763_v58, %v1762_v56  ;;  %v1827_v60 = vpop.f32.mrb[17].mxu1  ;;  %v1765_v61 = vpop.f32.mrb[18].mxu0 }
 0x119   :  { %v1828_v62 = vadd.f32 %v1827_v60, %v1826_v57  ;;  %v1829_v63 = vpop.f32.mrb[18].mxu1  ;;  %v1766_v0 = vpop.f32.mrb[19].mxu0 }
 0x11a   :  { %v1767_v1 = vadd.f32 %v1766_v0, %v1765_v61  ;;  %v1830_v2 = vpop.f32.mrb[19].mxu1 }
 0x11b   :  { %v2457_v3 = vadd.f32 %v1828_v62, %v1764_v59  ;;  %v1831_v4 = vadd.f32 %v1830_v2, %v1829_v63 }
 0x11d   :  { %v2459_v5 = vadd.f32 %v1831_v4, %v1767_v1 }
 0x11e   :  { %v1768_v6 = vpop.f32.mrb[20].mxu0 }
 0x11f   :  { %v1832_v7 = vpop.f32.mrb[20].mxu1  ;;  %v1769_v8 = vpop.f32.mrb[21].mxu0 }
 0x120   :  { %v1770_v9 = vadd.f32 %v1769_v8, %v1768_v6  ;;  %v1833_v10 = vpop.f32.mrb[21].mxu1  ;;  %v1771_v12 = vpop.f32.mrb[22].mxu0 }
 0x121   :  { %v1834_v14 = vadd.f32 %v1833_v10, %v1832_v7  ;;  %v1835_v15 = vpop.f32.mrb[22].mxu1  ;;  %v1772_v16 = vpop.f32.mrb[23].mxu0 }
 0x122   :  { %v1773_v17 = vadd.f32 %v1772_v16, %v1771_v12  ;;  %v1836_v18 = vpop.f32.mrb[23].mxu1 }
 0x123   :  { %v2461_v19 = vadd.f32 %v1834_v14, %v1770_v9  ;;  %v1837_v20 = vadd.f32 %v1836_v18, %v1835_v15 }
 0x125   :  { %v2463_v21 = vadd.f32 %v1837_v20, %v1773_v17 }
 0x126   :  { %v1774_v22 = vpop.f32.mrb[24].mxu0 }
 0x127   :  { %v1838_v23 = vpop.f32.mrb[24].mxu1  ;;  %v1775_v24 = vpop.f32.mrb[25].mxu0 }
 0x128   :  { %v1776_v26 = vadd.f32 %v1775_v24, %v1774_v22  ;;  %v1839_v28 = vpop.f32.mrb[25].mxu1  ;;  %v1777_v29 = vpop.f32.mrb[26].mxu0 }
 0x129   :  { %v1840_v30 = vadd.f32 %v1839_v28, %v1838_v23  ;;  %v1841_v31 = vpop.f32.mrb[26].mxu1  ;;  %v1778_v32 = vpop.f32.mrb[27].mxu0 }
 0x12a   :  { %v1779_v33 = vadd.f32 %v1778_v32, %v1777_v29  ;;  %v1842_v34 = vpop.f32.mrb[27].mxu1 }
 0x12b   :  { %v2465_v35 = vadd.f32 %v1840_v30, %v1776_v26  ;;  %v1843_v36 = vadd.f32 %v1842_v34, %v1841_v31 }
 0x12d   :  { %v2467_v37 = vadd.f32 %v1843_v36, %v1779_v33 }
 0x12e   :  { %v1780_v38 = vpop.f32.mrb[28].mxu0 }
 0x12f   :  { %v1844_v40 = vpop.f32.mrb[28].mxu1  ;;  %v1781_v42 = vpop.f32.mrb[29].mxu0 }
 0x130   :  { %v1782_v43 = vadd.f32 %v1781_v42, %v1780_v38  ;;  %v1845_v44 = vpop.f32.mrb[29].mxu1  ;;  %v1783_v45 = vpop.f32.mrb[30].mxu0 }
 0x131   :  { %v1846_v46 = vadd.f32 %v1845_v44, %v1844_v40  ;;  %v1847_v47 = vpop.f32.mrb[30].mxu1  ;;  %v1784_v48 = vpop.f32.mrb[31].mxu0 }
 0x132   :  { %v1785_v49 = vadd.f32 %v1784_v48, %v1783_v45  ;;  %v1848_v50 = vpop.f32.mrb[31].mxu1 }
 0x133   :  { %v2469_v51 = vadd.f32 %v1846_v46, %v1782_v43  ;;  %v1849_v52 = vadd.f32 %v1848_v50, %v1847_v47 }
 0x135   :  { %v2471_v54 = vadd.f32 %v1849_v52, %v1785_v49 }
 0x136   :  { %v1866_v56 = vpop.f32.mrb[32].mxu0 }
 0x137   :  { %v1930_v57 = vpop.f32.mrb[32].mxu1  ;;  %v1867_v58 = vpop.f32.mrb[33].mxu0 }
 0x138   :  { %v1868_v59 = vadd.f32 %v1867_v58, %v1866_v56  ;;  %v1931_v60 = vpop.f32.mrb[33].mxu1  ;;  %v1869_v61 = vpop.f32.mrb[34].mxu0 }
 0x139   :  { %v1932_v62 = vadd.f32 %v1931_v60, %v1930_v57  ;;  %v1933_v63 = vpop.f32.mrb[34].mxu1  ;;  %v1870_v0 = vpop.f32.mrb[35].mxu0 }
 0x13a   :  { %v1173_v1 = vadd.f32 %v1868_v59, %v2441_v11  ;;  %v1871_v2 = vadd.f32 %v1870_v0, %v1869_v61  ;;  %v1934_v4 = vpop.f32.mrb[35].mxu1 }
 0x13b   :  { %v1935_v6 = vadd.f32 %v1934_v4, %v1933_v63 }
 0x13c   :  { %v1270_v7 = vadd.f32 %v1932_v62, %v1173_v1  ;;  %v1176_v8 = vadd.f32 %v1871_v2, %v2443_v13 }
 0x13e   :  { %v1399_v9 = vmul.f32 0.2, %v1270_v7  ;;  %v1273_v10 = vadd.f32 %v1935_v6, %v1176_v8  ;;  %v1872_v12 = vpop.f32.mrb[36].mxu0  ;;  %vm1383_vm0 = vcmp.ge.f32.partialorder %v1270_v7, 0.0 }
 0x13f   :  { %v1936_v14 = vpop.f32.mrb[36].mxu1  ;;  %v1873_v15 = vpop.f32.mrb[37].mxu0 }
 0x140   :  { %vm1384_vm1 = vcmp.ge.f32.partialorder %v1273_v10, 0.0  ;;  %v1400_v16 = vmul.f32 0.2, %v1273_v10  ;;  %v1874_v17 = vadd.f32 %v1873_v15, %v1872_v12  ;;  %v1937_v18 = vpop.f32.mrb[37].mxu1  ;;  %v1875_v20 = vpop.f32.mrb[38].mxu0  ;;  %v1415_v24 = vsel %vm1383_vm0, %v1270_v7, %v1399_v9 }
 0x141   :  { %v1938_v22 = vadd.f32 %v1937_v18, %v1936_v14  ;;  %v1939_v23 = vpop.f32.mrb[38].mxu1  ;;  %v1876_v11 = vpop.f32.mrb[39].mxu0 }
 0x142   :  { %v1416_v26 = vsel %vm1384_vm1, %v1273_v10, %v1400_v16  ;;  %v1181_v28 = vadd.f32 %v1874_v17, %v2445_v25  ;;  %v1877_v29 = vadd.f32 %v1876_v11, %v1875_v20  ;;  %v1940_v13 = vpop.f32.mrb[39].mxu1 }
 0x143   :  { %v1678_v30 = vpack.c.bf16 %v1416_v26, %v1415_v24  ;;  %v1941_v31 = vadd.f32 %v1940_v13, %v1939_v23 }
 0x144   :  { %v1278_v32 = vadd.f32 %v1938_v22, %v1181_v28  ;;  %v1184_v33 = vadd.f32 %v1877_v29, %v2447_v27 }
 0x145   :  { %1679 = vst [vmem:[%s2515_s2] sm:$0xff] %v1678_v30  }
 0x146   :  { %v1401_v34 = vmul.f32 0.2, %v1278_v32  ;;  %v1281_v36 = vadd.f32 %v1941_v31, %v1184_v33  ;;  %v1878_v38 = vpop.f32.mrb[40].mxu0  ;;  %vm1385_vm2 = vcmp.ge.f32.partialorder %v1278_v32, 0.0 }
 0x147   :  { %v1942_v40 = vpop.f32.mrb[40].mxu1  ;;  %v1879_v42 = vpop.f32.mrb[41].mxu0 }
 0x148   :  { %vm1386_vm3 = vcmp.ge.f32.partialorder %v1281_v36, 0.0  ;;  %v1402_v43 = vmul.f32 0.2, %v1281_v36  ;;  %v1880_v25 = vadd.f32 %v1879_v42, %v1878_v38  ;;  %v1943_v44 = vpop.f32.mrb[41].mxu1  ;;  %v1881_v45 = vpop.f32.mrb[42].mxu0  ;;  %v1417_v49 = vsel %vm1385_vm2, %v1278_v32, %v1401_v34 }
 0x149   :  { %v1944_v46 = vadd.f32 %v1943_v44, %v1942_v40  ;;  %v1945_v47 = vpop.f32.mrb[42].mxu1  ;;  %v1882_v48 = vpop.f32.mrb[43].mxu0 }
 0x14a   :  { %v1418_v27 = vsel %vm1386_vm3, %v1281_v36, %v1402_v43  ;;  %v1189_v50 = vadd.f32 %v1880_v25, %v2449_v39  ;;  %v1883_v52 = vadd.f32 %v1882_v48, %v1881_v45  ;;  %v1946_v56 = vpop.f32.mrb[43].mxu1 }
 0x14b   :  { %v1683_v57 = vpack.c.bf16 %v1418_v27, %v1417_v49  ;;  %v1947_v58 = vadd.f32 %v1946_v56, %v1945_v47 }
 0x14c   :  { %v1286_v59 = vadd.f32 %v1944_v46, %v1189_v50  ;;  %v1192_v60 = vadd.f32 %v1883_v52, %v2451_v41 }
 0x14d   :  { %1715 = vst [vmem:[%s2515_s2 + $0x8] sm:$0xff] %v1683_v57  }
 0x14e   :  { %v1403_v61 = vmul.f32 0.2, %v1286_v59  ;;  %v1289_v62 = vadd.f32 %v1947_v58, %v1192_v60  ;;  %v1884_v63 = vpop.f32.mrb[44].mxu0  ;;  %vm1387_vm4 = vcmp.ge.f32.partialorder %v1286_v59, 0.0 }
 0x14f   :  { %v1948_v0 = vpop.f32.mrb[44].mxu1  ;;  %v1885_v1 = vpop.f32.mrb[45].mxu0 }
 0x150   :  { %vm1388_vm5 = vcmp.ge.f32.partialorder %v1289_v62, 0.0  ;;  %v1404_v2 = vmul.f32 0.2, %v1289_v62  ;;  %v1886_v39 = vadd.f32 %v1885_v1, %v1884_v63  ;;  %v1949_v4 = vpop.f32.mrb[45].mxu1  ;;  %v1887_v6 = vpop.f32.mrb[46].mxu0  ;;  %v1419_v10 = vsel %vm1387_vm4, %v1286_v59, %v1403_v61 }
 0x151   :  { %v1950_v7 = vadd.f32 %v1949_v4, %v1948_v0  ;;  %v1951_v8 = vpop.f32.mrb[46].mxu1  ;;  %v1888_v9 = vpop.f32.mrb[47].mxu0 }
 0x152   :  { %v1420_v41 = vsel %vm1388_vm5, %v1289_v62, %v1404_v2  ;;  %v1197_v12 = vadd.f32 %v1886_v39, %v2453_v53  ;;  %v1889_v14 = vadd.f32 %v1888_v9, %v1887_v6  ;;  %v1952_v15 = vpop.f32.mrb[47].mxu1 }
 0x153   :  { %v1688_v16 = vpack.c.bf16 %v1420_v41, %v1419_v10  ;;  %v1953_v17 = vadd.f32 %v1952_v15, %v1951_v8 }
 0x154   :  { %v1294_v18 = vadd.f32 %v1950_v7, %v1197_v12  ;;  %v1200_v20 = vadd.f32 %v1889_v14, %v2455_v55 }
 0x155   :  { %1716 = vst [vmem:[%s2515_s2 + $0x10] sm:$0xff] %v1688_v16  }
 0x156   :  { %v1405_v22 = vmul.f32 0.2, %v1294_v18  ;;  %v1297_v23 = vadd.f32 %v1953_v17, %v1200_v20  ;;  %v1890_v11 = vpop.f32.mrb[48].mxu0  ;;  %vm1389_vm6 = vcmp.ge.f32.partialorder %v1294_v18, 0.0 }
 0x157   :  { %v1954_v24 = vpop.f32.mrb[48].mxu1  ;;  %v1891_v26 = vpop.f32.mrb[49].mxu0 }
 0x158   :  { %vm1390_vm7 = vcmp.ge.f32.partialorder %v1297_v23, 0.0  ;;  %v1406_v28 = vmul.f32 0.2, %v1297_v23  ;;  %v1892_v53 = vadd.f32 %v1891_v26, %v1890_v11  ;;  %v1955_v29 = vpop.f32.mrb[49].mxu1  ;;  %v1893_v13 = vpop.f32.mrb[50].mxu0  ;;  %v1421_v33 = vsel %vm1389_vm6, %v1294_v18, %v1405_v22 }
 0x159   :  { %v1956_v30 = vadd.f32 %v1955_v29, %v1954_v24  ;;  %v1957_v31 = vpop.f32.mrb[50].mxu1  ;;  %v1894_v32 = vpop.f32.mrb[51].mxu0 }
 0x15a   :  { %v1422_v55 = vsel %vm1390_vm7, %v1297_v23, %v1406_v28  ;;  %v1205_v34 = vadd.f32 %v1892_v53, %v2457_v3  ;;  %v1895_v36 = vadd.f32 %v1894_v32, %v1893_v13  ;;  %v1958_v38 = vpop.f32.mrb[51].mxu1 }
 0x15b   :  { %v1693_v40 = vpack.c.bf16 %v1422_v55, %v1421_v33  ;;  %v1959_v42 = vadd.f32 %v1958_v38, %v1957_v31 }
 0x15c   :  { %v1302_v43 = vadd.f32 %v1956_v30, %v1205_v34  ;;  %v1208_v25 = vadd.f32 %v1895_v36, %v2459_v5 }
 0x15d   :  { %1717 = vst [vmem:[%s2515_s2 + $0x18] sm:$0xff] %v1693_v40  }
 0x15e   :  { %v1407_v44 = vmul.f32 0.2, %v1302_v43  ;;  %v1305_v45 = vadd.f32 %v1959_v42, %v1208_v25  ;;  %v1896_v46 = vpop.f32.mrb[52].mxu0  ;;  %vm1391_vm8 = vcmp.ge.f32.partialorder %v1302_v43, 0.0 }
 0x15f   :  { %v1960_v47 = vpop.f32.mrb[52].mxu1  ;;  %v1897_v48 = vpop.f32.mrb[53].mxu0 }
 0x160   :  { %vm1392_vm9 = vcmp.ge.f32.partialorder %v1305_v45, 0.0  ;;  %v1408_v49 = vmul.f32 0.2, %v1305_v45  ;;  %v1898_v3 = vadd.f32 %v1897_v48, %v1896_v46  ;;  %v1961_v27 = vpop.f32.mrb[53].mxu1  ;;  %v1899_v50 = vpop.f32.mrb[54].mxu0  ;;  %v1423_v58 = vsel %vm1391_vm8, %v1302_v43, %v1407_v44 }
 0x161   :  { %v1962_v52 = vadd.f32 %v1961_v27, %v1960_v47  ;;  %v1963_v56 = vpop.f32.mrb[54].mxu1  ;;  %v1900_v57 = vpop.f32.mrb[55].mxu0 }
 0x162   :  { %v1424_v5 = vsel %vm1392_vm9, %v1305_v45, %v1408_v49  ;;  %v1213_v59 = vadd.f32 %v1898_v3, %v2461_v19  ;;  %v1901_v60 = vadd.f32 %v1900_v57, %v1899_v50  ;;  %v1964_v61 = vpop.f32.mrb[55].mxu1 }
 0x163   :  { %v1698_v62 = vpack.c.bf16 %v1424_v5, %v1423_v58  ;;  %v1965_v63 = vadd.f32 %v1964_v61, %v1963_v56 }
 0x164   :  { %v1310_v0 = vadd.f32 %v1962_v52, %v1213_v59  ;;  %v1216_v1 = vadd.f32 %v1901_v60, %v2463_v21 }
 0x165   :  { %1718 = vst [vmem:[%s2515_s2 + $0x20] sm:$0xff] %v1698_v62  }
 0x166   :  { %v1409_v2 = vmul.f32 0.2, %v1310_v0  ;;  %v1313_v39 = vadd.f32 %v1965_v63, %v1216_v1  ;;  %v1902_v4 = vpop.f32.mrb[56].mxu0  ;;  %vm1393_vm10 = vcmp.ge.f32.partialorder %v1310_v0, 0.0 }
 0x167   :  { %v1966_v6 = vpop.f32.mrb[56].mxu1  ;;  %v1903_v7 = vpop.f32.mrb[57].mxu0 }
 0x168   :  { %vm1394_vm11 = vcmp.ge.f32.partialorder %v1313_v39, 0.0  ;;  %v1410_v8 = vmul.f32 0.2, %v1313_v39  ;;  %v1904_v19 = vadd.f32 %v1903_v7, %v1902_v4  ;;  %v1967_v9 = vpop.f32.mrb[57].mxu1  ;;  %v1905_v10 = vpop.f32.mrb[58].mxu0  ;;  %v1425_v15 = vsel %vm1393_vm10, %v1310_v0, %v1409_v2 }
 0x169   :  { %v1968_v41 = vadd.f32 %v1967_v9, %v1966_v6  ;;  %v1969_v12 = vpop.f32.mrb[58].mxu1  ;;  %v1906_v14 = vpop.f32.mrb[59].mxu0 }
 0x16a   :  { %v1426_v21 = vsel %vm1394_vm11, %v1313_v39, %v1410_v8  ;;  %v1221_v16 = vadd.f32 %v1904_v19, %v2465_v35  ;;  %v1907_v17 = vadd.f32 %v1906_v14, %v1905_v10  ;;  %v1970_v18 = vpop.f32.mrb[59].mxu1 }
 0x16b   :  { %v1703_v20 = vpack.c.bf16 %v1426_v21, %v1425_v15  ;;  %v1971_v22 = vadd.f32 %v1970_v18, %v1969_v12 }
 0x16c   :  { %v1318_v23 = vadd.f32 %v1968_v41, %v1221_v16  ;;  %v1224_v11 = vadd.f32 %v1907_v17, %v2467_v37 }
 0x16d   :  { %1719 = vst [vmem:[%s2515_s2 + $0x28] sm:$0xff] %v1703_v20  }
 0x16e   :  { %v1411_v24 = vmul.f32 0.2, %v1318_v23  ;;  %v1321_v26 = vadd.f32 %v1971_v22, %v1224_v11  ;;  %v1908_v28 = vpop.f32.mrb[60].mxu0  ;;  %vm1395_vm12 = vcmp.ge.f32.partialorder %v1318_v23, 0.0 }
 0x16f   :  { %v1972_v53 = vpop.f32.mrb[60].mxu1  ;;  %v1909_v29 = vpop.f32.mrb[61].mxu0 }
 0x170   :  { %vm1396_vm13 = vcmp.ge.f32.partialorder %v1321_v26, 0.0  ;;  %v1412_v13 = vmul.f32 0.2, %v1321_v26  ;;  %v1910_v35 = vadd.f32 %v1909_v29, %v1908_v28  ;;  %v1973_v30 = vpop.f32.mrb[61].mxu1  ;;  %v1911_v31 = vpop.f32.mrb[62].mxu0  ;;  %v1427_v34 = vsel %vm1395_vm12, %v1318_v23, %v1411_v24 }
 0x171   :  { %v1974_v32 = vadd.f32 %v1973_v30, %v1972_v53  ;;  %v1975_v33 = vpop.f32.mrb[62].mxu1  ;;  %v1912_v55 = vpop.f32.mrb[63].mxu0 }
 0x172   :  { %v1428_v37 = vsel %vm1396_vm13, %v1321_v26, %v1412_v13  ;;  %v1229_v36 = vadd.f32 %v1910_v35, %v2469_v51  ;;  %v1913_v38 = vadd.f32 %v1912_v55, %v1911_v31  ;;  %v1976_v40 = vpop.f32.mrb[63].mxu1 }
 0x173   :  { %v1708_v42 = vpack.c.bf16 %v1428_v37, %v1427_v34  ;;  %v1977_v43 = vadd.f32 %v1976_v40, %v1975_v33 }
 0x174   :  { %v1326_v25 = vadd.f32 %v1974_v32, %v1229_v36  ;;  %v1232_v44 = vadd.f32 %v1913_v38, %v2471_v54 }
 0x175   :  { %1720 = vst [vmem:[%s2515_s2 + $0x30] sm:$0xff] %v1708_v42  }
 0x176   :  { %v1413_v45 = vmul.f32 0.2, %v1326_v25  ;;  %v1329_v46 = vadd.f32 %v1977_v43, %v1232_v44  ;;  %vm1397_vm14 = vcmp.ge.f32.partialorder %v1326_v25, 0.0 }
 0x178   :  { %vm1398_vm15 = vcmp.ge.f32.partialorder %v1329_v46, 0.0  ;;  %v1414_v47 = vmul.f32 0.2, %v1329_v46  ;;  %v1429_v48 = vsel %vm1397_vm14, %v1326_v25, %v1413_v45 }
 0x17a   :  { %v1430_v49 = vsel %vm1398_vm15, %v1329_v46, %v1414_v47 }
 0x17b   :  { %v1713_v3 = vpack.c.bf16 %v1430_v49, %v1429_v48 }
 0x17d   :  { %1721 = vst [vmem:[%s2515_s2 + $0x38] sm:$0xff] %v1713_v3  }

// kernel: discriminator_forward.7
= control target key start
LH: loop header
LB: loop body
LE: loop exit
PB: predicated region body
PF: predicated region fallthrough
CT: control target
= control target key end

     0   :  { %s1986_s9 = smov 0   ;;  %s1988_s10 = smov 0   ;;  %s2247_s0 = inlined_call_operand.vmem [shape: bf16[32,2048], index: 0, kind: input, shape index: {}]   ;;  %s2248_s1 = inlined_call_operand.vmem [shape: bf16[2048,256], index: 1, kind: input, shape index: {}]   ;;  %s2249_s2 = inlined_call_operand.vmem [shape: bf16[32,256], index: 2, kind: output, shape index: {}]  }
   0x1   :  { %s1990_s11 = smov 0   ;;  %s1992_s12 = smov 0  }
   0x2   :  { %s1994_s13 = smov 0  }
   0x3 LB: > { %s21_s14 = sadd.s32 1, %s1964_s12  ;;  %p40_p1 = scmp.ne.s32.totalorder %s1956_s10, %s1952_s9  ;;  %s1968_s13 = sphi %s1994_s13, %s12_s13   ;;  %s1964_s12 = sphi %s1992_s12, %s2253_s12   ;;  %s1960_s11 = sphi %s1990_s11, %s2252_s11   ;;  %s1956_s10 = sphi %s1988_s10, %s2251_s10   ;;  %s1952_s9 = sphi %s1986_s9, %s2250_s9  }
   0x4   : > { %p22_p0 = scmp.ge.s32.totalorder %s21_s14, 2  ;;  %p41_p2 = scmp.eq.s32.totalorder %s1968_s13, 0 }
   0x5   : > { %s33_s16 = sadd.s32 1, %s1956_s10  ;;  %p1504_p5 = scmp.ge.s32.totalorder %s1968_s13, 2 }
   0x6   : > { %s2255_s14 = smov (%p22_p0, %s21_s14), 0  ;;  %p42_p3 = por %p41_p2, %p40_p1 }
   0x7   : > { %s29_s15 = ssub.s32 %s1964_s12, %s2255_s14  ;;  %118 = sbr.rel (%p1504_p5) target bundleno = 26 (0x1a), region = 16 }
   0x8   : > { %p31_p4 = scmp.eq.s32.totalorder %s29_s15, 0 }
   0xa   : > { %s2021_s17 = scalar_select %p31_p4, %s1956_s10, %s33_s16  }
   0xe   : > { %121 = sbr.rel (!%p42_p3) target bundleno = 26 (0x1a), region = 20  ;;  %s123_s18 = sand.u32 (%p42_p3), 1, %s1956_s10  }
   0xf   : > { %s1667_s19 = sshll.u32 (%p42_p3), %s1964_s12, 5  ;;  %s1505_s20 = sshll.u32 (%p42_p3), %s123_s18, 7 }
  0x10   : > { %s2029_s23 = scalar_lea.vmem (%p42_p3), %s2247_s0, %s1667_s19  ;;  %s125_s24 = scalar_lea.vmem (%p42_p3), [#allocation3], %s1505_s20 }
  0x11   : > { %v144_v0 = vld [vmem:[%s2029_s23] sm:$0xff] (%p42_p3)  ;;  %v146_v1 = vld [vmem:[%s2029_s23 + $0x8] sm:$0xff] (%p42_p3)  ;;  %v148_v2 = vld [vmem:[%s2029_s23 + $0x10] sm:$0xff] (%p42_p3) }
  0x12   : > { %145 = vst [vmem:[%s125_s24] sm:$0xff] (%p42_p3), %v144_v0  ;;  %147 = vst [vmem:[%s125_s24 + $0x8] sm:$0xff] (%p42_p3), %v146_v1  ;;  %v150_v3 = vld [vmem:[%s2029_s23 + $0x18] sm:$0xff] (%p42_p3)  ;;  %v152_v4 = vld [vmem:[%s2029_s23 + $0x40] sm:$0xff] (%p42_p3) }
  0x13   : > { %149 = vst [vmem:[%s125_s24 + $0x10] sm:$0xff] (%p42_p3), %v148_v2  ;;  %v154_v5 = vld [vmem:[%s2029_s23 + $0x48] sm:$0xff] (%p42_p3)  ;;  %151 = vst [vmem:[%s125_s24 + $0x18] sm:$0xff] (%p42_p3), %v150_v3  ;;  %v156_v6 = vld [vmem:[%s2029_s23 + $0x50] sm:$0xff] (%p42_p3) }
  0x14   : > { %153 = vst [vmem:[%s125_s24 + $0x20] sm:$0xff] (%p42_p3), %v152_v4  ;;  %155 = vst [vmem:[%s125_s24 + $0x28] sm:$0xff] (%p42_p3), %v154_v5  ;;  %v158_v7 = vld [vmem:[%s2029_s23 + $0x58] sm:$0xff] (%p42_p3)  ;;  %v160_v8 = vld [vmem:[%s2029_s23 + $0x80] sm:$0xff] (%p42_p3) }
  0x15   : > { %157 = vst [vmem:[%s125_s24 + $0x30] sm:$0xff] %v156_v6  ;;  %159 = vst [vmem:[%s125_s24 + $0x38] sm:$0xff] %v158_v7  ;;  %v162_v9 = vld [vmem:[%s2029_s23 + $0x88] sm:$0xff]  ;;  %v164_v10 = vld [vmem:[%s2029_s23 + $0x90] sm:$0xff] }
  0x16   : > { %161 = vst [vmem:[%s125_s24 + $0x40] sm:$0xff] %v160_v8  ;;  %v166_v11 = vld [vmem:[%s2029_s23 + $0x98] sm:$0xff]  ;;  %163 = vst [vmem:[%s125_s24 + $0x48] sm:$0xff] %v162_v9  ;;  %v168_v12 = vld [vmem:[%s2029_s23 + $0xc0] sm:$0xff] }
  0x17   : > { %165 = vst [vmem:[%s125_s24 + $0x50] sm:$0xff] %v164_v10  ;;  %167 = vst [vmem:[%s125_s24 + $0x58] sm:$0xff] %v166_v11  ;;  %v170_v13 = vld [vmem:[%s2029_s23 + $0xc8] sm:$0xff]  ;;  %v172_v14 = vld [vmem:[%s2029_s23 + $0xd0] sm:$0xff] }
  0x18   : > { %169 = vst [vmem:[%s125_s24 + $0x60] sm:$0xff] %v168_v12  ;;  %171 = vst [vmem:[%s125_s24 + $0x68] sm:$0xff] %v170_v13  ;;  %v174_v15 = vld [vmem:[%s2029_s23 + $0xd8] sm:$0xff] }
  0x19   : > { %173 = vst [vmem:[%s125_s24 + $0x70] sm:$0xff] %v172_v14  ;;  %175 = vst [vmem:[%s125_s24 + $0x78] sm:$0xff] %v174_v15 }
  0x1a PF: > { %p1508_p6 = scmp.ge.s32.totalorder %s1968_s13, 1  ;;  %p190_p7 = scmp.lt.s32.totalorder %s1968_s13, 3 }
  0x1c   : > { %p191_p8 = pnand %p1508_p6, %p190_p7 }
  0x1d   : > { %s197_s25 = sand.u32 (!%p191_p8), 1, %s1952_s9   ;;  %s1510_s26 = sshll.u32 (!%p191_p8), %s1960_s11, 7 }
  0x1e   : > { %194 = sbr.rel (%p191_p8) target bundleno = 415 (0x19f), region = 47  ;;  %s1509_s27 = sshll.u32 (!%p191_p8), %s197_s25, 7 }
  0x1f   : > { %p228_p9 = scmp.lt.s32.totalorder (!%p191_p8), %s1510_s26, 255  ;;  %s2056_s4 = scalar_lea.vmem (!%p191_p8), [#allocation3], %s1509_s27 }
  0x20   : > { %p1513_p10 = scmp.ne.s32.totalorder (!%p191_p8), %s1960_s11, 0 }
  0x25   : > { %s2257_s26 = smov (!%p228_p9, %s1510_s26), 255  ;;  %244 = sbr.rel (%p1513_p10) target bundleno = 44 (0x2c), region = 55 }
  0x26   : > { %s1668_s28 = sshll.u32 %s2257_s26, 3  ;;  %v1970_v16 = vmov (!%p1513_p10), 0.0  }
  0x27   : > { %s2054_s3 = scalar_lea.vmem %s2248_s1, %s1668_s28  ;;  %245 = vst [vmem:[#allocation2] sm:$0xff] (!%p1513_p10), %v1970_v16  ;;  %246 = vst [vmem:[#allocation2 + $0x8] sm:$0xff] (!%p1513_p10), %v1970_v16 }
  0x28   : > { %247 = vst [vmem:[#allocation2 + $0x10] sm:$0xff] (!%p1513_p10), %v1970_v16  ;;  %248 = vst [vmem:[#allocation2 + $0x18] sm:$0xff] (!%p1513_p10), %v1970_v16 }
  0x29   : > { %249 = vst [vmem:[#allocation2 + $0x20] sm:$0xff] (!%p1513_p10), %v1970_v16  ;;  %250 = vst [vmem:[#allocation2 + $0x28] sm:$0xff] (!%p1513_p10), %v1970_v16 }
  0x2a   : > { %251 = vst [vmem:[#allocation2 + $0x30] sm:$0xff] (!%p1513_p10), %v1970_v16  ;;  %252 = vst [vmem:[#allocation2 + $0x38] sm:$0xff] (!%p1513_p10), %v1970_v16 }
  0x2c PF: > { %v1738_v17 = vld [vmem:[%s2054_s3 + $0x4] ss:$8 sps:$4 sm:$0xff]   ;;  %v1742_v19 = vld [vmem:[%s2054_s3] ss:$8 sps:$4 sm:$0xff]   ;;  %v1744_v21 = vld [vmem:[%s2054_s3 + $0x14] ss:$8 sps:$4 sm:$0xff]  }
  0x2d   : > { %v1740_v18 = vld [vmem:[%s2054_s3 + $0x204] ss:$8 sps:$4 sm:$0xff]   ;;  %1125 = vmatprep.subr.bf16.mxu1 %v1738_v17  ;;  %v1743_v20 = vld [vmem:[%s2054_s3 + $0x200] ss:$8 sps:$4 sm:$0xff]   ;;  %v1746_v22 = vld [vmem:[%s2054_s3 + $0x214] ss:$8 sps:$4 sm:$0xff]  }
  0x2e   : > { %1231 = vmatprep.subr.bf16.mxu0 %v1740_v18  ;;  %1126 = vmatpush1.bf16.msra.mxu1 %v1742_v19  ;;  %v1748_v23 = vld [vmem:[%s2054_s3 + $0x10] ss:$8 sps:$4 sm:$0xff]   ;;  %v1750_v25 = vld [vmem:[%s2054_s3 + $0x24] ss:$8 sps:$4 sm:$0xff]   ;;  %v1754_v27 = vld [vmem:[%s2054_s3 + $0x20] ss:$8 sps:$4 sm:$0xff]  }
  0x2f   : > { %1232 = vmatpush1.bf16.msra.mxu0 %v1743_v20  ;;  %1127 = vmatprep.subr.bf16.mxu1 %v1744_v21  ;;  %v1749_v24 = vld [vmem:[%s2054_s3 + $0x210] ss:$8 sps:$4 sm:$0xff]   ;;  %v1752_v26 = vld [vmem:[%s2054_s3 + $0x224] ss:$8 sps:$4 sm:$0xff]   ;;  %v1755_v28 = vld [vmem:[%s2054_s3 + $0x220] ss:$8 sps:$4 sm:$0xff]  }
  0x30   : > { %1233 = vmatprep.subr.bf16.mxu0 %v1746_v22  ;;  %v1756_v29 = vld [vmem:[%s2054_s3 + $0x34] ss:$8 sps:$4 sm:$0xff]   ;;  %v1760_v31 = vld [vmem:[%s2054_s3 + $0x30] ss:$8 sps:$4 sm:$0xff]   ;;  %v1762_v33 = vld [vmem:[%s2054_s3 + $0x44] ss:$8 sps:$4 sm:$0xff]  }
  0x31   : > { %v1758_v30 = vld [vmem:[%s2054_s3 + $0x234] ss:$8 sps:$4 sm:$0xff]   ;;  %v1761_v32 = vld [vmem:[%s2054_s3 + $0x230] ss:$8 sps:$4 sm:$0xff]   ;;  %v1764_v34 = vld [vmem:[%s2054_s3 + $0x244] ss:$8 sps:$4 sm:$0xff]  }
  0x32   : > { %1128 = vmatpush1.bf16.msra.mxu1 %v1748_v23  ;;  %v1766_v35 = vld [vmem:[%s2054_s3 + $0x40] ss:$8 sps:$4 sm:$0xff]   ;;  %v1768_v37 = vld [vmem:[%s2054_s3 + $0x54] ss:$8 sps:$4 sm:$0xff]   ;;  %v1772_v39 = vld [vmem:[%s2054_s3 + $0x50] ss:$8 sps:$4 sm:$0xff]  }
  0x33   : > { %1234 = vmatpush1.bf16.msra.mxu0 %v1749_v24  ;;  %1129 = vmatprep.subr.bf16.mxu1 %v1750_v25  ;;  %v1767_v36 = vld [vmem:[%s2054_s3 + $0x240] ss:$8 sps:$4 sm:$0xff]   ;;  %v1770_v38 = vld [vmem:[%s2054_s3 + $0x254] ss:$8 sps:$4 sm:$0xff]   ;;  %v1773_v40 = vld [vmem:[%s2054_s3 + $0x250] ss:$8 sps:$4 sm:$0xff]  }
  0x34   : > { %1235 = vmatprep.subr.bf16.mxu0 %v1752_v26  ;;  %v1774_v41 = vld [vmem:[%s2054_s3 + $0x64] ss:$8 sps:$4 sm:$0xff]   ;;  %v1778_v43 = vld [vmem:[%s2054_s3 + $0x60] ss:$8 sps:$4 sm:$0xff]   ;;  %v1780_v45 = vld [vmem:[%s2054_s3 + $0x74] ss:$8 sps:$4 sm:$0xff]  }
  0x35   : > { %v1776_v42 = vld [vmem:[%s2054_s3 + $0x264] ss:$8 sps:$4 sm:$0xff]   ;;  %v1779_v44 = vld [vmem:[%s2054_s3 + $0x260] ss:$8 sps:$4 sm:$0xff]   ;;  %v1782_v46 = vld [vmem:[%s2054_s3 + $0x274] ss:$8 sps:$4 sm:$0xff]  }
  0x36   : > { %1130 = vmatpush1.bf16.msra.mxu1 %v1754_v27  ;;  %v1784_v47 = vld [vmem:[%s2054_s3 + $0x70] ss:$8 sps:$4 sm:$0xff]   ;;  %v1786_v49 = vld [vmem:[%s2054_s3 + $0x84] ss:$8 sps:$4 sm:$0xff]   ;;  %v1790_v51 = vld [vmem:[%s2054_s3 + $0x80] ss:$8 sps:$4 sm:$0xff]  }
  0x37   : > { %1236 = vmatpush1.bf16.msra.mxu0 %v1755_v28  ;;  %1131 = vmatprep.subr.bf16.mxu1 %v1756_v29  ;;  %v1785_v48 = vld [vmem:[%s2054_s3 + $0x270] ss:$8 sps:$4 sm:$0xff]   ;;  %v1788_v50 = vld [vmem:[%s2054_s3 + $0x284] ss:$8 sps:$4 sm:$0xff]   ;;  %v1791_v52 = vld [vmem:[%s2054_s3 + $0x280] ss:$8 sps:$4 sm:$0xff]  }
  0x38   : > { %1237 = vmatprep.subr.bf16.mxu0 %v1758_v30  ;;  %v1792_v53 = vld [vmem:[%s2054_s3 + $0x94] ss:$8 sps:$4 sm:$0xff]   ;;  %v1796_v55 = vld [vmem:[%s2054_s3 + $0x90] ss:$8 sps:$4 sm:$0xff]   ;;  %v1798_v57 = vld [vmem:[%s2054_s3 + $0xa4] ss:$8 sps:$4 sm:$0xff]  }
  0x39   : > { %v1794_v54 = vld [vmem:[%s2054_s3 + $0x294] ss:$8 sps:$4 sm:$0xff]   ;;  %v1797_v56 = vld [vmem:[%s2054_s3 + $0x290] ss:$8 sps:$4 sm:$0xff]   ;;  %v1800_v58 = vld [vmem:[%s2054_s3 + $0x2a4] ss:$8 sps:$4 sm:$0xff]  }
  0x3a   : > { %1132 = vmatpush1.bf16.msra.mxu1 %v1760_v31  ;;  %v1802_v59 = vld [vmem:[%s2054_s3 + $0xa0] ss:$8 sps:$4 sm:$0xff]   ;;  %v1804_v61 = vld [vmem:[%s2054_s3 + $0xb4] ss:$8 sps:$4 sm:$0xff]   ;;  %v1808_v63 = vld [vmem:[%s2054_s3 + $0xb0] ss:$8 sps:$4 sm:$0xff]  }
  0x3b   : > { %1238 = vmatpush1.bf16.msra.mxu0 %v1761_v32  ;;  %1133 = vmatprep.subr.bf16.mxu1 %v1762_v33  ;;  %v1803_v60 = vld [vmem:[%s2054_s3 + $0x2a0] ss:$8 sps:$4 sm:$0xff]   ;;  %v1806_v62 = vld [vmem:[%s2054_s3 + $0x2b4] ss:$8 sps:$4 sm:$0xff]   ;;  %v1809_v0 = vld [vmem:[%s2054_s3 + $0x2b0] ss:$8 sps:$4 sm:$0xff]  }
  0x3c   : > { %1239 = vmatprep.subr.bf16.mxu0 %v1764_v34  ;;  %v261_v1 = vld [vmem:[%s2056_s4] sm:$0xff]  ;;  %v263_v6 = vld [vmem:[%s2056_s4 + $0x10] sm:$0xff]  ;;  %p1658_p11 = scmp.ne.s32.totalorder %s1960_s11, 1 }
  0x3d   : > { %v265_v2 = vld [vmem:[%s2056_s4 + $0x20] sm:$0xff]  ;;  %v267_v7 = vld [vmem:[%s2056_s4 + $0x30] sm:$0xff] }
  0x3e   : > { %1134 = vmatpush1.bf16.msra.mxu1 %v1766_v35  ;;  %v1810_v3 = vld [vmem:[%s2054_s3 + $0xc4] ss:$8 sps:$4 sm:$0xff]   ;;  %v1515_v5 = vcombine.high %v261_v1, %v265_v2  ;;  %v1519_v8 = vcombine.high %v263_v6, %v267_v7  ;;  %v1814_v9 = vld [vmem:[%s2054_s3 + $0xc0] ss:$8 sps:$4 sm:$0xff]   ;;  %v1816_v11 = vld [vmem:[%s2054_s3 + $0xd4] ss:$8 sps:$4 sm:$0xff]   ;;  %v1514_v25 = vcombine.low %v261_v1, %v265_v2  ;;  %v1518_v27 = vcombine.low %v263_v6, %v267_v7 }
  0x3f   : > { %1240 = vmatpush1.bf16.msra.mxu0 %v1767_v36  ;;  %1135 = vmatprep.subr.bf16.mxu1 %v1768_v37  ;;  %v1812_v4 = vld [vmem:[%s2054_s3 + $0x2c4] ss:$8 sps:$4 sm:$0xff]   ;;  %v1815_v10 = vld [vmem:[%s2054_s3 + $0x2c0] ss:$8 sps:$4 sm:$0xff]   ;;  %v1818_v12 = vld [vmem:[%s2054_s3 + $0x2d4] ss:$8 sps:$4 sm:$0xff]  }
  0x40   : > { %1241 = vmatprep.subr.bf16.mxu0 %v1770_v38  ;;  %1157 = vmatprep.mubr.bf16.mxu1 %v1515_v5  ;;  %v1820_v13 = vld [vmem:[%s2054_s3 + $0xd0] ss:$8 sps:$4 sm:$0xff]   ;;  %v1822_v15 = vld [vmem:[%s2054_s3 + $0xe4] ss:$8 sps:$4 sm:$0xff]   ;;  %v1826_v17 = vld [vmem:[%s2054_s3 + $0xe0] ss:$8 sps:$4 sm:$0xff]  }
  0x41   : > { %1263 = vmatprep.mubr.bf16.mxu0 %v1519_v8  ;;  %v1821_v14 = vld [vmem:[%s2054_s3 + $0x2d0] ss:$8 sps:$4 sm:$0xff]   ;;  %v1824_v16 = vld [vmem:[%s2054_s3 + $0x2e4] ss:$8 sps:$4 sm:$0xff]   ;;  %v1827_v18 = vld [vmem:[%s2054_s3 + $0x2e0] ss:$8 sps:$4 sm:$0xff]  }
  0x42   : > { %1136 = vmatpush1.bf16.msra.mxu1 %v1772_v39  ;;  %v1828_v19 = vld [vmem:[%s2054_s3 + $0xf4] ss:$8 sps:$4 sm:$0xff]   ;;  %v1832_v21 = vld [vmem:[%s2054_s3 + $0xf0] ss:$8 sps:$4 sm:$0xff]   ;;  %v1836_v23 = vld [vmem:[%s2054_s3 + $0x104] ss:$8 sps:$4 sm:$0xff]  }
  0x43   : > { %1242 = vmatpush1.bf16.msra.mxu0 %v1773_v40  ;;  %1137 = vmatprep.subr.bf16.mxu1 %v1774_v41  ;;  %v1830_v20 = vld [vmem:[%s2054_s3 + $0x2f4] ss:$8 sps:$4 sm:$0xff]   ;;  %v1833_v22 = vld [vmem:[%s2054_s3 + $0x2f0] ss:$8 sps:$4 sm:$0xff]   ;;  %v1839_v24 = vld [vmem:[%s2054_s3 + $0x304] ss:$8 sps:$4 sm:$0xff]  }
  0x44   : > { %1243 = vmatprep.subr.bf16.mxu0 %v1776_v42  ;;  %v1834_v26 = vld [vmem:[%s2054_s3 + $0x100] ss:$8 sps:$4 sm:$0xff]   ;;  %v1842_v29 = vld [vmem:[%s2054_s3 + $0x114] ss:$8 sps:$4 sm:$0xff]   ;;  %v1840_v31 = vld [vmem:[%s2054_s3 + $0x110] ss:$8 sps:$4 sm:$0xff]  }
  0x45   : > { %v1837_v28 = vld [vmem:[%s2054_s3 + $0x300] ss:$8 sps:$4 sm:$0xff]   ;;  %v1845_v30 = vld [vmem:[%s2054_s3 + $0x314] ss:$8 sps:$4 sm:$0xff]   ;;  %v1843_v32 = vld [vmem:[%s2054_s3 + $0x310] ss:$8 sps:$4 sm:$0xff]  }
  0x46   : > { %1138 = vmatpush1.bf16.msra.mxu1 %v1778_v43  ;;  %v1848_v33 = vld [vmem:[%s2054_s3 + $0x124] ss:$8 sps:$4 sm:$0xff]   ;;  %v1846_v35 = vld [vmem:[%s2054_s3 + $0x120] ss:$8 sps:$4 sm:$0xff]   ;;  %v1854_v37 = vld [vmem:[%s2054_s3 + $0x134] ss:$8 sps:$4 sm:$0xff]  }
  0x47   : > { %1244 = vmatpush1.bf16.msra.mxu0 %v1779_v44  ;;  %1139 = vmatprep.subr.bf16.mxu1 %v1780_v45  ;;  %v1851_v34 = vld [vmem:[%s2054_s3 + $0x324] ss:$8 sps:$4 sm:$0xff]   ;;  %v1849_v36 = vld [vmem:[%s2054_s3 + $0x320] ss:$8 sps:$4 sm:$0xff]   ;;  %v1857_v38 = vld [vmem:[%s2054_s3 + $0x334] ss:$8 sps:$4 sm:$0xff]  }
  0x48   : > { %1245 = vmatprep.subr.bf16.mxu0 %v1782_v46  ;;  %v1852_v39 = vld [vmem:[%s2054_s3 + $0x130] ss:$8 sps:$4 sm:$0xff]   ;;  %v1860_v41 = vld [vmem:[%s2054_s3 + $0x144] ss:$8 sps:$4 sm:$0xff]   ;;  %v1858_v43 = vld [vmem:[%s2054_s3 + $0x140] ss:$8 sps:$4 sm:$0xff]  }
  0x49   : > { %v1855_v40 = vld [vmem:[%s2054_s3 + $0x330] ss:$8 sps:$4 sm:$0xff]   ;;  %v1863_v42 = vld [vmem:[%s2054_s3 + $0x344] ss:$8 sps:$4 sm:$0xff]   ;;  %v1861_v44 = vld [vmem:[%s2054_s3 + $0x340] ss:$8 sps:$4 sm:$0xff]  }
  0x4a   : > { %1140 = vmatpush1.bf16.msra.mxu1 %v1784_v47  ;;  %v1866_v45 = vld [vmem:[%s2054_s3 + $0x154] ss:$8 sps:$4 sm:$0xff]   ;;  %v269_v47 = vld [vmem:[%s2056_s4 + $0x40] sm:$0xff]  ;;  %v1876_v5 = vld [vmem:[%s2054_s3 + $0x170] ss:$8 sps:$4 sm:$0xff]  }
  0x4b   : > { %1246 = vmatpush1.bf16.msra.mxu0 %v1785_v48  ;;  %1141 = vmatprep.subr.bf16.mxu1 %v1786_v49  ;;  %v1869_v46 = vld [vmem:[%s2054_s3 + $0x354] ss:$8 sps:$4 sm:$0xff]   ;;  %v273_v48 = vld [vmem:[%s2056_s4 + $0x60] sm:$0xff]  ;;  %v1879_v6 = vld [vmem:[%s2054_s3 + $0x370] ss:$8 sps:$4 sm:$0xff]  }
  0x4c   : > { %1247 = vmatprep.subr.bf16.mxu0 %v1788_v50  ;;  %v1523_v49 = vcombine.high %v269_v47, %v273_v48  ;;  %v271_v50 = vld [vmem:[%s2056_s4 + $0x50] sm:$0xff]  ;;  %v1884_v7 = vld [vmem:[%s2054_s3 + $0x184] ss:$8 sps:$4 sm:$0xff]  }
  0x4d   : > { %v1881_v1 = vld [vmem:[%s2054_s3 + $0x374] ss:$8 sps:$4 sm:$0xff]   ;;  %v1887_v8 = vld [vmem:[%s2054_s3 + $0x384] ss:$8 sps:$4 sm:$0xff]  }
  0x4e   : > { %1142 = vmatpush1.bf16.msra.mxu1 %v1790_v51  ;;  %v275_v51 = vld [vmem:[%s2056_s4 + $0x70] sm:$0xff] }
  0x4f   : > { %1248 = vmatpush1.bf16.msra.mxu0 %v1791_v52  ;;  %1143 = vmatprep.subr.bf16.mxu1 %v1792_v53  ;;  %v1864_v52 = vld [vmem:[%s2054_s3 + $0x150] ss:$8 sps:$4 sm:$0xff]  }
  0x50   : > { %1249 = vmatprep.subr.bf16.mxu0 %v1794_v54  ;;  %v1867_v53 = vld [vmem:[%s2054_s3 + $0x350] ss:$8 sps:$4 sm:$0xff]   ;;  %v1527_v54 = vcombine.high %v271_v50, %v275_v51 }
  0x52   : > { %1144 = vmatpush1.bf16.msra.mxu1 %v1796_v55  ;;  %v1522_v55 = vcombine.low %v269_v47, %v273_v48 }
  0x53   : > { %1250 = vmatpush1.bf16.msra.mxu0 %v1797_v56  ;;  %1145 = vmatprep.subr.bf16.mxu1 %v1798_v57  ;;  %v1526_v56 = vcombine.low %v271_v50, %v275_v51  ;;  %v1872_v57 = vld [vmem:[%s2054_s3 + $0x164] ss:$8 sps:$4 sm:$0xff]  }
  0x54   : > { %1251 = vmatprep.subr.bf16.mxu0 %v1800_v58  ;;  %v1875_v58 = vld [vmem:[%s2054_s3 + $0x364] ss:$8 sps:$4 sm:$0xff]  }
  0x55   : > { %v253_v50 = vld [vmem:[#allocation2] sm:$0xff] }
  0x56   : > { %1146 = vmatpush1.bf16.msra.mxu1 %v1802_v59  ;;  %v1870_v59 = vld [vmem:[%s2054_s3 + $0x160] ss:$8 sps:$4 sm:$0xff]  }
  0x57   : > { %1252 = vmatpush1.bf16.msra.mxu0 %v1803_v60  ;;  %1147 = vmatprep.subr.bf16.mxu1 %v1804_v61  ;;  %v1873_v60 = vld [vmem:[%s2054_s3 + $0x360] ss:$8 sps:$4 sm:$0xff]  }
  0x58   : > { %1253 = vmatprep.subr.bf16.mxu0 %v1806_v62  ;;  %v2160_v61 = vld [vmem:[%s2056_s4 + $0x8] sm:$0xff] }
  0x59   : > { %v2163_v62 = vld [vmem:[%s2056_s4 + $0x28] sm:$0xff] }
  0x5a   : > { %1148 = vmatpush1.bf16.msra.mxu1 %v1808_v63  ;;  %v2166_v63 = vld [vmem:[%s2056_s4 + $0x18] sm:$0xff]  ;;  %v1517_v2 = vcombine.high %v2160_v61, %v2163_v62 }
  0x5b   : > { %1254 = vmatpush1.bf16.msra.mxu0 %v1809_v0  ;;  %1149 = vmatprep.subr.bf16.mxu1 %v1810_v3  ;;  %v1878_v0 = vld [vmem:[%s2054_s3 + $0x174] ss:$8 sps:$4 sm:$0xff]  }
  0x5c   : > { %1255 = vmatprep.subr.bf16.mxu0 %v1812_v4  ;;  %v2173_v3 = vld [vmem:[%s2056_s4 + $0x38] sm:$0xff] }
  0x5d   : > { %v1521_v4 = vcombine.high %v2166_v63, %v2173_v3 }
  0x5e   : > { %1150 = vmatpush1.bf16.msra.mxu1 %v1814_v9  ;;  %v1882_v9 = vld [vmem:[%s2054_s3 + $0x180] ss:$8 sps:$4 sm:$0xff]  }
  0x5f   : > { %1256 = vmatpush1.bf16.msra.mxu0 %v1815_v10  ;;  %1151 = vmatprep.subr.bf16.mxu1 %v1816_v11  ;;  %v1885_v10 = vld [vmem:[%s2054_s3 + $0x380] ss:$8 sps:$4 sm:$0xff]   ;;  %v1890_v11 = vld [vmem:[%s2054_s3 + $0x194] ss:$8 sps:$4 sm:$0xff]  }
  0x60   : > { %1257 = vmatprep.subr.bf16.mxu0 %v1818_v12  ;;  %v1893_v12 = vld [vmem:[%s2054_s3 + $0x394] ss:$8 sps:$4 sm:$0xff]  }
  0x62   : > { %1152 = vmatpush1.bf16.msra.mxu1 %v1820_v13  ;;  %v1888_v13 = vld [vmem:[%s2054_s3 + $0x190] ss:$8 sps:$4 sm:$0xff]  }
  0x63   : > { %1258 = vmatpush1.bf16.msra.mxu0 %v1821_v14  ;;  %1153 = vmatprep.subr.bf16.mxu1 %v1822_v15  ;;  %v1891_v14 = vld [vmem:[%s2054_s3 + $0x390] ss:$8 sps:$4 sm:$0xff]   ;;  %v1896_v15 = vld [vmem:[%s2054_s3 + $0x1a4] ss:$8 sps:$4 sm:$0xff]  }
  0x64   : > { %1259 = vmatprep.subr.bf16.mxu0 %v1824_v16  ;;  %v1899_v16 = vld [vmem:[%s2054_s3 + $0x3a4] ss:$8 sps:$4 sm:$0xff]  }
  0x66   : > { %1154 = vmatpush1.bf16.msra.mxu1 %v1826_v17  ;;  %v1894_v17 = vld [vmem:[%s2054_s3 + $0x1a0] ss:$8 sps:$4 sm:$0xff]  }
  0x67   : > { %1260 = vmatpush1.bf16.msra.mxu0 %v1827_v18  ;;  %1155 = vmatprep.subr.bf16.mxu1 %v1828_v19  ;;  %v1897_v18 = vld [vmem:[%s2054_s3 + $0x3a0] ss:$8 sps:$4 sm:$0xff]   ;;  %v1902_v19 = vld [vmem:[%s2054_s3 + $0x1b4] ss:$8 sps:$4 sm:$0xff]  }
  0x68   : > { %1261 = vmatprep.subr.bf16.mxu0 %v1830_v20  ;;  %v1905_v20 = vld [vmem:[%s2054_s3 + $0x3b4] ss:$8 sps:$4 sm:$0xff]  }
  0x6a   : > { %1156 = vmatpush1.bf16.msra.mxu1 %v1832_v21  ;;  %v1900_v21 = vld [vmem:[%s2054_s3 + $0x1b0] ss:$8 sps:$4 sm:$0xff]  }
  0x6b   : > { %1262 = vmatpush1.bf16.msra.mxu0 %v1833_v22  ;;  %1178 = vmatprep.subr.bf16.mxu1 %v1836_v23  ;;  %v1903_v22 = vld [vmem:[%s2054_s3 + $0x3b0] ss:$8 sps:$4 sm:$0xff]   ;;  %v1908_v23 = vld [vmem:[%s2054_s3 + $0x1c4] ss:$8 sps:$4 sm:$0xff]  }
  0x6c   : > { %1284 = vmatprep.subr.bf16.mxu0 %v1839_v24  ;;  %v1911_v24 = vld [vmem:[%s2054_s3 + $0x3c4] ss:$8 sps:$4 sm:$0xff]  }
  0x6d   : > { %1158 = vmatmul.mubr.bf16.vlgmr.msra.gmra.mrb[0].mxu1 %v1514_v25  ;;  %v1906_v25 = vld [vmem:[%s2054_s3 + $0x1c0] ss:$8 sps:$4 sm:$0xff]  }
  0x6e   : > { %1264 = vmatmul.mubr.bf16.vlgmr.msra.gmra.mrb[0].mxu0 %v1518_v27  ;;  %1179 = vmatpush1.bf16.msra.mxu1 %v1834_v26  ;;  %v1909_v26 = vld [vmem:[%s2054_s3 + $0x3c0] ss:$8 sps:$4 sm:$0xff]   ;;  %v1914_v27 = vld [vmem:[%s2054_s3 + $0x1d4] ss:$8 sps:$4 sm:$0xff]  }
  0x6f   : > { %1285 = vmatpush1.bf16.msra.mxu0 %v1837_v28  ;;  %1180 = vmatprep.subr.bf16.mxu1 %v1842_v29  ;;  %v1917_v28 = vld [vmem:[%s2054_s3 + $0x3d4] ss:$8 sps:$4 sm:$0xff]   ;;  %v1912_v29 = vld [vmem:[%s2054_s3 + $0x1d0] ss:$8 sps:$4 sm:$0xff]  }
  0x70   : > { %1286 = vmatprep.subr.bf16.mxu0 %v1845_v30  ;;  %1167 = vmatprep.mubr.bf16.mxu1 %v1523_v49  ;;  %v1915_v30 = vld [vmem:[%s2054_s3 + $0x3d0] ss:$8 sps:$4 sm:$0xff]  }
  0x71   : > { %1273 = vmatprep.mubr.bf16.mxu0 %v1527_v54  ;;  %v254_v54 = vld [vmem:[#allocation2 + $0x8] sm:$0xff] }
  0x72   : > { %1181 = vmatpush1.bf16.msra.mxu1 %v1840_v31  ;;  %v1920_v31 = vld [vmem:[%s2054_s3 + $0x1e4] ss:$8 sps:$4 sm:$0xff]  }
  0x73   : > { %1287 = vmatpush1.bf16.msra.mxu0 %v1843_v32  ;;  %1182 = vmatprep.subr.bf16.mxu1 %v1848_v33  ;;  %v1923_v32 = vld [vmem:[%s2054_s3 + $0x3e4] ss:$8 sps:$4 sm:$0xff]   ;;  %v1918_v33 = vld [vmem:[%s2054_s3 + $0x1e0] ss:$8 sps:$4 sm:$0xff]  }
  0x74   : > { %1288 = vmatprep.subr.bf16.mxu0 %v1851_v34  ;;  %v1921_v34 = vld [vmem:[%s2054_s3 + $0x3e0] ss:$8 sps:$4 sm:$0xff]  }
  0x75   : > { %1168 = vmatmul.mubr.bf16.gmra.mrb[4].mxu1 %v1522_v55 }
  0x76   : > { %1183 = vmatpush1.bf16.msra.mxu1 %v1846_v35  ;;  %1274 = vmatmul.mubr.bf16.gmra.mrb[4].mxu0 %v1526_v56  ;;  %v1926_v35 = vld [vmem:[%s2054_s3 + $0x1f4] ss:$8 sps:$4 sm:$0xff]  }
  0x77   : > { %1289 = vmatpush1.bf16.msra.mxu0 %v1849_v36  ;;  %1184 = vmatprep.subr.bf16.mxu1 %v1854_v37  ;;  %v1929_v36 = vld [vmem:[%s2054_s3 + $0x3f4] ss:$8 sps:$4 sm:$0xff]   ;;  %v1924_v37 = vld [vmem:[%s2054_s3 + $0x1f0] ss:$8 sps:$4 sm:$0xff]  }
  0x78   : > { %1290 = vmatprep.subr.bf16.mxu0 %v1857_v38  ;;  %1210 = vmatprep.mubr.bf16.mxu1 %v1517_v2  ;;  %v1927_v38 = vld [vmem:[%s2054_s3 + $0x3f0] ss:$8 sps:$4 sm:$0xff]  }
  0x79   : > { %1316 = vmatprep.mubr.bf16.mxu0 %v1521_v4 }
  0x7a   : > { %1185 = vmatpush1.bf16.msra.mxu1 %v1852_v39  ;;  %v270_v39 = vld [vmem:[%s2056_s4 + $0x48] sm:$0xff] }
  0x7b   : > { %1291 = vmatpush1.bf16.msra.mxu0 %v1855_v40  ;;  %1186 = vmatprep.subr.bf16.mxu1 %v1860_v41  ;;  %v274_v40 = vld [vmem:[%s2056_s4 + $0x68] sm:$0xff]  ;;  %v272_v41 = vld [vmem:[%s2056_s4 + $0x58] sm:$0xff] }
  0x7c   : > { %1292 = vmatprep.subr.bf16.mxu0 %v1863_v42  ;;  %v276_v42 = vld [vmem:[%s2056_s4 + $0x78] sm:$0xff]  ;;  %v1524_v47 = vcombine.low %v270_v39, %v274_v40 }
  0x7d   : > { %v1528_v48 = vcombine.low %v272_v41, %v276_v42 }
  0x7e   : > { %1187 = vmatpush1.bf16.msra.mxu1 %v1858_v43  ;;  %v1516_v43 = vcombine.low %v2160_v61, %v2163_v62 }
  0x7f   : > { %1293 = vmatpush1.bf16.msra.mxu0 %v1861_v44  ;;  %1188 = vmatprep.subr.bf16.mxu1 %v1866_v45  ;;  %v1520_v44 = vcombine.low %v2166_v63, %v2173_v3  ;;  %v1525_v45 = vcombine.high %v270_v39, %v274_v40  ;;  %v256_v63 = vld [vmem:[#allocation2 + $0x18] sm:$0xff] }
  0x80   : > { %1294 = vmatprep.subr.bf16.mxu0 %v1869_v46  ;;  %v1529_v46 = vcombine.high %v272_v41, %v276_v42 }
  0x82   : > { %1189 = vmatpush1.bf16.msra.mxu1 %v1864_v52 }
  0x83   : > { %1295 = vmatpush1.bf16.msra.mxu0 %v1867_v53  ;;  %1190 = vmatprep.subr.bf16.mxu1 %v1872_v57 }
  0x84   : > { %1296 = vmatprep.subr.bf16.mxu0 %v1875_v58  ;;  %v255_v58 = vld [vmem:[#allocation2 + $0x10] sm:$0xff] }
  0x86   : > { %1191 = vmatpush1.bf16.msra.mxu1 %v1870_v59 }
  0x87   : > { %1297 = vmatpush1.bf16.msra.mxu0 %v1873_v60  ;;  %1192 = vmatprep.subr.bf16.mxu1 %v1878_v0 }
  0x88   : > { %1298 = vmatprep.subr.bf16.mxu0 %v1881_v1 }
  0x8a   : > { %1193 = vmatpush1.bf16.msra.mxu1 %v1876_v5 }
  0x8b   : > { %1299 = vmatpush1.bf16.msra.mxu0 %v1879_v6  ;;  %1194 = vmatprep.subr.bf16.mxu1 %v1884_v7  ;;  %v257_v6 = vld [vmem:[#allocation2 + $0x20] sm:$0xff] }
  0x8c   : > { %1300 = vmatprep.subr.bf16.mxu0 %v1887_v8 }
  0x8e   : > { %1195 = vmatpush1.bf16.msra.mxu1 %v1882_v9 }
  0x8f   : > { %1301 = vmatpush1.bf16.msra.mxu0 %v1885_v10  ;;  %1196 = vmatprep.subr.bf16.mxu1 %v1890_v11  ;;  %v258_v10 = vld [vmem:[#allocation2 + $0x28] sm:$0xff] }
  0x90   : > { %1302 = vmatprep.subr.bf16.mxu0 %v1893_v12 }
  0x92   : > { %1197 = vmatpush1.bf16.msra.mxu1 %v1888_v13 }
  0x93   : > { %1303 = vmatpush1.bf16.msra.mxu0 %v1891_v14  ;;  %1198 = vmatprep.subr.bf16.mxu1 %v1896_v15  ;;  %v259_v14 = vld [vmem:[#allocation2 + $0x30] sm:$0xff] }
  0x94   : > { %1304 = vmatprep.subr.bf16.mxu0 %v1899_v16 }
  0x96   : > { %1199 = vmatpush1.bf16.msra.mxu1 %v1894_v17 }
  0x97   : > { %1305 = vmatpush1.bf16.msra.mxu0 %v1897_v18  ;;  %1200 = vmatprep.subr.bf16.mxu1 %v1902_v19  ;;  %v260_v19 = vld [vmem:[#allocation2 + $0x38] sm:$0xff] }
  0x98   : > { %1306 = vmatprep.subr.bf16.mxu0 %v1905_v20 }
  0x9a   : > { %1201 = vmatpush1.bf16.msra.mxu1 %v1900_v21 }
  0x9b   : > { %1307 = vmatpush1.bf16.msra.mxu0 %v1903_v22  ;;  %1202 = vmatprep.subr.bf16.mxu1 %v1908_v23 }
  0x9c   : > { %1308 = vmatprep.subr.bf16.mxu0 %v1911_v24 }
  0x9e   : > { %1203 = vmatpush1.bf16.msra.mxu1 %v1906_v25 }
  0x9f   : > { %1309 = vmatpush1.bf16.msra.mxu0 %v1909_v26  ;;  %1204 = vmatprep.subr.bf16.mxu1 %v1914_v27 }
  0xa0   : > { %1310 = vmatprep.subr.bf16.mxu0 %v1917_v28 }
  0xa2   : > { %1205 = vmatpush1.bf16.msra.mxu1 %v1912_v29 }
  0xa3   : > { %1311 = vmatpush1.bf16.msra.mxu0 %v1915_v30  ;;  %1206 = vmatprep.subr.bf16.mxu1 %v1920_v31 }
  0xa4   : > { %1312 = vmatprep.subr.bf16.mxu0 %v1923_v32 }
  0xa6   : > { %1207 = vmatpush1.bf16.msra.mxu1 %v1918_v33 }
  0xa7   : > { %1313 = vmatpush1.bf16.msra.mxu0 %v1921_v34  ;;  %1208 = vmatprep.subr.bf16.mxu1 %v1926_v35 }
  0xa8   : > { %1314 = vmatprep.subr.bf16.mxu0 %v1929_v36 }
  0xaa   : > { %1209 = vmatpush1.bf16.msra.mxu1 %v1924_v37 }
  0xab   : > { %1315 = vmatpush1.bf16.msra.mxu0 %v1927_v38 }
  0xad   : > { %1211 = vmatmul.mubr.bf16.vlgmr.msra.gmra.mrb[0].mxu1 %v1516_v43 }
  0xae   : > { %1317 = vmatmul.mubr.bf16.vlgmr.msra.gmra.mrb[0].mxu0 %v1520_v44  ;;  %1220 = vmatprep.mubr.bf16.mxu1 %v1525_v45 }
  0xaf   : > { %1326 = vmatprep.mubr.bf16.mxu0 %v1529_v46 }
  0xb5   : > { %1221 = vmatmul.mubr.bf16.gmra.mrb[4].mxu1 %v1524_v47 }
  0xb6   : > { %1327 = vmatmul.mubr.bf16.gmra.mrb[4].mxu0 %v1528_v48 }
 0x180   : > { %v1212_v49 = vpop.f32.mrb[0].mxu1 }
 0x181   : > { %v1318_v51 = vpop.f32.mrb[0].mxu0  ;;  %v1214_v53 = vpop.f32.mrb[1].mxu1 }
 0x182   : > { %v1673_v52 = vadd.f32 %v1318_v51, %v1212_v49  ;;  %v1320_v55 = vpop.f32.mrb[1].mxu0  ;;  %v1216_v57 = vpop.f32.mrb[2].mxu1 }
 0x183   : > { %v1674_v56 = vadd.f32 %v1320_v55, %v1214_v53  ;;  %v1322_v59 = vpop.f32.mrb[2].mxu0  ;;  %v1218_v62 = vpop.f32.mrb[3].mxu1 }
 0x184   : > { %v1337_v60 = vadd.f32 %v1673_v52, %v253_v50  ;;  %v1675_v61 = vadd.f32 %v1322_v59, %v1216_v57  ;;  %v1324_v0 = vpop.f32.mrb[3].mxu0 }
 0x185   : > { %v1338_v1 = vadd.f32 %v1674_v56, %v254_v54  ;;  %v1676_v2 = vadd.f32 %v1324_v0, %v1218_v62 }
 0x186   : > { %1345 = vst [vmem:[#allocation2] sm:$0xff] %v1337_v60  ;;  %v1339_v3 = vadd.f32 %v1675_v61, %v255_v58 }
 0x187   : > { %1346 = vst [vmem:[#allocation2 + $0x8] sm:$0xff] %v1338_v1  ;;  %v1340_v4 = vadd.f32 %v1676_v2, %v256_v63 }
 0x188   : > { %1347 = vst [vmem:[#allocation2 + $0x10] sm:$0xff] %v1339_v3  ;;  %v1222_v5 = vpop.f32.mrb[4].mxu1 }
 0x189   : > { %1348 = vst [vmem:[#allocation2 + $0x18] sm:$0xff] %v1340_v4  ;;  %v1328_v7 = vpop.f32.mrb[4].mxu0  ;;  %v1224_v9 = vpop.f32.mrb[5].mxu1 }
 0x18a   : > { %v1677_v8 = vadd.f32 %v1328_v7, %v1222_v5  ;;  %v1330_v11 = vpop.f32.mrb[5].mxu0  ;;  %v1226_v13 = vpop.f32.mrb[6].mxu1 }
 0x18b   : > { %v1678_v12 = vadd.f32 %v1330_v11, %v1224_v9  ;;  %v1332_v15 = vpop.f32.mrb[6].mxu0  ;;  %v1228_v18 = vpop.f32.mrb[7].mxu1  ;;  %1356 = sbr.rel (%p1658_p11) target bundleno = 415 (0x19f), region = 59 }
 0x18c   : > { %v1341_v16 = vadd.f32 %v1677_v8, %v257_v6  ;;  %v1679_v17 = vadd.f32 %v1332_v15, %v1226_v13  ;;  %v1334_v20 = vpop.f32.mrb[7].mxu0 }
 0x18d   : > { %v1342_v21 = vadd.f32 %v1678_v12, %v258_v10  ;;  %v1680_v22 = vadd.f32 %v1334_v20, %v1228_v18  ;;  %v1357_v25 = vld [vmem:[#allocation2] sm:$0xff] (!%p1658_p11) }
 0x18e   : > { %1349 = vst [vmem:[#allocation2 + $0x20] sm:$0xff] %v1341_v16  ;;  %v1343_v23 = vadd.f32 %v1679_v17, %v259_v14  ;;  %v1358_v26 = vld [vmem:[#allocation2 + $0x8] sm:$0xff] (!%p1658_p11)  ;;  %vm1365_vm0 = vcmp.ge.f32.partialorder (!%p1658_p11), %v1357_v25, 0.0  ;;  %v1373_v28 = vmul.f32 (!%p1658_p11), 0.2, %v1357_v25 }
 0x18f   : > { %1350 = vst [vmem:[#allocation2 + $0x28] sm:$0xff] %v1342_v21  ;;  %v1344_v24 = vadd.f32 %v1680_v22, %v260_v19  ;;  %v1359_v27 = vld [vmem:[#allocation2 + $0x10] sm:$0xff] (!%p1658_p11)  ;;  %vm1366_vm1 = vcmp.ge.f32.partialorder (!%p1658_p11), %v1358_v26, 0.0  ;;  %v1374_v29 = vmul.f32 (!%p1658_p11), 0.2, %v1358_v26 }
 0x190   : > { %1351 = vst [vmem:[#allocation2 + $0x30] sm:$0xff] %v1343_v23  ;;  %v1360_v30 = vld [vmem:[#allocation2 + $0x18] sm:$0xff] (!%p1658_p11)  ;;  %vm1367_vm2 = vcmp.ge.f32.partialorder (!%p1658_p11), %v1359_v27, 0.0  ;;  %v1375_v31 = vmul.f32 (!%p1658_p11), 0.2, %v1359_v27  ;;  %v1381_v34 = vsel (!%p1658_p11), %vm1365_vm0, %v1357_v25, %v1373_v28 }
 0x191   : > { %1352 = vst [vmem:[#allocation2 + $0x38] sm:$0xff] %v1344_v24  ;;  %v1382_v35 = vsel (!%p1658_p11), %vm1366_vm1, %v1358_v26, %v1374_v29  ;;  %vm1368_vm3 = vcmp.ge.f32.partialorder (!%p1658_p11), %v1360_v30, 0.0  ;;  %v1376_v36 = vmul.f32 (!%p1658_p11), 0.2, %v1360_v30 }
 0x192   : > { %v1669_v39 = vpack.c.bf16 %v1382_v35, %v1381_v34  ;;  %v1383_v40 = vsel %vm1367_vm2, %v1359_v27, %v1375_v31 }
 0x193   : > { %v1384_v41 = vsel %vm1368_vm3, %v1360_v30, %v1376_v36 }
 0x194   : > { %1413 = vst [vmem:[%s2249_s2] sm:$0xff] %v1669_v39  ;;  %v1670_v44 = vpack.c.bf16 %v1384_v41, %v1383_v40 }
 0x195   : > { %v1361_v32 = vld [vmem:[#allocation2 + $0x20] sm:$0xff] }
 0x196   : > { %v1362_v33 = vld [vmem:[#allocation2 + $0x28] sm:$0xff]  ;;  %vm1369_vm4 = vcmp.ge.f32.partialorder %v1361_v32, 0.0  ;;  %v1377_v42 = vmul.f32 0.2, %v1361_v32  ;;  %1414 = vst [vmem:[%s2249_s2 + $0x8] sm:$0xff] %v1670_v44 }
 0x197   : > { %v1363_v37 = vld [vmem:[#allocation2 + $0x30] sm:$0xff]  ;;  %vm1370_vm5 = vcmp.ge.f32.partialorder %v1362_v33, 0.0  ;;  %v1378_v43 = vmul.f32 0.2, %v1362_v33 }
 0x198   : > { %v1364_v38 = vld [vmem:[#allocation2 + $0x38] sm:$0xff]  ;;  %vm1371_vm6 = vcmp.ge.f32.partialorder %v1363_v37, 0.0  ;;  %v1379_v45 = vmul.f32 0.2, %v1363_v37  ;;  %v1385_v47 = vsel %vm1369_vm4, %v1361_v32, %v1377_v42 }
 0x199   : > { %vm1372_vm7 = vcmp.ge.f32.partialorder %v1364_v38, 0.0  ;;  %v1380_v46 = vmul.f32 0.2, %v1364_v38  ;;  %v1386_v48 = vsel %vm1370_vm5, %v1362_v33, %v1378_v43 }
 0x19a   : > { %v1671_v49 = vpack.c.bf16 %v1386_v48, %v1385_v47  ;;  %v1387_v50 = vsel %vm1371_vm6, %v1363_v37, %v1379_v45 }
 0x19b   : > { %v1388_v51 = vsel %vm1372_vm7, %v1364_v38, %v1380_v46 }
 0x19c   : > { %v1672_v52 = vpack.c.bf16 %v1388_v51, %v1387_v50  ;;  %1415 = vst [vmem:[%s2249_s2 + $0x10] sm:$0xff] %v1671_v49 }
 0x19e   : > { %1416 = vst [vmem:[%s2249_s2 + $0x18] sm:$0xff] %v1672_v52 }
 0x19f PF: > { %s12_s13 = sadd.s32 1, %s1968_s13   ;;  %s2250_s9 = smov %s1956_s10 }
 0x1a0   : > { %p9_p12 = scmp.ge.s32.totalorder %s12_s13, 4   ;;  %s2251_s10 = smov %s2021_s17 }
 0x1a1   : > { %s2252_s11 = smov %s1964_s12  ;;  %s2253_s12 = smov %s2255_s14 }
 0x1a2   :  { %11 = sbr.rel (!%p9_p12) target bundleno = 3 (0x3), region = 97 }

// kernel: discriminator_forward.8
= control target key start
LH: loop header
LB: loop body
LE: loop exit
PB: predicated region body
PF: predicated region fallthrough
CT: control target
= control target key end

     0   :  { %s3134_s9 = smov 0   ;;  %s3136_s10 = smov 0   ;;  %s3505_s0 = inlined_call_operand.vmem [shape: bf16[16,4096], index: 0, kind: input, shape index: {}]   ;;  %s3506_s1 = inlined_call_operand.vmem [shape: bf16[4096,512], index: 1, kind: input, shape index: {}]   ;;  %s3507_s2 = inlined_call_operand.vmem [shape: bf16[16,512], index: 2, kind: output, shape index: {}]  }
   0x1   :  { %s3138_s11 = smov 0   ;;  %s3140_s12 = smov 0  }
   0x2   :  { %s3142_s13 = smov 0  }
   0x3 LB: > { %s21_s14 = sadd.s32 1, %s3112_s12  ;;  %p40_p1 = scmp.ne.s32.totalorder %s3104_s10, %s3100_s9  ;;  %s3116_s13 = sphi %s3142_s13, %s12_s13   ;;  %s3112_s12 = sphi %s3140_s12, %s3511_s12   ;;  %s3108_s11 = sphi %s3138_s11, %s3510_s11   ;;  %s3104_s10 = sphi %s3136_s10, %s3509_s10   ;;  %s3100_s9 = sphi %s3134_s9, %s3508_s9  }
   0x4   : > { %p22_p0 = scmp.ge.s32.totalorder %s21_s14, 4  ;;  %p41_p2 = scmp.eq.s32.totalorder %s3116_s13, 0 }
   0x5   : > { %s33_s16 = sadd.s32 1, %s3104_s10  ;;  %p2340_p5 = scmp.ge.s32.totalorder %s3116_s13, 4 }
   0x6   : > { %s3513_s14 = smov (%p22_p0, %s21_s14), 0  ;;  %p42_p3 = por %p41_p2, %p40_p1 }
   0x7   : > { %s29_s15 = ssub.s32 %s3112_s12, %s3513_s14  ;;  %118 = sbr.rel (%p2340_p5) target bundleno = 22 (0x16), region = 16 }
   0x8   : > { %p31_p4 = scmp.eq.s32.totalorder %s29_s15, 0 }
   0xa   : > { %s3169_s17 = scalar_select %p31_p4, %s3104_s10, %s33_s16  }
   0xe   : > { %121 = sbr.rel (!%p42_p3) target bundleno = 22 (0x16), region = 20  ;;  %s123_s18 = sand.u32 (%p42_p3), 1, %s3104_s10  }
   0xf   : > { %s2623_s19 = sshll.u32 (%p42_p3), %s3112_s12, 5  ;;  %s2341_s20 = sshll.u32 (%p42_p3), %s123_s18, 6 }
  0x10   : > { %s131_s23 = scalar_lea.vmem (%p42_p3), %s3505_s0, %s2623_s19  ;;  %s125_s24 = scalar_lea.vmem (%p42_p3), [#allocation3], %s2341_s20 }
  0x11   : > { %v144_v0 = vld [vmem:[%s131_s23] sm:$0xff] (%p42_p3)  ;;  %v146_v1 = vld [vmem:[%s131_s23 + $0x8] sm:$0xff] (%p42_p3)  ;;  %v148_v2 = vld [vmem:[%s131_s23 + $0x10] sm:$0xff] (%p42_p3) }
  0x12   : > { %145 = vst [vmem:[%s125_s24] sm:$0xff] (%p42_p3), %v144_v0  ;;  %147 = vst [vmem:[%s125_s24 + $0x8] sm:$0xff] (%p42_p3), %v146_v1  ;;  %v150_v3 = vld [vmem:[%s131_s23 + $0x18] sm:$0xff] (%p42_p3)  ;;  %v152_v4 = vld [vmem:[%s131_s23 + $0x80] sm:$0xff] (%p42_p3) }
  0x13   : > { %149 = vst [vmem:[%s125_s24 + $0x10] sm:$0xff] (%p42_p3), %v148_v2  ;;  %v154_v5 = vld [vmem:[%s131_s23 + $0x88] sm:$0xff] (%p42_p3)  ;;  %151 = vst [vmem:[%s125_s24 + $0x18] sm:$0xff] (%p42_p3), %v150_v3  ;;  %v156_v6 = vld [vmem:[%s131_s23 + $0x90] sm:$0xff] (%p42_p3) }
  0x14   : > { %153 = vst [vmem:[%s125_s24 + $0x20] sm:$0xff] (%p42_p3), %v152_v4  ;;  %155 = vst [vmem:[%s125_s24 + $0x28] sm:$0xff] (%p42_p3), %v154_v5  ;;  %v158_v7 = vld [vmem:[%s131_s23 + $0x98] sm:$0xff] (%p42_p3) }
  0x15   : > { %157 = vst [vmem:[%s125_s24 + $0x30] sm:$0xff] %v156_v6  ;;  %159 = vst [vmem:[%s125_s24 + $0x38] sm:$0xff] %v158_v7 }
  0x16 PF: > { %p2344_p6 = scmp.ge.s32.totalorder %s3116_s13, 1  ;;  %p174_p7 = scmp.lt.s32.totalorder %s3116_s13, 5 }
  0x18   : > { %p175_p8 = pnand %p2344_p6, %p174_p7 }
  0x19   : > { %s181_s25 = sand.u32 (!%p175_p8), 1, %s3100_s9   ;;  %s2346_s26 = sshll.u32 (!%p175_p8), %s3108_s11, 7 }
  0x1a   : > { %178 = sbr.rel (%p175_p8) target bundleno = 531 (0x213), region = 47  ;;  %s2345_s27 = sshll.u32 (!%p175_p8), %s181_s25, 6 }
  0x1b   : > { %p212_p9 = scmp.lt.s32.totalorder (!%p175_p8), %s2346_s26, 511  ;;  %s3186_s4 = scalar_lea.vmem (!%p175_p8), [#allocation3], %s2345_s27 }
  0x1c   : > { %p2349_p10 = scmp.ne.s32.totalorder (!%p175_p8), %s3108_s11, 0 }
  0x21   : > { %s3515_s26 = smov (!%p212_p9, %s2346_s26), 511  ;;  %228 = sbr.rel (%p2349_p10) target bundleno = 40 (0x28), region = 55 }
  0x22   : > { %s2624_s28 = sshll.u32 %s3515_s26, 4  ;;  %v3118_v8 = vmov (!%p2349_p10), 0.0  }
  0x23   : > { %s3184_s3 = scalar_lea.vmem %s3506_s1, %s2624_s28  ;;  %229 = vst [vmem:[#allocation2] sm:$0xff] (!%p2349_p10), %v3118_v8  ;;  %230 = vst [vmem:[#allocation2 + $0x8] sm:$0xff] (!%p2349_p10), %v3118_v8 }
  0x24   : > { %231 = vst [vmem:[#allocation2 + $0x10] sm:$0xff] (!%p2349_p10), %v3118_v8  ;;  %232 = vst [vmem:[#allocation2 + $0x18] sm:$0xff] (!%p2349_p10), %v3118_v8 }
  0x25   : > { %233 = vst [vmem:[#allocation2 + $0x20] sm:$0xff] (!%p2349_p10), %v3118_v8  ;;  %234 = vst [vmem:[#allocation2 + $0x28] sm:$0xff] (!%p2349_p10), %v3118_v8 }
  0x26   : > { %235 = vst [vmem:[#allocation2 + $0x30] sm:$0xff] (!%p2349_p10), %v3118_v8  ;;  %236 = vst [vmem:[#allocation2 + $0x38] sm:$0xff] (!%p2349_p10), %v3118_v8 }
  0x28 PF: > { %v2694_v9 = vld [vmem:[%s3184_s3 + $0x4] ss:$16 sps:$4 sm:$0xff]   ;;  %v2696_v10 = vld [vmem:[%s3184_s3 + $0xc] ss:$16 sps:$4 sm:$0xff]   ;;  %v2698_v11 = vld [vmem:[%s3184_s3] ss:$16 sps:$4 sm:$0xff]  }
  0x29   : > { %1829 = vmatprep.subr.bf16.mxu0 %v2694_v9  ;;  %v2699_v12 = vld [vmem:[%s3184_s3 + $0x8] ss:$16 sps:$4 sm:$0xff]   ;;  %2001 = vmatprep.subr.bf16.mxu1 %v2696_v10  ;;  %v2700_v13 = vld [vmem:[%s3184_s3 + $0x24] ss:$16 sps:$4 sm:$0xff]   ;;  %v2702_v14 = vld [vmem:[%s3184_s3 + $0x2c] ss:$16 sps:$4 sm:$0xff]  }
  0x2a   : > { %1830 = vmatpush1.bf16.msra.mxu0 %v2698_v11  ;;  %2002 = vmatpush1.bf16.msra.mxu1 %v2699_v12  ;;  %v2704_v15 = vld [vmem:[%s3184_s3 + $0x20] ss:$16 sps:$4 sm:$0xff]   ;;  %v2705_v16 = vld [vmem:[%s3184_s3 + $0x28] ss:$16 sps:$4 sm:$0xff]   ;;  %v2706_v17 = vld [vmem:[%s3184_s3 + $0x44] ss:$16 sps:$4 sm:$0xff]  }
  0x2b   : > { %1831 = vmatprep.subr.bf16.mxu0 %v2700_v13  ;;  %2003 = vmatprep.subr.bf16.mxu1 %v2702_v14  ;;  %v2708_v18 = vld [vmem:[%s3184_s3 + $0x4c] ss:$16 sps:$4 sm:$0xff]   ;;  %v2710_v19 = vld [vmem:[%s3184_s3 + $0x40] ss:$16 sps:$4 sm:$0xff]   ;;  %v2711_v20 = vld [vmem:[%s3184_s3 + $0x48] ss:$16 sps:$4 sm:$0xff]  }
  0x2c   : > { %v2712_v21 = vld [vmem:[%s3184_s3 + $0x64] ss:$16 sps:$4 sm:$0xff]   ;;  %v2714_v22 = vld [vmem:[%s3184_s3 + $0x6c] ss:$16 sps:$4 sm:$0xff]   ;;  %v2716_v23 = vld [vmem:[%s3184_s3 + $0x60] ss:$16 sps:$4 sm:$0xff]  }
  0x2d   : > { %v2717_v24 = vld [vmem:[%s3184_s3 + $0x68] ss:$16 sps:$4 sm:$0xff]   ;;  %v2718_v25 = vld [vmem:[%s3184_s3 + $0x84] ss:$16 sps:$4 sm:$0xff]   ;;  %v2720_v26 = vld [vmem:[%s3184_s3 + $0x8c] ss:$16 sps:$4 sm:$0xff]  }
  0x2e   : > { %1832 = vmatpush1.bf16.msra.mxu0 %v2704_v15  ;;  %2004 = vmatpush1.bf16.msra.mxu1 %v2705_v16  ;;  %v2722_v27 = vld [vmem:[%s3184_s3 + $0x80] ss:$16 sps:$4 sm:$0xff]   ;;  %v2723_v28 = vld [vmem:[%s3184_s3 + $0x88] ss:$16 sps:$4 sm:$0xff]   ;;  %v2724_v29 = vld [vmem:[%s3184_s3 + $0xa4] ss:$16 sps:$4 sm:$0xff]  }
  0x2f   : > { %1833 = vmatprep.subr.bf16.mxu0 %v2706_v17  ;;  %2005 = vmatprep.subr.bf16.mxu1 %v2708_v18  ;;  %v2726_v30 = vld [vmem:[%s3184_s3 + $0xac] ss:$16 sps:$4 sm:$0xff]   ;;  %v2728_v31 = vld [vmem:[%s3184_s3 + $0xa0] ss:$16 sps:$4 sm:$0xff]   ;;  %v2729_v32 = vld [vmem:[%s3184_s3 + $0xa8] ss:$16 sps:$4 sm:$0xff]  }
  0x30   : > { %v2730_v33 = vld [vmem:[%s3184_s3 + $0xc4] ss:$16 sps:$4 sm:$0xff]   ;;  %v2732_v34 = vld [vmem:[%s3184_s3 + $0xcc] ss:$16 sps:$4 sm:$0xff]   ;;  %v2734_v35 = vld [vmem:[%s3184_s3 + $0xc0] ss:$16 sps:$4 sm:$0xff]  }
  0x31   : > { %v2735_v36 = vld [vmem:[%s3184_s3 + $0xc8] ss:$16 sps:$4 sm:$0xff]   ;;  %v2736_v37 = vld [vmem:[%s3184_s3 + $0xe4] ss:$16 sps:$4 sm:$0xff]   ;;  %v2738_v38 = vld [vmem:[%s3184_s3 + $0xec] ss:$16 sps:$4 sm:$0xff]  }
  0x32   : > { %1834 = vmatpush1.bf16.msra.mxu0 %v2710_v19  ;;  %2006 = vmatpush1.bf16.msra.mxu1 %v2711_v20  ;;  %v2740_v39 = vld [vmem:[%s3184_s3 + $0xe0] ss:$16 sps:$4 sm:$0xff]   ;;  %v2741_v40 = vld [vmem:[%s3184_s3 + $0xe8] ss:$16 sps:$4 sm:$0xff]   ;;  %v2742_v41 = vld [vmem:[%s3184_s3 + $0x104] ss:$16 sps:$4 sm:$0xff]  }
  0x33   : > { %1835 = vmatprep.subr.bf16.mxu0 %v2712_v21  ;;  %2007 = vmatprep.subr.bf16.mxu1 %v2714_v22  ;;  %v2744_v42 = vld [vmem:[%s3184_s3 + $0x10c] ss:$16 sps:$4 sm:$0xff]   ;;  %v2746_v43 = vld [vmem:[%s3184_s3 + $0x100] ss:$16 sps:$4 sm:$0xff]   ;;  %v2747_v44 = vld [vmem:[%s3184_s3 + $0x108] ss:$16 sps:$4 sm:$0xff]  }
  0x34   : > { %v2748_v45 = vld [vmem:[%s3184_s3 + $0x124] ss:$16 sps:$4 sm:$0xff]   ;;  %v2750_v46 = vld [vmem:[%s3184_s3 + $0x12c] ss:$16 sps:$4 sm:$0xff]   ;;  %v2752_v47 = vld [vmem:[%s3184_s3 + $0x120] ss:$16 sps:$4 sm:$0xff]  }
  0x35   : > { %v2753_v48 = vld [vmem:[%s3184_s3 + $0x128] ss:$16 sps:$4 sm:$0xff]   ;;  %v2754_v49 = vld [vmem:[%s3184_s3 + $0x144] ss:$16 sps:$4 sm:$0xff]   ;;  %v2756_v50 = vld [vmem:[%s3184_s3 + $0x14c] ss:$16 sps:$4 sm:$0xff]  }
  0x36   : > { %1836 = vmatpush1.bf16.msra.mxu0 %v2716_v23  ;;  %2008 = vmatpush1.bf16.msra.mxu1 %v2717_v24  ;;  %v2758_v51 = vld [vmem:[%s3184_s3 + $0x140] ss:$16 sps:$4 sm:$0xff]   ;;  %v2759_v52 = vld [vmem:[%s3184_s3 + $0x148] ss:$16 sps:$4 sm:$0xff]   ;;  %v2760_v53 = vld [vmem:[%s3184_s3 + $0x164] ss:$16 sps:$4 sm:$0xff]  }
  0x37   : > { %1837 = vmatprep.subr.bf16.mxu0 %v2718_v25  ;;  %2009 = vmatprep.subr.bf16.mxu1 %v2720_v26  ;;  %v2762_v54 = vld [vmem:[%s3184_s3 + $0x16c] ss:$16 sps:$4 sm:$0xff]   ;;  %v245_v55 = vld [vmem:[%s3186_s4] sm:$0xff]  ;;  %v2765_v58 = vld [vmem:[%s3184_s3 + $0x168] ss:$16 sps:$4 sm:$0xff]   ;;  %p2614_p11 = scmp.ne.s32.totalorder %s3108_s11, 3 }
  0x38   : > { %v249_v56 = vld [vmem:[%s3186_s4 + $0x20] sm:$0xff]  ;;  %v2768_v61 = vld [vmem:[%s3184_s3 + $0x18c] ss:$16 sps:$4 sm:$0xff]   ;;  %v2771_v63 = vld [vmem:[%s3184_s3 + $0x188] ss:$16 sps:$4 sm:$0xff]  }
  0x39   : > { %v2764_v57 = vld [vmem:[%s3184_s3 + $0x160] ss:$16 sps:$4 sm:$0xff]   ;;  %v2351_v59 = vcombine.high %v245_v55, %v249_v56  ;;  %v2766_v60 = vld [vmem:[%s3184_s3 + $0x184] ss:$16 sps:$4 sm:$0xff]   ;;  %v2774_v1 = vld [vmem:[%s3184_s3 + $0x1ac] ss:$16 sps:$4 sm:$0xff]   ;;  %v2350_v14 = vcombine.low %v245_v55, %v249_v56 }
  0x3a   : > { %1838 = vmatpush1.bf16.msra.mxu0 %v2722_v27  ;;  %2010 = vmatpush1.bf16.msra.mxu1 %v2723_v28  ;;  %v2770_v62 = vld [vmem:[%s3184_s3 + $0x180] ss:$16 sps:$4 sm:$0xff]   ;;  %v2772_v0 = vld [vmem:[%s3184_s3 + $0x1a4] ss:$16 sps:$4 sm:$0xff]   ;;  %v2777_v3 = vld [vmem:[%s3184_s3 + $0x1a8] ss:$16 sps:$4 sm:$0xff]  }
  0x3b   : > { %1839 = vmatprep.subr.bf16.mxu0 %v2724_v29  ;;  %2011 = vmatprep.subr.bf16.mxu1 %v2726_v30  ;;  %v2776_v2 = vld [vmem:[%s3184_s3 + $0x1a0] ss:$16 sps:$4 sm:$0xff]   ;;  %v2778_v4 = vld [vmem:[%s3184_s3 + $0x1c4] ss:$16 sps:$4 sm:$0xff]   ;;  %v2780_v5 = vld [vmem:[%s3184_s3 + $0x1cc] ss:$16 sps:$4 sm:$0xff]  }
  0x3c   : > { %1861 = vmatprep.mubr.bf16.mxu0 %v2351_v59  ;;  %2033 = vmatprep.mubr.bf16.mxu1 %v2351_v59  ;;  %v2782_v6 = vld [vmem:[%s3184_s3 + $0x1c0] ss:$16 sps:$4 sm:$0xff]   ;;  %v2783_v7 = vld [vmem:[%s3184_s3 + $0x1c8] ss:$16 sps:$4 sm:$0xff]   ;;  %v2784_v8 = vld [vmem:[%s3184_s3 + $0x1e4] ss:$16 sps:$4 sm:$0xff]  }
  0x3d   : > { %v2786_v9 = vld [vmem:[%s3184_s3 + $0x1ec] ss:$16 sps:$4 sm:$0xff]   ;;  %v2788_v10 = vld [vmem:[%s3184_s3 + $0x1e0] ss:$16 sps:$4 sm:$0xff]   ;;  %v2789_v11 = vld [vmem:[%s3184_s3 + $0x1e8] ss:$16 sps:$4 sm:$0xff]  }
  0x3e   : > { %1840 = vmatpush1.bf16.msra.mxu0 %v2728_v31  ;;  %2012 = vmatpush1.bf16.msra.mxu1 %v2729_v32  ;;  %v2792_v12 = vld [vmem:[%s3184_s3 + $0x204] ss:$16 sps:$4 sm:$0xff]   ;;  %v2795_v13 = vld [vmem:[%s3184_s3 + $0x20c] ss:$16 sps:$4 sm:$0xff]   ;;  %v2790_v15 = vld [vmem:[%s3184_s3 + $0x200] ss:$16 sps:$4 sm:$0xff]  }
  0x3f   : > { %1841 = vmatprep.subr.bf16.mxu0 %v2730_v33  ;;  %2013 = vmatprep.subr.bf16.mxu1 %v2732_v34  ;;  %v2793_v16 = vld [vmem:[%s3184_s3 + $0x208] ss:$16 sps:$4 sm:$0xff]   ;;  %v2798_v17 = vld [vmem:[%s3184_s3 + $0x224] ss:$16 sps:$4 sm:$0xff]   ;;  %v2801_v18 = vld [vmem:[%s3184_s3 + $0x22c] ss:$16 sps:$4 sm:$0xff]  }
  0x40   : > { %v2796_v19 = vld [vmem:[%s3184_s3 + $0x220] ss:$16 sps:$4 sm:$0xff]   ;;  %v2799_v20 = vld [vmem:[%s3184_s3 + $0x228] ss:$16 sps:$4 sm:$0xff]   ;;  %v2804_v21 = vld [vmem:[%s3184_s3 + $0x244] ss:$16 sps:$4 sm:$0xff]  }
  0x41   : > { %v2807_v22 = vld [vmem:[%s3184_s3 + $0x24c] ss:$16 sps:$4 sm:$0xff]   ;;  %v2802_v23 = vld [vmem:[%s3184_s3 + $0x240] ss:$16 sps:$4 sm:$0xff]   ;;  %v2805_v24 = vld [vmem:[%s3184_s3 + $0x248] ss:$16 sps:$4 sm:$0xff]  }
  0x42   : > { %1842 = vmatpush1.bf16.msra.mxu0 %v2734_v35  ;;  %2014 = vmatpush1.bf16.msra.mxu1 %v2735_v36  ;;  %v2810_v25 = vld [vmem:[%s3184_s3 + $0x264] ss:$16 sps:$4 sm:$0xff]   ;;  %v2813_v26 = vld [vmem:[%s3184_s3 + $0x26c] ss:$16 sps:$4 sm:$0xff]   ;;  %v2808_v27 = vld [vmem:[%s3184_s3 + $0x260] ss:$16 sps:$4 sm:$0xff]  }
  0x43   : > { %1843 = vmatprep.subr.bf16.mxu0 %v2736_v37  ;;  %2015 = vmatprep.subr.bf16.mxu1 %v2738_v38  ;;  %v2811_v28 = vld [vmem:[%s3184_s3 + $0x268] ss:$16 sps:$4 sm:$0xff]   ;;  %v2816_v29 = vld [vmem:[%s3184_s3 + $0x284] ss:$16 sps:$4 sm:$0xff]   ;;  %v2819_v30 = vld [vmem:[%s3184_s3 + $0x28c] ss:$16 sps:$4 sm:$0xff]  }
  0x44   : > { %v2814_v31 = vld [vmem:[%s3184_s3 + $0x280] ss:$16 sps:$4 sm:$0xff]   ;;  %v2817_v32 = vld [vmem:[%s3184_s3 + $0x288] ss:$16 sps:$4 sm:$0xff]   ;;  %v2822_v33 = vld [vmem:[%s3184_s3 + $0x2a4] ss:$16 sps:$4 sm:$0xff]  }
  0x45   : > { %v2825_v34 = vld [vmem:[%s3184_s3 + $0x2ac] ss:$16 sps:$4 sm:$0xff]   ;;  %v2820_v35 = vld [vmem:[%s3184_s3 + $0x2a0] ss:$16 sps:$4 sm:$0xff]   ;;  %v2823_v36 = vld [vmem:[%s3184_s3 + $0x2a8] ss:$16 sps:$4 sm:$0xff]  }
  0x46   : > { %1844 = vmatpush1.bf16.msra.mxu0 %v2740_v39  ;;  %2016 = vmatpush1.bf16.msra.mxu1 %v2741_v40  ;;  %v2828_v37 = vld [vmem:[%s3184_s3 + $0x2c4] ss:$16 sps:$4 sm:$0xff]   ;;  %v2831_v38 = vld [vmem:[%s3184_s3 + $0x2cc] ss:$16 sps:$4 sm:$0xff]   ;;  %v2847_v55 = vld [vmem:[%s3184_s3 + $0x328] ss:$16 sps:$4 sm:$0xff]  }
  0x47   : > { %1845 = vmatprep.subr.bf16.mxu0 %v2742_v41  ;;  %2017 = vmatprep.subr.bf16.mxu1 %v2744_v42  ;;  %v3282_v39 = vld [vmem:[%s3186_s4 + $0x8] sm:$0xff]  ;;  %v2826_v41 = vld [vmem:[%s3184_s3 + $0x2c0] ss:$16 sps:$4 sm:$0xff]   ;;  %v2852_v56 = vld [vmem:[%s3184_s3 + $0x344] ss:$16 sps:$4 sm:$0xff]  }
  0x48   : > { %v3285_v40 = vld [vmem:[%s3186_s4 + $0x28] sm:$0xff] }
  0x49   : > { %v2829_v42 = vld [vmem:[%s3184_s3 + $0x2c8] ss:$16 sps:$4 sm:$0xff]  }
  0x4a   : > { %1846 = vmatpush1.bf16.msra.mxu0 %v2746_v43  ;;  %2018 = vmatpush1.bf16.msra.mxu1 %v2747_v44  ;;  %v2353_v43 = vcombine.high %v3282_v39, %v3285_v40  ;;  %v2834_v44 = vld [vmem:[%s3184_s3 + $0x2e4] ss:$16 sps:$4 sm:$0xff]   ;;  %v2853_v59 = vld [vmem:[%s3184_s3 + $0x348] ss:$16 sps:$4 sm:$0xff]  }
  0x4b   : > { %1847 = vmatprep.subr.bf16.mxu0 %v2748_v45  ;;  %2019 = vmatprep.subr.bf16.mxu1 %v2750_v46  ;;  %v2837_v45 = vld [vmem:[%s3184_s3 + $0x2ec] ss:$16 sps:$4 sm:$0xff]   ;;  %v2832_v46 = vld [vmem:[%s3184_s3 + $0x2e0] ss:$16 sps:$4 sm:$0xff]  }
  0x4e   : > { %1848 = vmatpush1.bf16.msra.mxu0 %v2752_v47  ;;  %2020 = vmatpush1.bf16.msra.mxu1 %v2753_v48  ;;  %v2835_v47 = vld [vmem:[%s3184_s3 + $0x2e8] ss:$16 sps:$4 sm:$0xff]   ;;  %v2840_v48 = vld [vmem:[%s3184_s3 + $0x304] ss:$16 sps:$4 sm:$0xff]  }
  0x4f   : > { %1849 = vmatprep.subr.bf16.mxu0 %v2754_v49  ;;  %2021 = vmatprep.subr.bf16.mxu1 %v2756_v50  ;;  %v2843_v49 = vld [vmem:[%s3184_s3 + $0x30c] ss:$16 sps:$4 sm:$0xff]   ;;  %v2838_v50 = vld [vmem:[%s3184_s3 + $0x300] ss:$16 sps:$4 sm:$0xff]  }
  0x52   : > { %1850 = vmatpush1.bf16.msra.mxu0 %v2758_v51  ;;  %2022 = vmatpush1.bf16.msra.mxu1 %v2759_v52  ;;  %v2841_v51 = vld [vmem:[%s3184_s3 + $0x308] ss:$16 sps:$4 sm:$0xff]   ;;  %v2846_v52 = vld [vmem:[%s3184_s3 + $0x324] ss:$16 sps:$4 sm:$0xff]  }
  0x53   : > { %1851 = vmatprep.subr.bf16.mxu0 %v2760_v53  ;;  %2023 = vmatprep.subr.bf16.mxu1 %v2762_v54  ;;  %v2849_v53 = vld [vmem:[%s3184_s3 + $0x32c] ss:$16 sps:$4 sm:$0xff]   ;;  %v2844_v54 = vld [vmem:[%s3184_s3 + $0x320] ss:$16 sps:$4 sm:$0xff]  }
  0x56   : > { %1852 = vmatpush1.bf16.msra.mxu0 %v2764_v57  ;;  %2024 = vmatpush1.bf16.msra.mxu1 %v2765_v58  ;;  %v2855_v57 = vld [vmem:[%s3184_s3 + $0x34c] ss:$16 sps:$4 sm:$0xff]   ;;  %v2850_v58 = vld [vmem:[%s3184_s3 + $0x340] ss:$16 sps:$4 sm:$0xff]  }
  0x57   : > { %1853 = vmatprep.subr.bf16.mxu0 %v2766_v60  ;;  %2025 = vmatprep.subr.bf16.mxu1 %v2768_v61  ;;  %v2858_v60 = vld [vmem:[%s3184_s3 + $0x364] ss:$16 sps:$4 sm:$0xff]   ;;  %v2861_v61 = vld [vmem:[%s3184_s3 + $0x36c] ss:$16 sps:$4 sm:$0xff]  }
  0x5a   : > { %1854 = vmatpush1.bf16.msra.mxu0 %v2770_v62  ;;  %2026 = vmatpush1.bf16.msra.mxu1 %v2771_v63  ;;  %v2856_v62 = vld [vmem:[%s3184_s3 + $0x360] ss:$16 sps:$4 sm:$0xff]   ;;  %v2859_v63 = vld [vmem:[%s3184_s3 + $0x368] ss:$16 sps:$4 sm:$0xff]  }
  0x5b   : > { %1855 = vmatprep.subr.bf16.mxu0 %v2772_v0  ;;  %2027 = vmatprep.subr.bf16.mxu1 %v2774_v1  ;;  %v2864_v0 = vld [vmem:[%s3184_s3 + $0x384] ss:$16 sps:$4 sm:$0xff]   ;;  %v2867_v1 = vld [vmem:[%s3184_s3 + $0x38c] ss:$16 sps:$4 sm:$0xff]  }
  0x5e   : > { %1856 = vmatpush1.bf16.msra.mxu0 %v2776_v2  ;;  %2028 = vmatpush1.bf16.msra.mxu1 %v2777_v3  ;;  %v2862_v2 = vld [vmem:[%s3184_s3 + $0x380] ss:$16 sps:$4 sm:$0xff]   ;;  %v2865_v3 = vld [vmem:[%s3184_s3 + $0x388] ss:$16 sps:$4 sm:$0xff]  }
  0x5f   : > { %1857 = vmatprep.subr.bf16.mxu0 %v2778_v4  ;;  %2029 = vmatprep.subr.bf16.mxu1 %v2780_v5  ;;  %v2870_v4 = vld [vmem:[%s3184_s3 + $0x3a4] ss:$16 sps:$4 sm:$0xff]   ;;  %v2873_v5 = vld [vmem:[%s3184_s3 + $0x3ac] ss:$16 sps:$4 sm:$0xff]  }
  0x62   : > { %1858 = vmatpush1.bf16.msra.mxu0 %v2782_v6  ;;  %2030 = vmatpush1.bf16.msra.mxu1 %v2783_v7  ;;  %v2868_v6 = vld [vmem:[%s3184_s3 + $0x3a0] ss:$16 sps:$4 sm:$0xff]   ;;  %v2871_v7 = vld [vmem:[%s3184_s3 + $0x3a8] ss:$16 sps:$4 sm:$0xff]  }
  0x63   : > { %1859 = vmatprep.subr.bf16.mxu0 %v2784_v8  ;;  %2031 = vmatprep.subr.bf16.mxu1 %v2786_v9  ;;  %v2876_v8 = vld [vmem:[%s3184_s3 + $0x3c4] ss:$16 sps:$4 sm:$0xff]   ;;  %v2879_v9 = vld [vmem:[%s3184_s3 + $0x3cc] ss:$16 sps:$4 sm:$0xff]  }
  0x66   : > { %1860 = vmatpush1.bf16.msra.mxu0 %v2788_v10  ;;  %2032 = vmatpush1.bf16.msra.mxu1 %v2789_v11  ;;  %v2874_v10 = vld [vmem:[%s3184_s3 + $0x3c0] ss:$16 sps:$4 sm:$0xff]   ;;  %v2877_v11 = vld [vmem:[%s3184_s3 + $0x3c8] ss:$16 sps:$4 sm:$0xff]  }
  0x67   : > { %1872 = vmatprep.subr.bf16.mxu0 %v2792_v12  ;;  %2044 = vmatprep.subr.bf16.mxu1 %v2795_v13  ;;  %v2882_v12 = vld [vmem:[%s3184_s3 + $0x3e4] ss:$16 sps:$4 sm:$0xff]   ;;  %v2885_v13 = vld [vmem:[%s3184_s3 + $0x3ec] ss:$16 sps:$4 sm:$0xff]  }
  0x69   : > { %1862 = vmatmul.mubr.bf16.vlgmr.msra.gmra.mrb[0].mxu0 %v2350_v14  ;;  %2034 = vmatmul.mubr.bf16.vlgmr.msra.gmra.mrb[0].mxu1 %v2350_v14  ;;  %v2880_v14 = vld [vmem:[%s3184_s3 + $0x3e0] ss:$16 sps:$4 sm:$0xff]  }
  0x6a   : > { %1873 = vmatpush1.bf16.msra.mxu0 %v2790_v15  ;;  %2045 = vmatpush1.bf16.msra.mxu1 %v2793_v16  ;;  %v2883_v15 = vld [vmem:[%s3184_s3 + $0x3e8] ss:$16 sps:$4 sm:$0xff]   ;;  %v2888_v16 = vld [vmem:[%s3184_s3 + $0x404] ss:$16 sps:$4 sm:$0xff]  }
  0x6b   : > { %1874 = vmatprep.subr.bf16.mxu0 %v2798_v17  ;;  %2046 = vmatprep.subr.bf16.mxu1 %v2801_v18  ;;  %v2891_v17 = vld [vmem:[%s3184_s3 + $0x40c] ss:$16 sps:$4 sm:$0xff]   ;;  %v2352_v18 = vcombine.low %v3282_v39, %v3285_v40  ;;  %v2913_v39 = vld [vmem:[%s3184_s3 + $0x488] ss:$16 sps:$4 sm:$0xff]   ;;  %v2918_v40 = vld [vmem:[%s3184_s3 + $0x4a4] ss:$16 sps:$4 sm:$0xff]  }
  0x6c   : > { %1904 = vmatprep.mubr.bf16.mxu0 %v2353_v43  ;;  %2076 = vmatprep.mubr.bf16.mxu1 %v2353_v43  ;;  %v2919_v43 = vld [vmem:[%s3184_s3 + $0x4a8] ss:$16 sps:$4 sm:$0xff]  }
  0x6e   : > { %1875 = vmatpush1.bf16.msra.mxu0 %v2796_v19  ;;  %2047 = vmatpush1.bf16.msra.mxu1 %v2799_v20  ;;  %v2886_v19 = vld [vmem:[%s3184_s3 + $0x400] ss:$16 sps:$4 sm:$0xff]   ;;  %v2889_v20 = vld [vmem:[%s3184_s3 + $0x408] ss:$16 sps:$4 sm:$0xff]  }
  0x6f   : > { %1876 = vmatprep.subr.bf16.mxu0 %v2804_v21  ;;  %2048 = vmatprep.subr.bf16.mxu1 %v2807_v22  ;;  %v2894_v21 = vld [vmem:[%s3184_s3 + $0x424] ss:$16 sps:$4 sm:$0xff]   ;;  %v2897_v22 = vld [vmem:[%s3184_s3 + $0x42c] ss:$16 sps:$4 sm:$0xff]  }
  0x72   : > { %1877 = vmatpush1.bf16.msra.mxu0 %v2802_v23  ;;  %2049 = vmatpush1.bf16.msra.mxu1 %v2805_v24  ;;  %v3336_v23 = vld [vmem:[%s3186_s4 + $0x10] sm:$0xff] }
  0x73   : > { %1878 = vmatprep.subr.bf16.mxu0 %v2810_v25  ;;  %2050 = vmatprep.subr.bf16.mxu1 %v2813_v26  ;;  %v3339_v24 = vld [vmem:[%s3186_s4 + $0x30] sm:$0xff] }
  0x74   : > { %v2355_v25 = vcombine.high %v3336_v23, %v3339_v24  ;;  %v2892_v26 = vld [vmem:[%s3184_s3 + $0x420] ss:$16 sps:$4 sm:$0xff]  }
  0x76   : > { %1879 = vmatpush1.bf16.msra.mxu0 %v2808_v27  ;;  %2051 = vmatpush1.bf16.msra.mxu1 %v2811_v28  ;;  %v2895_v27 = vld [vmem:[%s3184_s3 + $0x428] ss:$16 sps:$4 sm:$0xff]   ;;  %v2900_v28 = vld [vmem:[%s3184_s3 + $0x444] ss:$16 sps:$4 sm:$0xff]  }
  0x77   : > { %1880 = vmatprep.subr.bf16.mxu0 %v2816_v29  ;;  %2052 = vmatprep.subr.bf16.mxu1 %v2819_v30  ;;  %v2903_v29 = vld [vmem:[%s3184_s3 + $0x44c] ss:$16 sps:$4 sm:$0xff]   ;;  %v2898_v30 = vld [vmem:[%s3184_s3 + $0x440] ss:$16 sps:$4 sm:$0xff]  }
  0x7a   : > { %1881 = vmatpush1.bf16.msra.mxu0 %v2814_v31  ;;  %2053 = vmatpush1.bf16.msra.mxu1 %v2817_v32  ;;  %v2901_v31 = vld [vmem:[%s3184_s3 + $0x448] ss:$16 sps:$4 sm:$0xff]   ;;  %v2906_v32 = vld [vmem:[%s3184_s3 + $0x464] ss:$16 sps:$4 sm:$0xff]  }
  0x7b   : > { %1882 = vmatprep.subr.bf16.mxu0 %v2822_v33  ;;  %2054 = vmatprep.subr.bf16.mxu1 %v2825_v34  ;;  %v2909_v33 = vld [vmem:[%s3184_s3 + $0x46c] ss:$16 sps:$4 sm:$0xff]   ;;  %v2904_v34 = vld [vmem:[%s3184_s3 + $0x460] ss:$16 sps:$4 sm:$0xff]  }
  0x7e   : > { %1883 = vmatpush1.bf16.msra.mxu0 %v2820_v35  ;;  %2055 = vmatpush1.bf16.msra.mxu1 %v2823_v36  ;;  %v2907_v35 = vld [vmem:[%s3184_s3 + $0x468] ss:$16 sps:$4 sm:$0xff]   ;;  %v2912_v36 = vld [vmem:[%s3184_s3 + $0x484] ss:$16 sps:$4 sm:$0xff]  }
  0x7f   : > { %1884 = vmatprep.subr.bf16.mxu0 %v2828_v37  ;;  %2056 = vmatprep.subr.bf16.mxu1 %v2831_v38  ;;  %v2915_v37 = vld [vmem:[%s3184_s3 + $0x48c] ss:$16 sps:$4 sm:$0xff]   ;;  %v2910_v38 = vld [vmem:[%s3184_s3 + $0x480] ss:$16 sps:$4 sm:$0xff]  }
  0x82   : > { %1885 = vmatpush1.bf16.msra.mxu0 %v2826_v41  ;;  %2057 = vmatpush1.bf16.msra.mxu1 %v2829_v42  ;;  %v2921_v41 = vld [vmem:[%s3184_s3 + $0x4ac] ss:$16 sps:$4 sm:$0xff]   ;;  %v2916_v42 = vld [vmem:[%s3184_s3 + $0x4a0] ss:$16 sps:$4 sm:$0xff]  }
  0x83   : > { %1886 = vmatprep.subr.bf16.mxu0 %v2834_v44  ;;  %2058 = vmatprep.subr.bf16.mxu1 %v2837_v45  ;;  %v2924_v44 = vld [vmem:[%s3184_s3 + $0x4c4] ss:$16 sps:$4 sm:$0xff]   ;;  %v2927_v45 = vld [vmem:[%s3184_s3 + $0x4cc] ss:$16 sps:$4 sm:$0xff]  }
  0x86   : > { %1887 = vmatpush1.bf16.msra.mxu0 %v2832_v46  ;;  %2059 = vmatpush1.bf16.msra.mxu1 %v2835_v47  ;;  %v2922_v46 = vld [vmem:[%s3184_s3 + $0x4c0] ss:$16 sps:$4 sm:$0xff]   ;;  %v2925_v47 = vld [vmem:[%s3184_s3 + $0x4c8] ss:$16 sps:$4 sm:$0xff]  }
  0x87   : > { %1888 = vmatprep.subr.bf16.mxu0 %v2840_v48  ;;  %2060 = vmatprep.subr.bf16.mxu1 %v2843_v49  ;;  %v2930_v48 = vld [vmem:[%s3184_s3 + $0x4e4] ss:$16 sps:$4 sm:$0xff]   ;;  %v2933_v49 = vld [vmem:[%s3184_s3 + $0x4ec] ss:$16 sps:$4 sm:$0xff]  }
  0x8a   : > { %1889 = vmatpush1.bf16.msra.mxu0 %v2838_v50  ;;  %2061 = vmatpush1.bf16.msra.mxu1 %v2841_v51  ;;  %v2928_v50 = vld [vmem:[%s3184_s3 + $0x4e0] ss:$16 sps:$4 sm:$0xff]   ;;  %v2931_v51 = vld [vmem:[%s3184_s3 + $0x4e8] ss:$16 sps:$4 sm:$0xff]  }
  0x8b   : > { %1890 = vmatprep.subr.bf16.mxu0 %v2846_v52  ;;  %2062 = vmatprep.subr.bf16.mxu1 %v2849_v53  ;;  %v2936_v52 = vld [vmem:[%s3184_s3 + $0x504] ss:$16 sps:$4 sm:$0xff]   ;;  %v2939_v53 = vld [vmem:[%s3184_s3 + $0x50c] ss:$16 sps:$4 sm:$0xff]  }
  0x8e   : > { %1891 = vmatpush1.bf16.msra.mxu0 %v2844_v54  ;;  %2063 = vmatpush1.bf16.msra.mxu1 %v2847_v55  ;;  %v2934_v54 = vld [vmem:[%s3184_s3 + $0x500] ss:$16 sps:$4 sm:$0xff]   ;;  %v2937_v55 = vld [vmem:[%s3184_s3 + $0x508] ss:$16 sps:$4 sm:$0xff]  }
  0x8f   : > { %1892 = vmatprep.subr.bf16.mxu0 %v2852_v56  ;;  %2064 = vmatprep.subr.bf16.mxu1 %v2855_v57  ;;  %v2942_v56 = vld [vmem:[%s3184_s3 + $0x524] ss:$16 sps:$4 sm:$0xff]   ;;  %v2945_v57 = vld [vmem:[%s3184_s3 + $0x52c] ss:$16 sps:$4 sm:$0xff]  }
  0x92   : > { %1893 = vmatpush1.bf16.msra.mxu0 %v2850_v58  ;;  %2065 = vmatpush1.bf16.msra.mxu1 %v2853_v59  ;;  %v2940_v58 = vld [vmem:[%s3184_s3 + $0x520] ss:$16 sps:$4 sm:$0xff]   ;;  %v2943_v59 = vld [vmem:[%s3184_s3 + $0x528] ss:$16 sps:$4 sm:$0xff]  }
  0x93   : > { %1894 = vmatprep.subr.bf16.mxu0 %v2858_v60  ;;  %2066 = vmatprep.subr.bf16.mxu1 %v2861_v61  ;;  %v2948_v60 = vld [vmem:[%s3184_s3 + $0x544] ss:$16 sps:$4 sm:$0xff]   ;;  %v2951_v61 = vld [vmem:[%s3184_s3 + $0x54c] ss:$16 sps:$4 sm:$0xff]  }
  0x96   : > { %1895 = vmatpush1.bf16.msra.mxu0 %v2856_v62  ;;  %2067 = vmatpush1.bf16.msra.mxu1 %v2859_v63  ;;  %v2946_v62 = vld [vmem:[%s3184_s3 + $0x540] ss:$16 sps:$4 sm:$0xff]   ;;  %v2949_v63 = vld [vmem:[%s3184_s3 + $0x548] ss:$16 sps:$4 sm:$0xff]  }
  0x97   : > { %1896 = vmatprep.subr.bf16.mxu0 %v2864_v0  ;;  %2068 = vmatprep.subr.bf16.mxu1 %v2867_v1  ;;  %v2954_v0 = vld [vmem:[%s3184_s3 + $0x564] ss:$16 sps:$4 sm:$0xff]   ;;  %v2957_v1 = vld [vmem:[%s3184_s3 + $0x56c] ss:$16 sps:$4 sm:$0xff]  }
  0x9a   : > { %1897 = vmatpush1.bf16.msra.mxu0 %v2862_v2  ;;  %2069 = vmatpush1.bf16.msra.mxu1 %v2865_v3  ;;  %v2952_v2 = vld [vmem:[%s3184_s3 + $0x560] ss:$16 sps:$4 sm:$0xff]   ;;  %v2955_v3 = vld [vmem:[%s3184_s3 + $0x568] ss:$16 sps:$4 sm:$0xff]  }
  0x9b   : > { %1898 = vmatprep.subr.bf16.mxu0 %v2870_v4  ;;  %2070 = vmatprep.subr.bf16.mxu1 %v2873_v5  ;;  %v2960_v4 = vld [vmem:[%s3184_s3 + $0x584] ss:$16 sps:$4 sm:$0xff]   ;;  %v2963_v5 = vld [vmem:[%s3184_s3 + $0x58c] ss:$16 sps:$4 sm:$0xff]  }
  0x9e   : > { %1899 = vmatpush1.bf16.msra.mxu0 %v2868_v6  ;;  %2071 = vmatpush1.bf16.msra.mxu1 %v2871_v7  ;;  %v2958_v6 = vld [vmem:[%s3184_s3 + $0x580] ss:$16 sps:$4 sm:$0xff]   ;;  %v2961_v7 = vld [vmem:[%s3184_s3 + $0x588] ss:$16 sps:$4 sm:$0xff]  }
  0x9f   : > { %1900 = vmatprep.subr.bf16.mxu0 %v2876_v8  ;;  %2072 = vmatprep.subr.bf16.mxu1 %v2879_v9  ;;  %v2966_v8 = vld [vmem:[%s3184_s3 + $0x5a4] ss:$16 sps:$4 sm:$0xff]   ;;  %v2969_v9 = vld [vmem:[%s3184_s3 + $0x5ac] ss:$16 sps:$4 sm:$0xff]  }
  0xa2   : > { %1901 = vmatpush1.bf16.msra.mxu0 %v2874_v10  ;;  %2073 = vmatpush1.bf16.msra.mxu1 %v2877_v11  ;;  %v2964_v10 = vld [vmem:[%s3184_s3 + $0x5a0] ss:$16 sps:$4 sm:$0xff]   ;;  %v2967_v11 = vld [vmem:[%s3184_s3 + $0x5a8] ss:$16 sps:$4 sm:$0xff]  }
  0xa3   : > { %1902 = vmatprep.subr.bf16.mxu0 %v2882_v12  ;;  %2074 = vmatprep.subr.bf16.mxu1 %v2885_v13  ;;  %v2972_v12 = vld [vmem:[%s3184_s3 + $0x5c4] ss:$16 sps:$4 sm:$0xff]   ;;  %v2975_v13 = vld [vmem:[%s3184_s3 + $0x5cc] ss:$16 sps:$4 sm:$0xff]  }
  0xa6   : > { %1903 = vmatpush1.bf16.msra.mxu0 %v2880_v14  ;;  %2075 = vmatpush1.bf16.msra.mxu1 %v2883_v15  ;;  %v2970_v14 = vld [vmem:[%s3184_s3 + $0x5c0] ss:$16 sps:$4 sm:$0xff]   ;;  %v2973_v15 = vld [vmem:[%s3184_s3 + $0x5c8] ss:$16 sps:$4 sm:$0xff]  }
  0xa7   : > { %1915 = vmatprep.subr.bf16.mxu0 %v2888_v16  ;;  %2087 = vmatprep.subr.bf16.mxu1 %v2891_v17  ;;  %v2978_v16 = vld [vmem:[%s3184_s3 + $0x5e4] ss:$16 sps:$4 sm:$0xff]   ;;  %v2981_v17 = vld [vmem:[%s3184_s3 + $0x5ec] ss:$16 sps:$4 sm:$0xff]  }
  0xa9   : > { %1905 = vmatmul.mubr.bf16.vlgmr.msra.gmra.mrb[0].mxu0 %v2352_v18  ;;  %2077 = vmatmul.mubr.bf16.vlgmr.msra.gmra.mrb[0].mxu1 %v2352_v18  ;;  %v2976_v18 = vld [vmem:[%s3184_s3 + $0x5e0] ss:$16 sps:$4 sm:$0xff]  }
  0xaa   : > { %1916 = vmatpush1.bf16.msra.mxu0 %v2886_v19  ;;  %2088 = vmatpush1.bf16.msra.mxu1 %v2889_v20  ;;  %v2979_v19 = vld [vmem:[%s3184_s3 + $0x5e8] ss:$16 sps:$4 sm:$0xff]   ;;  %v2984_v20 = vld [vmem:[%s3184_s3 + $0x604] ss:$16 sps:$4 sm:$0xff]  }
  0xab   : > { %1917 = vmatprep.subr.bf16.mxu0 %v2894_v21  ;;  %2089 = vmatprep.subr.bf16.mxu1 %v2897_v22  ;;  %v2987_v21 = vld [vmem:[%s3184_s3 + $0x60c] ss:$16 sps:$4 sm:$0xff]   ;;  %v2354_v22 = vcombine.low %v3336_v23, %v3339_v24  ;;  %v2988_v24 = vld [vmem:[%s3184_s3 + $0x620] ss:$16 sps:$4 sm:$0xff]  }
  0xac   : > { %1947 = vmatprep.mubr.bf16.mxu0 %v2355_v25  ;;  %2119 = vmatprep.mubr.bf16.mxu1 %v2355_v25  ;;  %v3406_v25 = vld [vmem:[%s3186_s4 + $0x18] sm:$0xff] }
  0xae   : > { %1918 = vmatpush1.bf16.msra.mxu0 %v2892_v26  ;;  %2090 = vmatpush1.bf16.msra.mxu1 %v2895_v27  ;;  %v3409_v26 = vld [vmem:[%s3186_s4 + $0x38] sm:$0xff]  ;;  %v2982_v27 = vld [vmem:[%s3184_s3 + $0x600] ss:$16 sps:$4 sm:$0xff]  }
  0xaf   : > { %1919 = vmatprep.subr.bf16.mxu0 %v2900_v28  ;;  %2091 = vmatprep.subr.bf16.mxu1 %v2903_v29  ;;  %v2985_v28 = vld [vmem:[%s3184_s3 + $0x608] ss:$16 sps:$4 sm:$0xff]   ;;  %v2990_v29 = vld [vmem:[%s3184_s3 + $0x624] ss:$16 sps:$4 sm:$0xff]   ;;  %v2357_v23 = vcombine.high %v3406_v25, %v3409_v26 }
  0xb2   : > { %1920 = vmatpush1.bf16.msra.mxu0 %v2898_v30  ;;  %2092 = vmatpush1.bf16.msra.mxu1 %v2901_v31  ;;  %v2993_v30 = vld [vmem:[%s3184_s3 + $0x62c] ss:$16 sps:$4 sm:$0xff]   ;;  %v2991_v31 = vld [vmem:[%s3184_s3 + $0x628] ss:$16 sps:$4 sm:$0xff]  }
  0xb3   : > { %1921 = vmatprep.subr.bf16.mxu0 %v2906_v32  ;;  %2093 = vmatprep.subr.bf16.mxu1 %v2909_v33  ;;  %v2996_v32 = vld [vmem:[%s3184_s3 + $0x644] ss:$16 sps:$4 sm:$0xff]   ;;  %v2999_v33 = vld [vmem:[%s3184_s3 + $0x64c] ss:$16 sps:$4 sm:$0xff]  }
  0xb6   : > { %1922 = vmatpush1.bf16.msra.mxu0 %v2904_v34  ;;  %2094 = vmatpush1.bf16.msra.mxu1 %v2907_v35  ;;  %v2994_v34 = vld [vmem:[%s3184_s3 + $0x640] ss:$16 sps:$4 sm:$0xff]   ;;  %v2997_v35 = vld [vmem:[%s3184_s3 + $0x648] ss:$16 sps:$4 sm:$0xff]  }
  0xb7   : > { %1923 = vmatprep.subr.bf16.mxu0 %v2912_v36  ;;  %2095 = vmatprep.subr.bf16.mxu1 %v2915_v37  ;;  %v3002_v36 = vld [vmem:[%s3184_s3 + $0x664] ss:$16 sps:$4 sm:$0xff]   ;;  %v3005_v37 = vld [vmem:[%s3184_s3 + $0x66c] ss:$16 sps:$4 sm:$0xff]  }
  0xba   : > { %1924 = vmatpush1.bf16.msra.mxu0 %v2910_v38  ;;  %2096 = vmatpush1.bf16.msra.mxu1 %v2913_v39  ;;  %v3000_v38 = vld [vmem:[%s3184_s3 + $0x660] ss:$16 sps:$4 sm:$0xff]   ;;  %v3003_v39 = vld [vmem:[%s3184_s3 + $0x668] ss:$16 sps:$4 sm:$0xff]  }
  0xbb   : > { %1925 = vmatprep.subr.bf16.mxu0 %v2918_v40  ;;  %2097 = vmatprep.subr.bf16.mxu1 %v2921_v41  ;;  %v3008_v40 = vld [vmem:[%s3184_s3 + $0x684] ss:$16 sps:$4 sm:$0xff]   ;;  %v3011_v41 = vld [vmem:[%s3184_s3 + $0x68c] ss:$16 sps:$4 sm:$0xff]  }
  0xbe   : > { %1926 = vmatpush1.bf16.msra.mxu0 %v2916_v42  ;;  %2098 = vmatpush1.bf16.msra.mxu1 %v2919_v43  ;;  %v3006_v42 = vld [vmem:[%s3184_s3 + $0x680] ss:$16 sps:$4 sm:$0xff]   ;;  %v3009_v43 = vld [vmem:[%s3184_s3 + $0x688] ss:$16 sps:$4 sm:$0xff]  }
  0xbf   : > { %1927 = vmatprep.subr.bf16.mxu0 %v2924_v44  ;;  %2099 = vmatprep.subr.bf16.mxu1 %v2927_v45  ;;  %v3014_v44 = vld [vmem:[%s3184_s3 + $0x6a4] ss:$16 sps:$4 sm:$0xff]   ;;  %v3017_v45 = vld [vmem:[%s3184_s3 + $0x6ac] ss:$16 sps:$4 sm:$0xff]  }
  0xc2   : > { %1928 = vmatpush1.bf16.msra.mxu0 %v2922_v46  ;;  %2100 = vmatpush1.bf16.msra.mxu1 %v2925_v47  ;;  %v3012_v46 = vld [vmem:[%s3184_s3 + $0x6a0] ss:$16 sps:$4 sm:$0xff]   ;;  %v3015_v47 = vld [vmem:[%s3184_s3 + $0x6a8] ss:$16 sps:$4 sm:$0xff]  }
  0xc3   : > { %1929 = vmatprep.subr.bf16.mxu0 %v2930_v48  ;;  %2101 = vmatprep.subr.bf16.mxu1 %v2933_v49  ;;  %v3020_v48 = vld [vmem:[%s3184_s3 + $0x6c4] ss:$16 sps:$4 sm:$0xff]   ;;  %v3023_v49 = vld [vmem:[%s3184_s3 + $0x6cc] ss:$16 sps:$4 sm:$0xff]  }
  0xc6   : > { %1930 = vmatpush1.bf16.msra.mxu0 %v2928_v50  ;;  %2102 = vmatpush1.bf16.msra.mxu1 %v2931_v51  ;;  %v3018_v50 = vld [vmem:[%s3184_s3 + $0x6c0] ss:$16 sps:$4 sm:$0xff]   ;;  %v3021_v51 = vld [vmem:[%s3184_s3 + $0x6c8] ss:$16 sps:$4 sm:$0xff]  }
  0xc7   : > { %1931 = vmatprep.subr.bf16.mxu0 %v2936_v52  ;;  %2103 = vmatprep.subr.bf16.mxu1 %v2939_v53  ;;  %v3026_v52 = vld [vmem:[%s3184_s3 + $0x6e4] ss:$16 sps:$4 sm:$0xff]   ;;  %v3029_v53 = vld [vmem:[%s3184_s3 + $0x6ec] ss:$16 sps:$4 sm:$0xff]  }
  0xca   : > { %1932 = vmatpush1.bf16.msra.mxu0 %v2934_v54  ;;  %2104 = vmatpush1.bf16.msra.mxu1 %v2937_v55  ;;  %v3024_v54 = vld [vmem:[%s3184_s3 + $0x6e0] ss:$16 sps:$4 sm:$0xff]   ;;  %v3027_v55 = vld [vmem:[%s3184_s3 + $0x6e8] ss:$16 sps:$4 sm:$0xff]  }
  0xcb   : > { %1933 = vmatprep.subr.bf16.mxu0 %v2942_v56  ;;  %2105 = vmatprep.subr.bf16.mxu1 %v2945_v57  ;;  %v3032_v56 = vld [vmem:[%s3184_s3 + $0x704] ss:$16 sps:$4 sm:$0xff]   ;;  %v3035_v57 = vld [vmem:[%s3184_s3 + $0x70c] ss:$16 sps:$4 sm:$0xff]  }
  0xce   : > { %1934 = vmatpush1.bf16.msra.mxu0 %v2940_v58  ;;  %2106 = vmatpush1.bf16.msra.mxu1 %v2943_v59  ;;  %v3030_v58 = vld [vmem:[%s3184_s3 + $0x700] ss:$16 sps:$4 sm:$0xff]   ;;  %v3033_v59 = vld [vmem:[%s3184_s3 + $0x708] ss:$16 sps:$4 sm:$0xff]  }
  0xcf   : > { %1935 = vmatprep.subr.bf16.mxu0 %v2948_v60  ;;  %2107 = vmatprep.subr.bf16.mxu1 %v2951_v61  ;;  %v3038_v60 = vld [vmem:[%s3184_s3 + $0x724] ss:$16 sps:$4 sm:$0xff]   ;;  %v3041_v61 = vld [vmem:[%s3184_s3 + $0x72c] ss:$16 sps:$4 sm:$0xff]  }
  0xd2   : > { %1936 = vmatpush1.bf16.msra.mxu0 %v2946_v62  ;;  %2108 = vmatpush1.bf16.msra.mxu1 %v2949_v63  ;;  %v3036_v62 = vld [vmem:[%s3184_s3 + $0x720] ss:$16 sps:$4 sm:$0xff]   ;;  %v3039_v63 = vld [vmem:[%s3184_s3 + $0x728] ss:$16 sps:$4 sm:$0xff]  }
  0xd3   : > { %1937 = vmatprep.subr.bf16.mxu0 %v2954_v0  ;;  %2109 = vmatprep.subr.bf16.mxu1 %v2957_v1  ;;  %v3044_v0 = vld [vmem:[%s3184_s3 + $0x744] ss:$16 sps:$4 sm:$0xff]   ;;  %v3047_v1 = vld [vmem:[%s3184_s3 + $0x74c] ss:$16 sps:$4 sm:$0xff]  }
  0xd6   : > { %1938 = vmatpush1.bf16.msra.mxu0 %v2952_v2  ;;  %2110 = vmatpush1.bf16.msra.mxu1 %v2955_v3  ;;  %v3042_v2 = vld [vmem:[%s3184_s3 + $0x740] ss:$16 sps:$4 sm:$0xff]   ;;  %v3045_v3 = vld [vmem:[%s3184_s3 + $0x748] ss:$16 sps:$4 sm:$0xff]  }
  0xd7   : > { %1939 = vmatprep.subr.bf16.mxu0 %v2960_v4  ;;  %2111 = vmatprep.subr.bf16.mxu1 %v2963_v5  ;;  %v3050_v4 = vld [vmem:[%s3184_s3 + $0x764] ss:$16 sps:$4 sm:$0xff]   ;;  %v3053_v5 = vld [vmem:[%s3184_s3 + $0x76c] ss:$16 sps:$4 sm:$0xff]  }
  0xda   : > { %1940 = vmatpush1.bf16.msra.mxu0 %v2958_v6  ;;  %2112 = vmatpush1.bf16.msra.mxu1 %v2961_v7  ;;  %v3048_v6 = vld [vmem:[%s3184_s3 + $0x760] ss:$16 sps:$4 sm:$0xff]   ;;  %v3051_v7 = vld [vmem:[%s3184_s3 + $0x768] ss:$16 sps:$4 sm:$0xff]  }
  0xdb   : > { %1941 = vmatprep.subr.bf16.mxu0 %v2966_v8  ;;  %2113 = vmatprep.subr.bf16.mxu1 %v2969_v9  ;;  %v3056_v8 = vld [vmem:[%s3184_s3 + $0x784] ss:$16 sps:$4 sm:$0xff]   ;;  %v3059_v9 = vld [vmem:[%s3184_s3 + $0x78c] ss:$16 sps:$4 sm:$0xff]  }
  0xde   : > { %1942 = vmatpush1.bf16.msra.mxu0 %v2964_v10  ;;  %2114 = vmatpush1.bf16.msra.mxu1 %v2967_v11  ;;  %v3054_v10 = vld [vmem:[%s3184_s3 + $0x780] ss:$16 sps:$4 sm:$0xff]   ;;  %v3057_v11 = vld [vmem:[%s3184_s3 + $0x788] ss:$16 sps:$4 sm:$0xff]  }
  0xdf   : > { %1943 = vmatprep.subr.bf16.mxu0 %v2972_v12  ;;  %2115 = vmatprep.subr.bf16.mxu1 %v2975_v13  ;;  %v3062_v12 = vld [vmem:[%s3184_s3 + $0x7a4] ss:$16 sps:$4 sm:$0xff]   ;;  %v3065_v13 = vld [vmem:[%s3184_s3 + $0x7ac] ss:$16 sps:$4 sm:$0xff]  }
  0xe2   : > { %1944 = vmatpush1.bf16.msra.mxu0 %v2970_v14  ;;  %2116 = vmatpush1.bf16.msra.mxu1 %v2973_v15  ;;  %v3060_v14 = vld [vmem:[%s3184_s3 + $0x7a0] ss:$16 sps:$4 sm:$0xff]   ;;  %v3063_v15 = vld [vmem:[%s3184_s3 + $0x7a8] ss:$16 sps:$4 sm:$0xff]  }
  0xe3   : > { %1945 = vmatprep.subr.bf16.mxu0 %v2978_v16  ;;  %2117 = vmatprep.subr.bf16.mxu1 %v2981_v17  ;;  %v3068_v16 = vld [vmem:[%s3184_s3 + $0x7c4] ss:$16 sps:$4 sm:$0xff]   ;;  %v3071_v17 = vld [vmem:[%s3184_s3 + $0x7cc] ss:$16 sps:$4 sm:$0xff]  }
  0xe6   : > { %1946 = vmatpush1.bf16.msra.mxu0 %v2976_v18  ;;  %2118 = vmatpush1.bf16.msra.mxu1 %v2979_v19  ;;  %v3066_v18 = vld [vmem:[%s3184_s3 + $0x7c0] ss:$16 sps:$4 sm:$0xff]   ;;  %v3069_v19 = vld [vmem:[%s3184_s3 + $0x7c8] ss:$16 sps:$4 sm:$0xff]  }
  0xe7   : > { %1958 = vmatprep.subr.bf16.mxu0 %v2984_v20  ;;  %2130 = vmatprep.subr.bf16.mxu1 %v2987_v21  ;;  %v3074_v20 = vld [vmem:[%s3184_s3 + $0x7e4] ss:$16 sps:$4 sm:$0xff]   ;;  %v3077_v21 = vld [vmem:[%s3184_s3 + $0x7ec] ss:$16 sps:$4 sm:$0xff]  }
  0xe9   : > { %1948 = vmatmul.mubr.bf16.vlgmr.msra.gmra.mrb[0].mxu0 %v2354_v22  ;;  %2120 = vmatmul.mubr.bf16.vlgmr.msra.gmra.mrb[0].mxu1 %v2354_v22  ;;  %v3072_v22 = vld [vmem:[%s3184_s3 + $0x7e0] ss:$16 sps:$4 sm:$0xff]  }
  0xea   : > { %1959 = vmatpush1.bf16.msra.mxu0 %v2982_v27  ;;  %2131 = vmatpush1.bf16.msra.mxu1 %v2985_v28  ;;  %v3075_v27 = vld [vmem:[%s3184_s3 + $0x7e8] ss:$16 sps:$4 sm:$0xff]   ;;  %v2356_v28 = vcombine.low %v3406_v25, %v3409_v26 }
  0xeb   : > { %1960 = vmatprep.subr.bf16.mxu0 %v2990_v29  ;;  %2132 = vmatprep.subr.bf16.mxu1 %v2993_v30  ;;  %v237_v29 = vld [vmem:[#allocation2] sm:$0xff]  ;;  %v239_v30 = vld [vmem:[#allocation2 + $0x10] sm:$0xff] }
  0xec   : > { %1990 = vmatprep.mubr.bf16.mxu0 %v2357_v23  ;;  %2162 = vmatprep.mubr.bf16.mxu1 %v2357_v23  ;;  %v238_v23 = vld [vmem:[#allocation2 + $0x8] sm:$0xff] }
  0xee   : > { %1961 = vmatpush1.bf16.msra.mxu0 %v2988_v24  ;;  %2133 = vmatpush1.bf16.msra.mxu1 %v2991_v31  ;;  %v240_v24 = vld [vmem:[#allocation2 + $0x18] sm:$0xff] }
  0xef   : > { %1962 = vmatprep.subr.bf16.mxu0 %v2996_v32  ;;  %2134 = vmatprep.subr.bf16.mxu1 %v2999_v33  ;;  %v241_v33 = vld [vmem:[#allocation2 + $0x20] sm:$0xff] }
  0xf2   : > { %1963 = vmatpush1.bf16.msra.mxu0 %v2994_v34  ;;  %2135 = vmatpush1.bf16.msra.mxu1 %v2997_v35  ;;  %v243_v34 = vld [vmem:[#allocation2 + $0x30] sm:$0xff] }
  0xf3   : > { %1964 = vmatprep.subr.bf16.mxu0 %v3002_v36  ;;  %2136 = vmatprep.subr.bf16.mxu1 %v3005_v37 }
  0xf6   : > { %1965 = vmatpush1.bf16.msra.mxu0 %v3000_v38  ;;  %2137 = vmatpush1.bf16.msra.mxu1 %v3003_v39  ;;  %v242_v39 = vld [vmem:[#allocation2 + $0x28] sm:$0xff] }
  0xf7   : > { %1966 = vmatprep.subr.bf16.mxu0 %v3008_v40  ;;  %2138 = vmatprep.subr.bf16.mxu1 %v3011_v41  ;;  %v244_v40 = vld [vmem:[#allocation2 + $0x38] sm:$0xff] }
  0xfa   : > { %1967 = vmatpush1.bf16.msra.mxu0 %v3006_v42  ;;  %2139 = vmatpush1.bf16.msra.mxu1 %v3009_v43 }
  0xfb   : > { %1968 = vmatprep.subr.bf16.mxu0 %v3014_v44  ;;  %2140 = vmatprep.subr.bf16.mxu1 %v3017_v45 }
  0xfe   : > { %1969 = vmatpush1.bf16.msra.mxu0 %v3012_v46  ;;  %2141 = vmatpush1.bf16.msra.mxu1 %v3015_v47 }
  0xff   : > { %1970 = vmatprep.subr.bf16.mxu0 %v3020_v48  ;;  %2142 = vmatprep.subr.bf16.mxu1 %v3023_v49 }
 0x102   : > { %1971 = vmatpush1.bf16.msra.mxu0 %v3018_v50  ;;  %2143 = vmatpush1.bf16.msra.mxu1 %v3021_v51 }
 0x103   : > { %1972 = vmatprep.subr.bf16.mxu0 %v3026_v52  ;;  %2144 = vmatprep.subr.bf16.mxu1 %v3029_v53 }
 0x106   : > { %1973 = vmatpush1.bf16.msra.mxu0 %v3024_v54  ;;  %2145 = vmatpush1.bf16.msra.mxu1 %v3027_v55 }
 0x107   : > { %1974 = vmatprep.subr.bf16.mxu0 %v3032_v56  ;;  %2146 = vmatprep.subr.bf16.mxu1 %v3035_v57 }
 0x10a   : > { %1975 = vmatpush1.bf16.msra.mxu0 %v3030_v58  ;;  %2147 = vmatpush1.bf16.msra.mxu1 %v3033_v59 }
 0x10b   : > { %1976 = vmatprep.subr.bf16.mxu0 %v3038_v60  ;;  %2148 = vmatprep.subr.bf16.mxu1 %v3041_v61 }
 0x10e   : > { %1977 = vmatpush1.bf16.msra.mxu0 %v3036_v62  ;;  %2149 = vmatpush1.bf16.msra.mxu1 %v3039_v63 }
 0x10f   : > { %1978 = vmatprep.subr.bf16.mxu0 %v3044_v0  ;;  %2150 = vmatprep.subr.bf16.mxu1 %v3047_v1 }
 0x112   : > { %1979 = vmatpush1.bf16.msra.mxu0 %v3042_v2  ;;  %2151 = vmatpush1.bf16.msra.mxu1 %v3045_v3 }
 0x113   : > { %1980 = vmatprep.subr.bf16.mxu0 %v3050_v4  ;;  %2152 = vmatprep.subr.bf16.mxu1 %v3053_v5 }
 0x116   : > { %1981 = vmatpush1.bf16.msra.mxu0 %v3048_v6  ;;  %2153 = vmatpush1.bf16.msra.mxu1 %v3051_v7 }
 0x117   : > { %1982 = vmatprep.subr.bf16.mxu0 %v3056_v8  ;;  %2154 = vmatprep.subr.bf16.mxu1 %v3059_v9 }
 0x11a   : > { %1983 = vmatpush1.bf16.msra.mxu0 %v3054_v10  ;;  %2155 = vmatpush1.bf16.msra.mxu1 %v3057_v11 }
 0x11b   : > { %1984 = vmatprep.subr.bf16.mxu0 %v3062_v12  ;;  %2156 = vmatprep.subr.bf16.mxu1 %v3065_v13 }
 0x11e   : > { %1985 = vmatpush1.bf16.msra.mxu0 %v3060_v14  ;;  %2157 = vmatpush1.bf16.msra.mxu1 %v3063_v15 }
 0x11f   : > { %1986 = vmatprep.subr.bf16.mxu0 %v3068_v16  ;;  %2158 = vmatprep.subr.bf16.mxu1 %v3071_v17 }
 0x122   : > { %1987 = vmatpush1.bf16.msra.mxu0 %v3066_v18  ;;  %2159 = vmatpush1.bf16.msra.mxu1 %v3069_v19 }
 0x123   : > { %1988 = vmatprep.subr.bf16.mxu0 %v3074_v20  ;;  %2160 = vmatprep.subr.bf16.mxu1 %v3077_v21 }
 0x126   : > { %1989 = vmatpush1.bf16.msra.mxu0 %v3072_v22  ;;  %2161 = vmatpush1.bf16.msra.mxu1 %v3075_v27 }
 0x129   : > { %1991 = vmatmul.mubr.bf16.vlgmr.msra.gmra.mrb[0].mxu0 %v2356_v28  ;;  %2163 = vmatmul.mubr.bf16.vlgmr.msra.gmra.mrb[0].mxu1 %v2356_v28 }
 0x1fc   : > { %v1992_v31 = vpop.f32.mrb[0].mxu0  ;;  %v2164_v32 = vpop.f32.mrb[0].mxu1  ;;  %2192 = sbr.rel (%p2614_p11) target bundleno = 531 (0x213), region = 59 }
 0x1fd   : > { %v2173_v35 = vadd.f32 %v1992_v31, %v237_v29  ;;  %v2175_v36 = vadd.f32 %v2164_v32, %v239_v30  ;;  %v1994_v37 = vpop.f32.mrb[1].mxu0  ;;  %v2166_v38 = vpop.f32.mrb[1].mxu1 }
 0x1fe   : > { %v2174_v41 = vadd.f32 %v1994_v37, %v238_v23  ;;  %v2176_v25 = vadd.f32 %v2166_v38, %v240_v24  ;;  %v1996_v26 = vpop.f32.mrb[2].mxu0  ;;  %v2168_v42 = vpop.f32.mrb[2].mxu1 }
 0x1ff   : > { %2181 = vst [vmem:[#allocation2] sm:$0xff] %v2173_v35  ;;  %2183 = vst [vmem:[#allocation2 + $0x10] sm:$0xff] %v2175_v36  ;;  %v2177_v43 = vadd.f32 %v1996_v26, %v241_v33  ;;  %v2179_v44 = vadd.f32 %v2168_v42, %v243_v34  ;;  %v1998_v45 = vpop.f32.mrb[3].mxu0  ;;  %v2170_v46 = vpop.f32.mrb[3].mxu1 }
 0x200   : > { %2182 = vst [vmem:[#allocation2 + $0x8] sm:$0xff] %v2174_v41  ;;  %2184 = vst [vmem:[#allocation2 + $0x18] sm:$0xff] %v2176_v25  ;;  %v2178_v47 = vadd.f32 %v1998_v45, %v242_v39  ;;  %v2180_v48 = vadd.f32 %v2170_v46, %v244_v40 }
 0x201   : > { %2185 = vst [vmem:[#allocation2 + $0x20] sm:$0xff] %v2177_v43  ;;  %2187 = vst [vmem:[#allocation2 + $0x30] sm:$0xff] %v2179_v44 }
 0x202   : > { %2186 = vst [vmem:[#allocation2 + $0x28] sm:$0xff] %v2178_v47  ;;  %2188 = vst [vmem:[#allocation2 + $0x38] sm:$0xff] %v2180_v48 }
 0x206   : > { %v2193_v49 = vld [vmem:[#allocation2] sm:$0xff]  ;;  %v2195_v51 = vld [vmem:[#allocation2 + $0x10] sm:$0xff] }
 0x207   : > { %v2194_v50 = vld [vmem:[#allocation2 + $0x8] sm:$0xff]  ;;  %vm2201_vm0 = vcmp.ge.f32.partialorder %v2193_v49, 0.0  ;;  %v2209_v52 = vmul.f32 0.2, %v2193_v49  ;;  %v2196_v54 = vld [vmem:[#allocation2 + $0x18] sm:$0xff]  ;;  %vm2203_vm2 = vcmp.ge.f32.partialorder %v2195_v51, 0.0 }
 0x208   : > { %vm2202_vm1 = vcmp.ge.f32.partialorder %v2194_v50, 0.0  ;;  %v2210_v53 = vmul.f32 0.2, %v2194_v50  ;;  %v2211_v55 = vmul.f32 0.2, %v2195_v51  ;;  %v2197_v56 = vld [vmem:[#allocation2 + $0x20] sm:$0xff] }
 0x209   : > { %v2198_v57 = vld [vmem:[#allocation2 + $0x28] sm:$0xff]  ;;  %v2217_v58 = vsel %vm2201_vm0, %v2193_v49, %v2209_v52  ;;  %vm2204_vm3 = vcmp.ge.f32.partialorder %v2196_v54, 0.0  ;;  %v2212_v60 = vmul.f32 0.2, %v2196_v54  ;;  %v2199_v61 = vld [vmem:[#allocation2 + $0x30] sm:$0xff]  ;;  %v2200_v62 = vld [vmem:[#allocation2 + $0x38] sm:$0xff] }
 0x20a   : > { %v2218_v59 = vsel %vm2202_vm1, %v2194_v50, %v2210_v53  ;;  %v2219_v0 = vsel %vm2203_vm2, %v2195_v51, %v2211_v55  ;;  %vm2205_vm4 = vcmp.ge.f32.partialorder %v2197_v56, 0.0  ;;  %vm2206_vm5 = vcmp.ge.f32.partialorder %v2198_v57, 0.0 }
 0x20b   : > { %v2625_v63 = vpack.c.bf16 %v2218_v59, %v2217_v58  ;;  %v2220_v1 = vsel %vm2204_vm3, %v2196_v54, %v2212_v60  ;;  %v2213_v2 = vmul.f32 0.2, %v2197_v56  ;;  %v2214_v3 = vmul.f32 0.2, %v2198_v57 }
 0x20c   : > { %vm2207_vm6 = vcmp.ge.f32.partialorder %v2199_v61, 0.0  ;;  %v2626_v4 = vpack.c.bf16 %v2220_v1, %v2219_v0  ;;  %vm2208_vm7 = vcmp.ge.f32.partialorder %v2200_v62, 0.0  ;;  %v2215_v5 = vmul.f32 0.2, %v2199_v61 }
 0x20d   : > { %2249 = vst [vmem:[%s3507_s2] sm:$0xff] %v2625_v63  ;;  %v2216_v6 = vmul.f32 0.2, %v2200_v62  ;;  %v2221_v7 = vsel %vm2205_vm4, %v2197_v56, %v2213_v2  ;;  %v2222_v8 = vsel %vm2206_vm5, %v2198_v57, %v2214_v3 }
 0x20e   : > { %2250 = vst [vmem:[%s3507_s2 + $0x8] sm:$0xff] %v2626_v4  ;;  %v2627_v9 = vpack.c.bf16 %v2222_v8, %v2221_v7  ;;  %v2223_v10 = vsel %vm2207_vm6, %v2199_v61, %v2215_v5 }
 0x20f   : > { %v2224_v11 = vsel %vm2208_vm7, %v2200_v62, %v2216_v6 }
 0x210   : > { %v2628_v12 = vpack.c.bf16 %v2224_v11, %v2223_v10  ;;  %2251 = vst [vmem:[%s3507_s2 + $0x10] sm:$0xff] %v2627_v9 }
 0x212   : > { %2252 = vst [vmem:[%s3507_s2 + $0x18] sm:$0xff] %v2628_v12 }
 0x213 PF: > { %s12_s13 = sadd.s32 1, %s3116_s13   ;;  %s3508_s9 = smov %s3104_s10 }
 0x214   : > { %p9_p12 = scmp.ge.s32.totalorder %s12_s13, 6   ;;  %s3509_s10 = smov %s3169_s17 }
 0x215   : > { %s3510_s11 = smov %s3112_s12  ;;  %s3511_s12 = smov %s3513_s14 }
 0x216   :  { %11 = sbr.rel (!%p9_p12) target bundleno = 3 (0x3), region = 97 }

// kernel: discriminator_forward.9
= control target key start
LH: loop header
LB: loop body
LE: loop exit
PB: predicated region body
PF: predicated region fallthrough
CT: control target
= control target key end

     0   :  { %s1386_s9 = smov 0   ;;  %s1388_s10 = smov 0   ;;  %s1535_s0 = inlined_call_operand.vmem [shape: bf16[16,8192], index: 0, kind: input, shape index: {}]   ;;  %s1536_s1 = inlined_call_operand.vmem [shape: bf16[8192,128], index: 1, kind: input, shape index: {}]   ;;  %s1537_s2 = inlined_call_operand.vmem [shape: f32[16,128], index: 2, kind: output, shape index: {}]  }
   0x1   :  { %s1390_s11 = smov 0   ;;  %s1392_s12 = smov 0  }
   0x2   :  { %s1394_s13 = smov 0  }
   0x3 LB: > { %s21_s14 = sadd.s32 1, %s1364_s12  ;;  %p40_p1 = scmp.ne.s32.totalorder %s1356_s10, %s1352_s9  ;;  %s1368_s13 = sphi %s1394_s13, %s12_s13   ;;  %s1364_s12 = sphi %s1392_s12, %s1541_s12   ;;  %s1360_s11 = sphi %s1390_s11, %s1540_s11   ;;  %s1356_s10 = sphi %s1388_s10, %s1539_s10   ;;  %s1352_s9 = sphi %s1386_s9, %s1538_s9  }
   0x4   : > { %p22_p0 = scmp.ge.s32.totalorder %s21_s14, 8  ;;  %p41_p2 = scmp.eq.s32.totalorder %s1368_s13, 0 }
   0x5   : > { %s33_s16 = sadd.s32 1, %s1356_s10  ;;  %p1050_p5 = scmp.ge.s32.totalorder %s1368_s13, 8 }
   0x6   : > { %s1543_s14 = smov (%p22_p0, %s21_s14), 0  ;;  %p42_p3 = por %p41_p2, %p40_p1 }
   0x7   : > { %s29_s15 = ssub.s32 %s1364_s12, %s1543_s14  ;;  %118 = sbr.rel (%p1050_p5) target bundleno = 22 (0x16), region = 16 }
   0x8   : > { %p31_p4 = scmp.eq.s32.totalorder %s29_s15, 0 }
   0xa   : > { %s1421_s17 = scalar_select %p31_p4, %s1356_s10, %s33_s16  }
   0xe   : > { %121 = sbr.rel (!%p42_p3) target bundleno = 22 (0x16), region = 20  ;;  %s123_s18 = sand.u32 (%p42_p3), 1, %s1356_s10  }
   0xf   : > { %s1136_s19 = sshll.u32 (%p42_p3), %s1364_s12, 5  ;;  %s1051_s20 = sshll.u32 (%p42_p3), %s123_s18, 6 }
  0x10   : > { %s131_s23 = scalar_lea.vmem (%p42_p3), %s1535_s0, %s1136_s19  ;;  %s125_s24 = scalar_lea.vmem (%p42_p3), [#allocation3], %s1051_s20 }
  0x11   : > { %v144_v0 = vld [vmem:[%s131_s23] sm:$0xff] (%p42_p3)  ;;  %v146_v1 = vld [vmem:[%s131_s23 + $0x8] sm:$0xff] (%p42_p3)  ;;  %v148_v2 = vld [vmem:[%s131_s23 + $0x10] sm:$0xff] (%p42_p3) }
  0x12   : > { %145 = vst [vmem:[%s125_s24] sm:$0xff] (%p42_p3), %v144_v0  ;;  %147 = vst [vmem:[%s125_s24 + $0x8] sm:$0xff] (%p42_p3), %v146_v1  ;;  %v150_v3 = vld [vmem:[%s131_s23 + $0x18] sm:$0xff] (%p42_p3)  ;;  %v152_v4 = vld [vmem:[%s131_s23 + $0x100] sm:$0xff] (%p42_p3) }
  0x13   : > { %149 = vst [vmem:[%s125_s24 + $0x10] sm:$0xff] (%p42_p3), %v148_v2  ;;  %v154_v5 = vld [vmem:[%s131_s23 + $0x108] sm:$0xff] (%p42_p3)  ;;  %151 = vst [vmem:[%s125_s24 + $0x18] sm:$0xff] (%p42_p3), %v150_v3  ;;  %v156_v6 = vld [vmem:[%s131_s23 + $0x110] sm:$0xff] (%p42_p3) }
  0x14   : > { %153 = vst [vmem:[%s125_s24 + $0x20] sm:$0xff] (%p42_p3), %v152_v4  ;;  %155 = vst [vmem:[%s125_s24 + $0x28] sm:$0xff] (%p42_p3), %v154_v5  ;;  %v158_v7 = vld [vmem:[%s131_s23 + $0x118] sm:$0xff] (%p42_p3) }
  0x15   : > { %157 = vst [vmem:[%s125_s24 + $0x30] sm:$0xff] %v156_v6  ;;  %159 = vst [vmem:[%s125_s24 + $0x38] sm:$0xff] %v158_v7 }
  0x16 PF: > { %p1054_p6 = scmp.ge.s32.totalorder %s1368_s13, 1  ;;  %p173_p7 = scmp.lt.s32.totalorder %s1368_s13, 9 }
  0x18   : > { %p174_p8 = pnand %p1054_p6, %p173_p7 }
  0x19   : > { %s180_s25 = sand.u32 (!%p174_p8), 1, %s1352_s9   ;;  %s1056_s26 = sshll.u32 (!%p174_p8), %s1360_s11, 7 }
  0x1a   : > { %177 = sbr.rel (%p174_p8) target bundleno = 338 (0x152), region = 47  ;;  %s1055_s27 = sshll.u32 (!%p174_p8), %s180_s25, 6 }
  0x1b   : > { %p209_p9 = scmp.lt.s32.totalorder (!%p174_p8), %s1056_s26, 1023  ;;  %s1438_s4 = scalar_lea.vmem (!%p174_p8), [#allocation3], %s1055_s27 }
  0x1c   : > { %p1058_p10 = scmp.ne.s32.totalorder (!%p174_p8), %s1360_s11, 0 }
  0x21   : > { %s1545_s26 = smov (!%p209_p9, %s1056_s26), 1023  ;;  %224 = sbr.rel (%p1058_p10) target bundleno = 40 (0x28), region = 55 }
  0x22   : > { %s1057_s28 = sshll.u32 %s1545_s26, 2  ;;  %v1370_v8 = vmov (!%p1058_p10), 0.0  }
  0x23   : > { %s1436_s3 = scalar_lea.vmem %s1536_s1, %s1057_s28  ;;  %225 = vst [vmem:[#allocation2] sm:$0xff] (!%p1058_p10), %v1370_v8  ;;  %226 = vst [vmem:[#allocation2 + $0x8] sm:$0xff] (!%p1058_p10), %v1370_v8 }
  0x28 PF: > { %v1266_v9 = vld [vmem:[%s1436_s3 + $0x40] sm:$0xff]   ;;  %v1270_v13 = vld [vmem:[%s1436_s3 + $0x48] sm:$0xff]   ;;  %v1274_v17 = vld [vmem:[%s1436_s3 + $0x50] sm:$0xff]   ;;  %p1131_p11 = scmp.ne.s32.totalorder %s1360_s11, 7 }
  0x29   : > { %v1267_v10 = vld [vmem:[%s1436_s3 + $0xc0] sm:$0xff]   ;;  %1137 = vmatprep.subr.bf16.mxu0 %v1266_v9  ;;  %v1271_v14 = vld [vmem:[%s1436_s3 + $0xc8] sm:$0xff]   ;;  %v1275_v18 = vld [vmem:[%s1436_s3 + $0xd0] sm:$0xff]  }
  0x2a   : > { %v1268_v11 = vld [vmem:[%s1436_s3] sm:$0xff]   ;;  %1159 = vmatprep.subr.bf16.mxu1 %v1267_v10  ;;  %v1272_v15 = vld [vmem:[%s1436_s3 + $0x8] sm:$0xff]   ;;  %v1276_v19 = vld [vmem:[%s1436_s3 + $0x10] sm:$0xff]  }
  0x2b   : > { %v1269_v12 = vld [vmem:[%s1436_s3 + $0x80] sm:$0xff]   ;;  %1138 = vmatpush3.bf16.msra.mxu0 %v1268_v11  ;;  %v1273_v16 = vld [vmem:[%s1436_s3 + $0x88] sm:$0xff]   ;;  %v1277_v20 = vld [vmem:[%s1436_s3 + $0x90] sm:$0xff]  }
  0x2c   : > { %1160 = vmatpush3.bf16.msra.mxu1 %v1269_v12  ;;  %1139 = vmatprep.subr.bf16.mxu0 %v1270_v13  ;;  %v1278_v21 = vld [vmem:[%s1436_s3 + $0x58] sm:$0xff]   ;;  %v1282_v25 = vld [vmem:[%s1436_s3 + $0x60] sm:$0xff]   ;;  %v1286_v29 = vld [vmem:[%s1436_s3 + $0x68] sm:$0xff]  }
  0x2d   : > { %1161 = vmatprep.subr.bf16.mxu1 %v1271_v14  ;;  %v1279_v22 = vld [vmem:[%s1436_s3 + $0xd8] sm:$0xff]   ;;  %v1283_v26 = vld [vmem:[%s1436_s3 + $0xe0] sm:$0xff]   ;;  %v1287_v30 = vld [vmem:[%s1436_s3 + $0xe8] sm:$0xff]  }
  0x2e   : > { %v1280_v23 = vld [vmem:[%s1436_s3 + $0x18] sm:$0xff]   ;;  %v1284_v27 = vld [vmem:[%s1436_s3 + $0x20] sm:$0xff]   ;;  %v1288_v31 = vld [vmem:[%s1436_s3 + $0x28] sm:$0xff]  }
  0x2f   : > { %1140 = vmatpush3.bf16.msra.mxu0 %v1272_v15  ;;  %v1281_v24 = vld [vmem:[%s1436_s3 + $0x98] sm:$0xff]   ;;  %v1285_v28 = vld [vmem:[%s1436_s3 + $0xa0] sm:$0xff]   ;;  %v1289_v32 = vld [vmem:[%s1436_s3 + $0xa8] sm:$0xff]  }
  0x30   : > { %1162 = vmatpush3.bf16.msra.mxu1 %v1273_v16  ;;  %1141 = vmatprep.subr.bf16.mxu0 %v1274_v17  ;;  %v1290_v33 = vld [vmem:[%s1436_s3 + $0x70] sm:$0xff]   ;;  %v1294_v37 = vld [vmem:[%s1436_s3 + $0x78] sm:$0xff]   ;;  %v1298_v49 = vld [vmem:[%s1436_s3 + $0x140] sm:$0xff]  }
  0x31   : > { %1163 = vmatprep.subr.bf16.mxu1 %v1275_v18  ;;  %v1291_v34 = vld [vmem:[%s1436_s3 + $0xf0] sm:$0xff]   ;;  %v1295_v38 = vld [vmem:[%s1436_s3 + $0xf8] sm:$0xff]   ;;  %v1299_v50 = vld [vmem:[%s1436_s3 + $0x1c0] sm:$0xff]  }
  0x32   : > { %v1292_v35 = vld [vmem:[%s1436_s3 + $0x30] sm:$0xff]   ;;  %v1296_v39 = vld [vmem:[%s1436_s3 + $0x38] sm:$0xff]   ;;  %v1300_v51 = vld [vmem:[%s1436_s3 + $0x100] sm:$0xff]  }
  0x33   : > { %1142 = vmatpush3.bf16.msra.mxu0 %v1276_v19  ;;  %v1293_v36 = vld [vmem:[%s1436_s3 + $0xb0] sm:$0xff]   ;;  %v1297_v40 = vld [vmem:[%s1436_s3 + $0xb8] sm:$0xff]   ;;  %v1301_v52 = vld [vmem:[%s1436_s3 + $0x180] sm:$0xff]  }
  0x34   : > { %1164 = vmatpush3.bf16.msra.mxu1 %v1277_v20  ;;  %1143 = vmatprep.subr.bf16.mxu0 %v1278_v21  ;;  %v229_v41 = vld [vmem:[%s1438_s4] sm:$0xff]  ;;  %v230_v43 = vld [vmem:[%s1438_s4 + $0x8] sm:$0xff]  ;;  %v1302_v53 = vld [vmem:[%s1436_s3 + $0x148] sm:$0xff]  }
  0x35   : > { %1165 = vmatprep.subr.bf16.mxu1 %v1279_v22  ;;  %v233_v42 = vld [vmem:[%s1438_s4 + $0x20] sm:$0xff]  ;;  %v234_v46 = vld [vmem:[%s1438_s4 + $0x28] sm:$0xff]  ;;  %v1303_v54 = vld [vmem:[%s1436_s3 + $0x1c8] sm:$0xff]  }
  0x36   : > { %v1059_v44 = vcombine.low %v229_v41, %v233_v42  ;;  %v1060_v45 = vcombine.high %v229_v41, %v233_v42  ;;  %v1061_v47 = vcombine.low %v230_v43, %v234_v46  ;;  %v1062_v48 = vcombine.high %v230_v43, %v234_v46  ;;  %v1304_v55 = vld [vmem:[%s1436_s3 + $0x108] sm:$0xff]   ;;  %v1306_v57 = vld [vmem:[%s1436_s3 + $0x150] sm:$0xff]   ;;  %v1310_v61 = vld [vmem:[%s1436_s3 + $0x158] sm:$0xff]  }
  0x37   : > { %1144 = vmatpush3.bf16.msra.mxu0 %v1280_v23  ;;  %v1305_v56 = vld [vmem:[%s1436_s3 + $0x188] sm:$0xff]   ;;  %v1307_v58 = vld [vmem:[%s1436_s3 + $0x1d0] sm:$0xff]   ;;  %v1311_v62 = vld [vmem:[%s1436_s3 + $0x1d8] sm:$0xff]  }
  0x38   : > { %1166 = vmatpush3.bf16.msra.mxu1 %v1281_v24  ;;  %1145 = vmatprep.subr.bf16.mxu0 %v1282_v25  ;;  %v1308_v59 = vld [vmem:[%s1436_s3 + $0x110] sm:$0xff]   ;;  %v1312_v63 = vld [vmem:[%s1436_s3 + $0x118] sm:$0xff]   ;;  %v1314_v1 = vld [vmem:[%s1436_s3 + $0x160] sm:$0xff]  }
  0x39   : > { %1167 = vmatprep.subr.bf16.mxu1 %v1283_v26  ;;  %821 = vmatprep.mubr.bf16.mxu0 %v1060_v45  ;;  %v1309_v60 = vld [vmem:[%s1436_s3 + $0x190] sm:$0xff]   ;;  %v1313_v0 = vld [vmem:[%s1436_s3 + $0x198] sm:$0xff]   ;;  %v1315_v2 = vld [vmem:[%s1436_s3 + $0x1e0] sm:$0xff]  }
  0x3a   : > { %862 = vmatprep.mubr.bf16.mxu1 %v1062_v48  ;;  %v1316_v3 = vld [vmem:[%s1436_s3 + $0x120] sm:$0xff]   ;;  %v1318_v5 = vld [vmem:[%s1436_s3 + $0x168] sm:$0xff]   ;;  %v1322_v9 = vld [vmem:[%s1436_s3 + $0x170] sm:$0xff]  }
  0x3b   : > { %1146 = vmatpush3.bf16.msra.mxu0 %v1284_v27  ;;  %v1317_v4 = vld [vmem:[%s1436_s3 + $0x1a0] sm:$0xff]   ;;  %v1319_v6 = vld [vmem:[%s1436_s3 + $0x1e8] sm:$0xff]   ;;  %v1323_v10 = vld [vmem:[%s1436_s3 + $0x1f0] sm:$0xff]  }
  0x3c   : > { %1168 = vmatpush3.bf16.msra.mxu1 %v1285_v28  ;;  %1147 = vmatprep.subr.bf16.mxu0 %v1286_v29  ;;  %v1320_v7 = vld [vmem:[%s1436_s3 + $0x128] sm:$0xff]   ;;  %v1324_v11 = vld [vmem:[%s1436_s3 + $0x130] sm:$0xff]   ;;  %v1326_v13 = vld [vmem:[%s1436_s3 + $0x178] sm:$0xff]  }
  0x3d   : > { %1169 = vmatprep.subr.bf16.mxu1 %v1287_v30  ;;  %v1321_v8 = vld [vmem:[%s1436_s3 + $0x1a8] sm:$0xff]   ;;  %v1325_v12 = vld [vmem:[%s1436_s3 + $0x1b0] sm:$0xff]   ;;  %v1327_v14 = vld [vmem:[%s1436_s3 + $0x1f8] sm:$0xff]  }
  0x3e   : > { %v1328_v15 = vld [vmem:[%s1436_s3 + $0x138] sm:$0xff]   ;;  %v231_v17 = vld [vmem:[%s1438_s4 + $0x10] sm:$0xff]  ;;  %v232_v21 = vld [vmem:[%s1438_s4 + $0x18] sm:$0xff] }
  0x3f   : > { %1148 = vmatpush3.bf16.msra.mxu0 %v1288_v31  ;;  %v1329_v16 = vld [vmem:[%s1436_s3 + $0x1b8] sm:$0xff]   ;;  %v235_v18 = vld [vmem:[%s1438_s4 + $0x30] sm:$0xff]  ;;  %v236_v22 = vld [vmem:[%s1438_s4 + $0x38] sm:$0xff] }
  0x40   : > { %1170 = vmatpush3.bf16.msra.mxu1 %v1289_v32  ;;  %1149 = vmatprep.subr.bf16.mxu0 %v1290_v33  ;;  %v1063_v19 = vcombine.low %v231_v17, %v235_v18  ;;  %v1064_v20 = vcombine.high %v231_v17, %v235_v18  ;;  %v1065_v23 = vcombine.low %v232_v21, %v236_v22 }
  0x41   : > { %1171 = vmatprep.subr.bf16.mxu1 %v1291_v34  ;;  %v1066_v24 = vcombine.high %v232_v21, %v236_v22 }
  0x43   : > { %1150 = vmatpush3.bf16.msra.mxu0 %v1292_v35 }
  0x44   : > { %1172 = vmatpush3.bf16.msra.mxu1 %v1293_v36  ;;  %1151 = vmatprep.subr.bf16.mxu0 %v1294_v37 }
  0x45   : > { %1173 = vmatprep.subr.bf16.mxu1 %v1295_v38 }
  0x47   : > { %1152 = vmatpush3.bf16.msra.mxu0 %v1296_v39 }
  0x48   : > { %1174 = vmatpush3.bf16.msra.mxu1 %v1297_v40  ;;  %1181 = vmatprep.subr.bf16.mxu0 %v1298_v49 }
  0x49   : > { %1203 = vmatprep.subr.bf16.mxu1 %v1299_v50 }
  0x4a   : > { %822 = vmatmul.mubr.bf16.vlgmr.msra.gmra.mrb[0].mxu0 %v1059_v44 }
  0x4b   : > { %863 = vmatmul.mubr.bf16.vlgmr.msra.gmra.mrb[0].mxu1 %v1061_v47  ;;  %1182 = vmatpush3.bf16.msra.mxu0 %v1300_v51  ;;  %v227_v51 = vld [vmem:[#allocation2] sm:$0xff] }
  0x4c   : > { %1204 = vmatpush3.bf16.msra.mxu1 %v1301_v52  ;;  %1183 = vmatprep.subr.bf16.mxu0 %v1302_v53 }
  0x4d   : > { %1205 = vmatprep.subr.bf16.mxu1 %v1303_v54  ;;  %903 = vmatprep.mubr.bf16.mxu0 %v1064_v20 }
  0x4e   : > { %944 = vmatprep.mubr.bf16.mxu1 %v1066_v24 }
  0x4f   : > { %1184 = vmatpush3.bf16.msra.mxu0 %v1304_v55  ;;  %v228_v55 = vld [vmem:[#allocation2 + $0x8] sm:$0xff] }
  0x50   : > { %1206 = vmatpush3.bf16.msra.mxu1 %v1305_v56  ;;  %1185 = vmatprep.subr.bf16.mxu0 %v1306_v57 }
  0x51   : > { %1207 = vmatprep.subr.bf16.mxu1 %v1307_v58 }
  0x53   : > { %1186 = vmatpush3.bf16.msra.mxu0 %v1308_v59 }
  0x54   : > { %1208 = vmatpush3.bf16.msra.mxu1 %v1309_v60  ;;  %1187 = vmatprep.subr.bf16.mxu0 %v1310_v61 }
  0x55   : > { %1209 = vmatprep.subr.bf16.mxu1 %v1311_v62 }
  0x57   : > { %1188 = vmatpush3.bf16.msra.mxu0 %v1312_v63 }
  0x58   : > { %1210 = vmatpush3.bf16.msra.mxu1 %v1313_v0  ;;  %1189 = vmatprep.subr.bf16.mxu0 %v1314_v1 }
  0x59   : > { %1211 = vmatprep.subr.bf16.mxu1 %v1315_v2 }
  0x5b   : > { %1190 = vmatpush3.bf16.msra.mxu0 %v1316_v3 }
  0x5c   : > { %1212 = vmatpush3.bf16.msra.mxu1 %v1317_v4  ;;  %1191 = vmatprep.subr.bf16.mxu0 %v1318_v5 }
  0x5d   : > { %1213 = vmatprep.subr.bf16.mxu1 %v1319_v6 }
  0x5f   : > { %1192 = vmatpush3.bf16.msra.mxu0 %v1320_v7 }
  0x60   : > { %1214 = vmatpush3.bf16.msra.mxu1 %v1321_v8  ;;  %1193 = vmatprep.subr.bf16.mxu0 %v1322_v9 }
  0x61   : > { %1215 = vmatprep.subr.bf16.mxu1 %v1323_v10 }
  0x63   : > { %1194 = vmatpush3.bf16.msra.mxu0 %v1324_v11 }
  0x64   : > { %1216 = vmatpush3.bf16.msra.mxu1 %v1325_v12  ;;  %1195 = vmatprep.subr.bf16.mxu0 %v1326_v13 }
  0x65   : > { %1217 = vmatprep.subr.bf16.mxu1 %v1327_v14 }
  0x67   : > { %1196 = vmatpush3.bf16.msra.mxu0 %v1328_v15 }
  0x68   : > { %1218 = vmatpush3.bf16.msra.mxu1 %v1329_v16 }
  0x6a   : > { %904 = vmatmul.mubr.bf16.vlgmr.msra.gmra.mrb[4].mxu0 %v1063_v19 }
  0x6b   : > { %945 = vmatmul.mubr.bf16.vlgmr.msra.gmra.mrb[4].mxu1 %v1065_v23 }
 0x11d   : > { %v1153_v25 = vpop.f32.mrb[0].mxu0 }
 0x11e   : > { %v1175_v26 = vpop.f32.mrb[0].mxu1  ;;  %v1154_v27 = vpop.f32.mrb[1].mxu0 }
 0x11f   : > { %v1155_v28 = vadd.f32 %v1154_v27, %v1153_v25  ;;  %v1176_v29 = vpop.f32.mrb[1].mxu1  ;;  %v1156_v30 = vpop.f32.mrb[2].mxu0 }
 0x120   : > { %v1177_v31 = vadd.f32 %v1176_v29, %v1175_v26  ;;  %v1178_v32 = vpop.f32.mrb[2].mxu1  ;;  %v1157_v33 = vpop.f32.mrb[3].mxu0 }
 0x121   : > { %v1158_v34 = vadd.f32 %v1157_v33, %v1156_v30  ;;  %v1179_v35 = vpop.f32.mrb[3].mxu1 }
 0x122   : > { %v865_v36 = vadd.f32 %v1177_v31, %v1155_v28  ;;  %v1180_v37 = vadd.f32 %v1179_v35, %v1178_v32 }
 0x124   : > { %v868_v38 = vadd.f32 %v1180_v37, %v1158_v34 }
 0x13d   : > { %v1197_v39 = vpop.f32.mrb[4].mxu0 }
 0x13e   : > { %v1219_v40 = vpop.f32.mrb[4].mxu1  ;;  %v1198_v41 = vpop.f32.mrb[5].mxu0 }
 0x13f   : > { %v1199_v42 = vadd.f32 %v1198_v41, %v1197_v39  ;;  %v1220_v43 = vpop.f32.mrb[5].mxu1  ;;  %v1200_v44 = vpop.f32.mrb[6].mxu0 }
 0x140   : > { %v1221_v45 = vadd.f32 %v1220_v43, %v1219_v40  ;;  %v1222_v46 = vpop.f32.mrb[6].mxu1  ;;  %v1201_v47 = vpop.f32.mrb[7].mxu0 }
 0x141   : > { %v906_v48 = vadd.f32 %v1199_v42, %v865_v36  ;;  %v1202_v49 = vadd.f32 %v1201_v47, %v1200_v44  ;;  %v1223_v50 = vpop.f32.mrb[7].mxu1 }
 0x142   : > { %v1224_v52 = vadd.f32 %v1223_v50, %v1222_v46 }
 0x143   : > { %v947_v53 = vadd.f32 %v1221_v45, %v906_v48  ;;  %v909_v54 = vadd.f32 %v1202_v49, %v868_v38  ;;  %960 = sbr.rel (%p1131_p11) target bundleno = 338 (0x152), region = 59 }
 0x145   : > { %v953_v56 = vadd.f32 %v947_v53, %v227_v51  ;;  %v950_v57 = vadd.f32 %v1224_v52, %v909_v54 }
 0x147   : > { %955 = vst [vmem:[#allocation2] sm:$0xff] %v953_v56  ;;  %v954_v58 = vadd.f32 %v950_v57, %v228_v55 }
 0x149   : > { %956 = vst [vmem:[#allocation2 + $0x8] sm:$0xff] %v954_v58 }
 0x14e   : > { %v961_v59 = vld [vmem:[#allocation2] sm:$0xff] }
 0x14f   : > { %963 = vst [vmem:[%s1537_s2] sm:$0xff] %v961_v59 }
 0x150   : > { %v962_v60 = vld [vmem:[#allocation2 + $0x8] sm:$0xff] }
 0x151   : > { %964 = vst [vmem:[%s1537_s2 + $0x8] sm:$0xff] %v962_v60 }
 0x152 PF: > { %s12_s13 = sadd.s32 1, %s1368_s13   ;;  %s1538_s9 = smov %s1356_s10 }
 0x153   : > { %p9_p12 = scmp.ge.s32.totalorder %s12_s13, 10   ;;  %s1539_s10 = smov %s1421_s17 }
 0x154   : > { %s1540_s11 = smov %s1364_s12  ;;  %s1541_s12 = smov %s1543_s14 }
 0x155   :  { %11 = sbr.rel (!%p9_p12) target bundleno = 3 (0x3), region = 97 }

</bundles_post_ra>
